<compile_context>
chip_gen: v7x
topology: tpu7x:2x2x1
jax: 0.10.0
libtpu: 0.0.40
codegen_flags: <defaults>
</compile_context>

<pallas_src>
import math

import jax
import jax.numpy as jnp
from jax.experimental import pallas as pl
from jax.experimental.pallas import tpu as pltpu


def _round_up(n, m):
    return ((n + m - 1) // m) * m


# ---------------------------------------------------------------------------
# Kernel: Linear -> (folded) WaveAct -> transposed Linear, fused per row tile.
# ---------------------------------------------------------------------------
def _mlp_kernel(x_ref, w1_ref, b1_ref, w2t_ref, b2_ref, o_ref):
    # x is read from HBM as f32 and cast to bf16 here (cheap VPU work hidden
    # under the tile DMA); dots accumulate in f32 on the MXU.
    x_bf = x_ref[...].astype(jnp.bfloat16)
    h = jnp.dot(x_bf, w1_ref[...],
                preferred_element_type=jnp.float32) + b1_ref[...]

    # Folded WaveAct: amp*sin(h + phase); amp already folded into W2^T, phase
    # into b1. Keep the sin in f32 (v5e-safe), cast result to bf16 for the MXU.
    a = jnp.sin(h).astype(jnp.bfloat16)                      # (tm, d_ff)

    # Lane-dense second GEMM: contract d_ff of W2^T (d_out_p, d_ff) with d_ff of
    # a (tm, d_ff)  ->  (d_out_p, tm). Row indices land on the 128-lane axis, so
    # the store is unmasked and the output block is tiny.
    ot = jax.lax.dot_general(
        w2t_ref[...], a,
        dimension_numbers=(((1,), (1,)), ((), ())),
        preferred_element_type=jnp.float32)                   # (d_out_p, tm)

    o_ref[...] = ot + b2_ref[...]


# ---------------------------------------------------------------------------
# Wrapper
# ---------------------------------------------------------------------------
def mlp_forward(params, x, *, tm=2048):
    """MLP forward: x [..., d_input] -> [..., d_output]."""
    w1 = params["w1"]            # (d_in, d_ff)
    b1 = params["b1"]            # (d_ff,)
    w2 = params["w2"]            # (d_ff, d_out)
    b2 = params["b2"]            # (d_out,)
    wave1 = params["wave1"]      # WaveAct scalars
    wave2 = params["wave2"]

    d_in, d_ff = w1.shape
    d_out = w2.shape[1]

    # ---- fold WaveAct into the surrounding linears (wrapper-side, one-off) ----
    amp = jnp.sqrt(wave1 * wave1 + wave2 * wave2)
    phase = jnp.arctan2(wave2, wave1)
    b1_eff = (b1.astype(jnp.float32) + phase).reshape(1, d_ff)

    # ---- transposed second weight (amp folded in), d_out padded to a sublane
    #      multiple (8) so the small-M matmul / output block are well formed ----
    d_out_p = _round_up(d_out, 8)
    w2t = (w2.astype(jnp.float32) * amp).T                    # (d_out, d_ff)
    if d_out_p != d_out:
        w2t = jnp.pad(w2t, ((0, d_out_p - d_out), (0, 0)))
        b2_p = jnp.pad(b2.astype(jnp.float32), (0, d_out_p - d_out))
    else:
        b2_p = b2.astype(jnp.float32)
    b2_p = b2_p.reshape(d_out_p, 1)

    # bf16 MXU weights (tiny one-off casts). Activations stay f32 in HBM.
    w1_bf = w1.astype(jnp.bfloat16)
    w2t_bf = w2t.astype(jnp.bfloat16)

    # ---- row tiling: tm multiple of 128 (rows pack the output lane axis);
    #      keep >= 2 grid steps when there is enough work (v7x megacore) ----
    lead = x.shape[:-1]
    x2 = x.reshape(-1, d_in)
    n = x2.shape[0]

    num_tiles = max(1, pl.cdiv(n, max(128, tm)))
    if num_tiles == 1 and n > 128:
        num_tiles = 2                      # shard across v7x's two TensorCores
    tm_eff = _round_up(pl.cdiv(n, num_tiles), 128)
    n_p = num_tiles * tm_eff
    if n_p != n:
        # TODO(synk): tail-only pad would avoid a full copy of x for huge n;
        # padding here is at most one partial tile of extra rows.
        x2 = jnp.pad(x2, ((0, n_p - n), (0, 0)))

    out = pl.pallas_call(
        _mlp_kernel,
        grid=(num_tiles,),
        in_specs=[
            pl.BlockSpec((tm_eff, d_in), lambda i: (i, 0)),    # x row tile (f32)
            pl.BlockSpec((d_in, d_ff), lambda i: (0, 0)),      # W1 (bf16, resident)
            pl.BlockSpec((1, d_ff), lambda i: (0, 0)),         # b1 + phase (f32)
            pl.BlockSpec((d_out_p, d_ff), lambda i: (0, 0)),   # amp*W2^T (bf16, resident)
            pl.BlockSpec((d_out_p, 1), lambda i: (0, 0)),      # b2 (f32)
        ],
        out_specs=pl.BlockSpec((d_out_p, tm_eff), lambda i: (0, i)),
        out_shape=jax.ShapeDtypeStruct((d_out_p, n_p), jnp.float32),
        compiler_params=pltpu.CompilerParams(
            dimension_semantics=("parallel",),     # row tiles across TCs (v7x)
            vmem_limit_bytes=32 * 1024 * 1024,     # safe on v5e/v6e/v7x
        ),
    )(x2, w1_bf, b1_eff, w2t_bf, b2_p)

    # Lane-packed result is tiny (d_out_p x n_p f32): slice + transpose is noise.
    return out[:d_out, :n].T.reshape(*lead, d_out)


# ---------------------------------------------------------------------------
# Params / pure-JAX reference (matches the torch module semantics)
# ---------------------------------------------------------------------------
def init_mlp_params(key, d_input, d_output, d_ff=256):
    k1, k2, k3, k4 = jax.random.split(key, 4)
    lim1 = 1.0 / math.sqrt(d_input)
    lim2 = 1.0 / math.sqrt(d_ff)
    return {
        "w1": jax.random.uniform(k1, (d_input, d_ff), jnp.float32, -lim1, lim1),
        "b1": jax.random.uniform(k2, (d_ff,), jnp.float32, -lim1, lim1),
        "w2": jax.random.uniform(k3, (d_ff, d_output), jnp.float32, -lim2, lim2),
        "b2": jax.random.uniform(k4, (d_output,), jnp.float32, -lim2, lim2),
        "wave1": jnp.float32(1.0),   # WaveAct params (torch init: ones)
        "wave2": jnp.float32(1.0),
    }


def mlp_reference(params, x):
    h = x @ params["w1"] + params["b1"]
    a = params["wave1"] * jnp.sin(h) + params["wave2"] * jnp.cos(h)
    return a @ params["w2"] + params["b2"]


# ---------------------------------------------------------------------------
# Example run
# ---------------------------------------------------------------------------
if __name__ == "__main__":
    d_input, d_ff, d_output = 32, 256, 1
    key = jax.random.PRNGKey(0)
    pkey, xkey, xkey2 = jax.random.split(key, 3)
    params = init_mlp_params(pkey, d_input, d_output, d_ff)

    # Small shape consistent with the module (single-tile path).
    B, S = 2, 12
    x = jax.random.normal(xkey, (B, S, d_input), jnp.float32)
    out = mlp_forward(params, x)
    jax.block_until_ready(out)
    ref = mlp_reference(params, x)
    err = float(jnp.max(jnp.abs(out - ref)) / (jnp.max(jnp.abs(ref)) + 1e-6))
    assert out.shape == (B, S, d_output)
    assert bool(jnp.all(jnp.isfinite(out)))
    assert err < 0.1, f"max relative error too large: {err}"

    # Slightly larger run to exercise the multi-tile (>=2 grid steps) path.
    x2 = jax.random.normal(xkey2, (2, 200, d_input), jnp.float32)
    out2 = mlp_forward(params, x2)
    jax.block_until_ready(out2)
    ref2 = mlp_reference(params, x2)
    err2 = float(jnp.max(jnp.abs(out2 - ref2)) / (jnp.max(jnp.abs(ref2)) + 1e-6))
    assert out2.shape == (2, 200, d_output)
    assert bool(jnp.all(jnp.isfinite(out2)))
    assert err2 < 0.1, f"max relative error too large (tiled): {err2}"

    print("KERNEL_OK")
</pallas_src>

<mosaic_0001>
module attributes {stable_mosaic.version = 11 : i64} {
  func.func @_mlp_kernel(%arg0: i32, %arg1: memref<128x32xf32, #tpu.memory_space<vmem>>, %arg2: memref<32x256xbf16, #tpu.memory_space<vmem>>, %arg3: memref<1x256xf32, #tpu.memory_space<vmem>>, %arg4: memref<8x256xbf16, #tpu.memory_space<vmem>>, %arg5: memref<8x1xf32, #tpu.memory_space<vmem>>, %arg6: memref<8x128xf32, #tpu.memory_space<vmem>>) attributes {dimension_semantics = [#tpu.dimension_semantics<parallel>], iteration_bounds = array<i64: 1>, scalar_prefetch = 0 : i64, scratch_operands = 0 : i64, tpu.core_type = #tpu.core_type<tc>, window_params = [{transform_indices = @transform_0, window_bounds = array<i64: 128, 32>}, {pipeline_mode = #tpu.pipeline_mode<synchronous>, transform_indices = @transform_1, window_bounds = array<i64: 32, 256>}, {pipeline_mode = #tpu.pipeline_mode<synchronous>, transform_indices = @transform_2, window_bounds = array<i64: 1, 256>}, {pipeline_mode = #tpu.pipeline_mode<synchronous>, transform_indices = @transform_3, window_bounds = array<i64: 8, 256>}, {pipeline_mode = #tpu.pipeline_mode<synchronous>, transform_indices = @transform_4, window_bounds = array<i64: 8, 1>}, {transform_indices = @transform_5, window_bounds = array<i64: 8, 128>}]} {
    %c0 = arith.constant 0 : index
    %c0_0 = arith.constant 0 : index
    %0 = vector.load %arg1[%c0, %c0_0] : memref<128x32xf32, #tpu.memory_space<vmem>>, vector<128x32xf32>
    %1 = arith.truncf %0 : vector<128x32xf32> to vector<128x32xbf16>
    %c0_1 = arith.constant 0 : index
    %c0_2 = arith.constant 0 : index
    %2 = vector.load %arg2[%c0_1, %c0_2] : memref<32x256xbf16, #tpu.memory_space<vmem>>, vector<32x256xbf16>
    %cst = arith.constant dense<0.000000e+00> : vector<128x256xf32>
    %3 = tpu.matmul %1, %2, %cst {dimension_numbers = #tpu.dot_dimension_numbers<[1], [0], [0], [1], [0, 0, 1, 1], [], []>} : vector<128x32xbf16>, vector<32x256xbf16>, vector<128x256xf32> -> vector<128x256xf32>
    %c0_3 = arith.constant 0 : index
    %c0_4 = arith.constant 0 : index
    %4 = vector.load %arg3[%c0_3, %c0_4] : memref<1x256xf32, #tpu.memory_space<vmem>>, vector<1x256xf32>
    %5 = vector.broadcast %4 : vector<1x256xf32> to vector<128x256xf32>
    %6 = arith.addf %3, %5 : vector<128x256xf32>
    %7 = math.sin %6 : vector<128x256xf32>
    %8 = arith.truncf %7 : vector<128x256xf32> to vector<128x256xbf16>
    %c0_5 = arith.constant 0 : index
    %c0_6 = arith.constant 0 : index
    %9 = vector.load %arg4[%c0_5, %c0_6] : memref<8x256xbf16, #tpu.memory_space<vmem>>, vector<8x256xbf16>
    %cst_7 = arith.constant dense<0.000000e+00> : vector<8x128xf32>
    %10 = tpu.matmul %9, %8, %cst_7 {dimension_numbers = #tpu.dot_dimension_numbers<[1], [1], [0], [0], [0, 0, 1, 0], [], []>} : vector<8x256xbf16>, vector<128x256xbf16>, vector<8x128xf32> -> vector<8x128xf32>
    %c0_8 = arith.constant 0 : index
    %c0_9 = arith.constant 0 : index
    %11 = vector.load %arg5[%c0_8, %c0_9] : memref<8x1xf32, #tpu.memory_space<vmem>>, vector<8x1xf32>
    %12 = vector.broadcast %11 : vector<8x1xf32> to vector<8x128xf32>
    %13 = arith.addf %10, %12 : vector<8x128xf32>
    %c0_10 = arith.constant 0 : index
    %c0_11 = arith.constant 0 : index
    %14 = vector.load %arg6[%c0_10, %c0_11] : memref<8x128xf32, #tpu.memory_space<vmem>>, vector<8x128xf32>
    tpu.vector_store %arg6[%c0_10, %c0_11], %13 {strides = array<i32>} : memref<8x128xf32, #tpu.memory_space<vmem>>, vector<8x128xf32>,
    return
  }
  func.func @transform_0(%arg0: i32) -> (i32, i32) {
    %c0_i32 = arith.constant 0 : i32
    %c0_i32_0 = arith.constant 0 : i32
    return %arg0, %c0_i32 : i32, i32
  }
  func.func @transform_1(%arg0: i32) -> (i32, i32) {
    %c0_i32 = arith.constant 0 : i32
    %c0_i32_0 = arith.constant 0 : i32
    %c0_i32_1 = arith.constant 0 : i32
    return %c0_i32, %c0_i32_0 : i32, i32
  }
  func.func @transform_2(%arg0: i32) -> (i32, i32) {
    %c0_i32 = arith.constant 0 : i32
    %c0_i32_0 = arith.constant 0 : i32
    %c0_i32_1 = arith.constant 0 : i32
    return %c0_i32, %c0_i32_0 : i32, i32
  }
  func.func @transform_3(%arg0: i32) -> (i32, i32) {
    %c0_i32 = arith.constant 0 : i32
    %c0_i32_0 = arith.constant 0 : i32
    %c0_i32_1 = arith.constant 0 : i32
    return %c0_i32, %c0_i32_0 : i32, i32
  }
  func.func @transform_4(%arg0: i32) -> (i32, i32) {
    %c0_i32 = arith.constant 0 : i32
    %c0_i32_0 = arith.constant 0 : i32
    %c0_i32_1 = arith.constant 0 : i32
    return %c0_i32, %c0_i32_0 : i32, i32
  }
  func.func @transform_5(%arg0: i32) -> (i32, i32) {
    %c0_i32 = arith.constant 0 : i32
    %c0_i32_0 = arith.constant 0 : i32
    return %c0_i32, %arg0 : i32, i32
  }
}

</mosaic_0001>

<bundles_post_ra>
// kernel: tpu_custom_call.1
= control target key start
LH: loop header
LB: loop body
LE: loop exit
PB: predicated region body
PF: predicated region fallthrough
CT: control target
= control target key end

     0   :  { %v4072_v2 = vmov 0   ;;  %vm82_vm0 = vcmask 261120   ;;  %s7376_s0 = inlined_call_operand.vmem [shape: f32[128,32], index: 0, kind: input, shape index: {}]   ;;  %s7377_s1 = inlined_call_operand.vmem [shape: bf16[32,256], index: 1, kind: input, shape index: {}]   ;;  %s7378_s2 = inlined_call_operand.vmem [shape: f32[1,256], index: 2, kind: input, shape index: {}]   ;;  %s7379_s3 = inlined_call_operand.vmem [shape: bf16[8,256], index: 3, kind: input, shape index: {}]   ;;  %s7380_s4 = inlined_call_operand.vmem [shape: f32[8,1], index: 4, kind: input, shape index: {}]   ;;  %s7381_s5 = inlined_call_operand.hbm [shape: f32[8,128], index: 5, kind: output, shape index: {}]  }
   0x1   :  { %v3912_v0 = vld [vmem:[%s7377_s1 + $0x4] ss:$8 sps:$4 sm:$0xff]   ;;  %v3914_v1 = vld [vmem:[%s7377_s1] ss:$8 sps:$4 sm:$0xff]   ;;  %139 = vmatprep.mubr.bf16.mxu0 %v4072_v2  ;;  %3911 = vset.pattern.permute.xlu0 %v4072_v2  ;;  %v3915_v3 = vld [vmem:[%s7377_s1 + $0x14] ss:$8 sps:$4 sm:$0xff]  }
   0x2   :  { %107 = vmatprep.subr.bf16.mxu0 %v3912_v0  ;;  %v3917_v4 = vld [vmem:[%s7377_s1 + $0x10] ss:$8 sps:$4 sm:$0xff]   ;;  %v22_v5 = vld [vmem:[%s7376_s0] sm:$0xff]  ;;  %v23_v6 = vld [vmem:[%s7376_s0 + $0x8] sm:$0xff] }
   0x3   :  { %108 = vmatpush1.bf16.msra.mxu0 %v3914_v1  ;;  %v38_v7 = vpack.c.bf16 %v23_v6, %v22_v5 }
   0x4   :  { %109 = vmatprep.subr.bf16.mxu0 %v3915_v3 }
   0x7   :  { %110 = vmatpush1.bf16.msra.mxu0 %v3917_v4 }
   0x8   :  { %10 = vsyncpa [#allocation3], 0  ;;  %v24_v8 = vld [vmem:[%s7376_s0 + $0x10] sm:$0xff]  ;;  %v25_v9 = vld [vmem:[%s7376_s0 + $0x18] sm:$0xff]  ;;  %v52_v29 = vlaneseq  ;;  %v7396_v61 = vmov 683565275  }
   0x9   :  { %v39_v10 = vpack.c.bf16 %v25_v9, %v24_v8  ;;  %v26_v11 = vld [vmem:[%s7376_s0 + $0x20] sm:$0xff]  ;;  %v27_v12 = vld [vmem:[%s7376_s0 + $0x28] sm:$0xff]  ;;  %v28_v14 = vld [vmem:[%s7376_s0 + $0x30] sm:$0xff]  ;;  %v7388_v63 = vmov 2475754826  }
   0xa   :  { %3637 = vmatmul.mubr.msk.bf16.vlgmr.msra.gmra.mrb[0].mxu0 %vm82_vm0, %v38_v7  ;;  %v40_v13 = vpack.c.bf16 %v27_v12, %v26_v11  ;;  %v29_v15 = vld [vmem:[%s7376_s0 + $0x38] sm:$0xff]  ;;  %v30_v17 = vld [vmem:[%s7376_s0 + $0x40] sm:$0xff]  ;;  %v31_v18 = vld [vmem:[%s7376_s0 + $0x48] sm:$0xff]  ;;  %v53_v30 = vshrl.u32 %v52_v29, 7  ;;  %v7386_v3 = vmov 2131351028  }
   0xb   :  { %149 = vmatprep.mubr.bf16.mxu0 %v4072_v2  ;;  %v41_v16 = vpack.c.bf16 %v29_v15, %v28_v14  ;;  %v42_v19 = vpack.c.bf16 %v31_v18, %v30_v17  ;;  %v32_v20 = vld [vmem:[%s7376_s0 + $0x50] sm:$0xff]  ;;  %v33_v21 = vld [vmem:[%s7376_s0 + $0x58] sm:$0xff]  ;;  %v34_v23 = vld [vmem:[%s7376_s0 + $0x60] sm:$0xff]  ;;  %v7390_v6 = vmov 2102212464  }
   0xc   :  { %v43_v22 = vpack.c.bf16 %v33_v21, %v32_v20  ;;  %v35_v24 = vld [vmem:[%s7376_s0 + $0x68] sm:$0xff]  ;;  %v36_v26 = vld [vmem:[%s7376_s0 + $0x70] sm:$0xff]  ;;  %v37_v27 = vld [vmem:[%s7376_s0 + $0x78] sm:$0xff]  ;;  %v54_v31 = vsub.s32 0, %v53_v30  ;;  %v58_v43 = vsub.s32 1, %v53_v30 }
   0xd   :  { %v44_v25 = vpack.c.bf16 %v35_v24, %v34_v23  ;;  %v45_v28 = vpack.c.bf16 %v37_v27, %v36_v26  ;;  %v50_v32 = vld [vmem:[%s7378_s2] sm:$0x3] }
   0xe   :  { %v4181_v33 = vrot.slane %v50_v32, %v54_v31  ;;  %v4200_v50 = vrot.slane %v50_v32, %v58_v43 }
  0x12   :  { %3638 = vmatmul.mubr.msk.bf16.gmra.mrb[4].mxu0 %vm82_vm0, %v39_v10  ;;  %v7394_v10 = vmov 920167782  }
  0x13   :  { %159 = vmatprep.mubr.bf16.mxu0 %v4072_v2 }
  0x1a   :  { %3639 = vmatmul.mubr.msk.bf16.gmra.mrb[8].mxu0 %vm82_vm0, %v40_v13  ;;  %v7392_v13 = vmov 1326507024  }
  0x1b   :  { %169 = vmatprep.mubr.bf16.mxu0 %v4072_v2 }
  0x22   :  { %3640 = vmatmul.mubr.msk.bf16.gmra.mrb[12].mxu0 %vm82_vm0, %v41_v16 }
  0x23   :  { %179 = vmatprep.mubr.bf16.mxu0 %v4072_v2 }
  0x2a   :  { %3641 = vmatmul.mubr.msk.bf16.gmra.mrb[16].mxu0 %vm82_vm0, %v42_v19 }
  0x2b   :  { %189 = vmatprep.mubr.bf16.mxu0 %v4072_v2 }
  0x32   :  { %3642 = vmatmul.mubr.msk.bf16.gmra.mrb[20].mxu0 %vm82_vm0, %v43_v22 }
  0x33   :  { %199 = vmatprep.mubr.bf16.mxu0 %v4072_v2 }
  0x3a   :  { %3643 = vmatmul.mubr.msk.bf16.gmra.mrb[24].mxu0 %vm82_vm0, %v44_v25 }
  0x3b   :  { %209 = vmatprep.mubr.bf16.mxu0 %v4072_v2 }
  0x42   :  { %3644 = vmatmul.mubr.msk.bf16.gmra.mrb[28].mxu0 %vm82_vm0, %v45_v28 }
  0xdd   :  { %v141_v34 = vpop.f32.mrb[0].mxu0 }
  0xde   :  { %v4184_v35 = vadd.f32 %v141_v34, %v4181_v33  ;;  %v143_v36 = vpop.f32.mrb[1].mxu0 }
  0xdf   :  { %v145_v37 = vpop.f32.mrb[2].mxu0  ;;  %v4207_v57 = vadd.f32 %v143_v36, %v4200_v50 }
  0xe0   :  { %7648 = vst [vmem:[#allocation5_spill] sm:$0xff] %v4184_v35  ;;  %v223_v38 = vand.u32 2139095040, %v4184_v35  ;;  %v4188_v39 = vadd.f32 %v145_v37, %v4181_v33  ;;  %v4190_v40 = vpop.f32.mrb[3].mxu0  ;;  %v7383_v45 = vand.u32 2147483647, %v4184_v35 }
  0xe1   :  { %7650 = vst [vmem:[#allocation7_spill] sm:$0xff] %v4207_v57  ;;  %v327_v43 = vand.u32 2139095040, %v4207_v57 }
  0xe2   :  { %7649 = vst [vmem:[#allocation6_spill] sm:$0xff] %v4188_v39  ;;  %v224_v41 = vshrl.u32 %v223_v38, 23  ;;  %v431_v44 = vand.u32 2139095040, %v4188_v39  ;;  %v227_v53 = vand.u32 8388607, %v7383_v45 }
  0xe4   :  { %v3645_v42 = vadd.s32 4294967169, %v224_v41  ;;  %v432_v51 = vshrl.u32 %v431_v44, 23  ;;  %v228_v59 = vor.u32 8388608, %v227_v53  ;;  %v4236_v53 = vadd.f32 %v4190_v40, %v4200_v50 }
  0xe5   :  { %v4194_v46 = vpop.f32.mrb[4].mxu0 }
  0xe6   :  { %v230_v47 = vadd.s32 1, %v3645_v42  ;;  %v4196_v48 = vpop.f32.mrb[5].mxu0  ;;  %v3653_v58 = vadd.s32 4294967169, %v432_v51  ;;  %v268_v24 = vshll.u32 %v228_v59, 8  ;;  %7651 = vst [vmem:[#allocation8_spill] sm:$0xff] %v4236_v53  ;;  %v328_v59 = vshrl.u32 %v327_v43, 23 }
  0xe7   :  { %v4198_v49 = vpop.f32.mrb[6].mxu0 }
  0xe8   :  { %vm231_vm1 = vcmp.gt.s32.totalorder %v230_v47, 0  ;;  %v4202_v52 = vpop.f32.mrb[7].mxu0  ;;  %v438_v18 = vadd.s32 1, %v3653_v58 }
  0xe9   :  { %v232_v54 = vsel %vm231_vm1, %v230_v47, 0 }
  0xea   :  { %v234_v55 = vand.u32 31, %v232_v54  ;;  %v233_v60 = vshrl.u32 %v232_v54, 5  ;;  %vm439_vm6 = vcmp.gt.s32.totalorder %v438_v18, 0 }
  0xeb   :  { %v440_v44 = vsel %vm439_vm6, %v438_v18, 0 }
  0xec   :  { %v235_v56 = vsub.s32 32, %v234_v55  ;;  %v237_v62 = vshll.u32 %v7396_v61, %v234_v55  ;;  %v240_v0 = vshll.u32 %v7388_v63, %v234_v55  ;;  %v243_v5 = vshll.u32 %v7386_v3, %v234_v55 }
  0xed   :  { %v4211_v1 = vpop.f32.mrb[8].mxu0  ;;  %v246_v9 = vshll.u32 %v7390_v6, %v234_v55  ;;  %v249_v12 = vshll.u32 %v7394_v10, %v234_v55  ;;  %vm252_vm2 = vcmp.lt.s32.totalorder %v233_v60, 1  ;;  %vm255_vm3 = vcmp.lt.s32.totalorder %v233_v60, 4 }
  0xee   :  { %v238_v2 = vshrl.u32 %v7388_v63, %v235_v56  ;;  %v241_v4 = vshrl.u32 %v7386_v3, %v235_v56  ;;  %v244_v7 = vshrl.u32 %v7390_v6, %v235_v56  ;;  %v4217_v8 = vpop.f32.mrb[9].mxu0  ;;  %v247_v11 = vshrl.u32 %v7394_v10, %v235_v56 }
  0xef   :  { %v250_v14 = vshrl.u32 %v7392_v13, %v235_v56  ;;  %v4223_v25 = vpop.f32.mrb[10].mxu0  ;;  %v236_v26 = vshrl.u32 %v7396_v61, %v235_v56  ;;  %vm254_vm4 = vcmp.lt.s32.totalorder %v233_v60, 3  ;;  %vm253_vm5 = vcmp.lt.s32.totalorder %v233_v60, 2 }
  0xf0   :  { %v239_v15 = vor.u32 %v238_v2, %v237_v62  ;;  %v242_v16 = vor.u32 %v241_v4, %v240_v0  ;;  %v245_v17 = vor.u32 %v244_v7, %v243_v5  ;;  %v248_v19 = vor.u32 %v247_v11, %v246_v9 }
  0xf1   :  { %v251_v20 = vor.u32 %v250_v14, %v249_v12  ;;  %v442_v51 = vand.u32 31, %v440_v44  ;;  %v7382_v55 = vand.u32 2147483647, %v4188_v39  ;;  %v4242_v60 = vshrl.u32 %v440_v44, 5 }
  0xf2   :  { %v257_v21 = vsel %vm255_vm3, %v245_v17, 2102212464  ;;  %v260_v22 = vsel %vm252_vm2, %v239_v15, %v242_v16  ;;  %v264_v23 = vsel %vm252_vm2, %v242_v16, %v245_v17  ;;  %v261_v27 = vsel %vm255_vm3, %v248_v19, 920167782 }
  0xf3   :  { %v265_v28 = vsel %vm255_vm3, %v251_v20, 1326507024  ;;  %v262_v29 = vsel %vm254_vm4, %v245_v17, %v261_v27  ;;  %v256_v31 = vsel %vm252_vm2, %v236_v26, %v239_v15  ;;  %v258_v32 = vsel %vm254_vm4, %v242_v16, %v257_v21 }
  0xf4   :  { %v266_v30 = vsel %vm254_vm4, %v248_v19, %v265_v28  ;;  %v263_v34 = vsel %vm253_vm5, %v260_v22, %v262_v29  ;;  %v259_v47 = vsel %vm253_vm5, %v256_v31, %v258_v32  ;;  %v443_v56 = vsub.s32 32, %v442_v51 }
  0xf5   :  { %v267_v36 = vsel %vm253_vm5, %v264_v23, %v266_v30  ;;  %v4229_v41 = vmul.u32.u64.low %v268_v24, %v263_v34  ;;  %v4230_v42 = vmul.u32.u64.high %v268_v24, %v263_v34, %v4229_v41  ;;  %v275_v58 = vmul.u32 %v268_v24, %v259_v47  ;;  %v4276_v34 = vpop.f32.mrb[11].mxu0 }
  0xf6   :  { %v4226_v37 = vmul.u32.u64.low %v268_v24, %v267_v36  ;;  %v4227_v38 = vmul.u32.u64.high %v268_v24, %v267_v36, %v4226_v37  ;;  %v4246_v62 = vadd.f32 %v4194_v46, %v4181_v33  ;;  %v445_v40 = vshll.u32 %v7396_v61, %v442_v51 }
  0xf7   :  { %v278_v54 = vadd.s32 1, %v4230_v42  ;;  %v446_v2 = vshrl.u32 %v7388_v63, %v443_v56  ;;  %v449_v4 = vshrl.u32 %v7386_v3, %v443_v56  ;;  %v452_v7 = vshrl.u32 %v7390_v6, %v443_v56 }
  0xf8   :  { %vm277_vm7 = vc.u32 %v4227_v38, %v4229_v41  ;;  %7652 = vst [vmem:[#allocation9_spill] sm:$0xff] %v4246_v62  ;;  %v454_v9 = vshll.u32 %v7390_v6, %v442_v51  ;;  %v455_v11 = vshrl.u32 %v7394_v10, %v443_v56  ;;  %v448_v12 = vshll.u32 %v7388_v63, %v442_v51 }
  0xf9   :  { %v279_v0 = vsel %vm277_vm7, %v278_v54, %v4230_v42  ;;  %v451_v46 = vshll.u32 %v7386_v3, %v442_v51  ;;  %v457_v14 = vshll.u32 %v7394_v10, %v442_v51  ;;  %v458_v15 = vshrl.u32 %v7392_v13, %v443_v56 }
  0xfa   :  { %v280_v5 = vadd.s32 %v279_v0, %v275_v58  ;;  %v435_v17 = vand.u32 8388607, %v7382_v55  ;;  %v447_v18 = vor.u32 %v446_v2, %v445_v40  ;;  %v456_v19 = vor.u32 %v455_v11, %v454_v9 }
  0xfb   :  { %v450_v20 = vor.u32 %v449_v4, %v448_v12  ;;  %v453_v21 = vor.u32 %v452_v7, %v451_v46  ;;  %v459_v22 = vor.u32 %v458_v15, %v457_v14  ;;  %vm463_vm8 = vcmp.lt.s32.totalorder %v4242_v60, 4 }
  0xfc   :  { %v281_v16 = vadd.s32 536870912, %v280_v5  ;;  %v469_v23 = vsel %vm463_vm8, %v456_v19, 920167782  ;;  %v3649_v24 = vadd.s32 4294967169, %v328_v59  ;;  %v639_v26 = vand.u32 2139095040, %v4246_v62 }
  0xfd   :  { %vm460_vm9 = vcmp.lt.s32.totalorder %v4242_v60, 1  ;;  %vm462_vm10 = vcmp.lt.s32.totalorder %v4242_v60, 3  ;;  %v535_v28 = vand.u32 2139095040, %v4236_v53  ;;  %v436_v29 = vor.u32 8388608, %v435_v17 }
  0xfe   :  { %v4265_v27 = vshrl.u32 %v281_v16, 30  ;;  %v468_v30 = vsel %vm460_vm9, %v447_v18, %v450_v20  ;;  %v470_v31 = vsel %vm462_vm10, %v453_v21, %v469_v23  ;;  %v473_v32 = vsel %vm463_vm8, %v459_v22, 1326507024 }
  0xff   :  { %v334_v36 = vadd.s32 1, %v3649_v24  ;;  %vm461_vm11 = vcmp.lt.s32.totalorder %v4242_v60, 2  ;;  %v640_v37 = vshrl.u32 %v639_v26, 23  ;;  %v472_v44 = vsel %vm460_vm9, %v450_v20, %v453_v21 }
 0x100   :  { %7653 = vst [vmem:[#allocation10_spill] sm:$0xff] %v4265_v27  ;;  %v283_v42 = vshll.u32 %v4265_v27, 30  ;;  %v471_v43 = vsel %vm461_vm11, %v468_v30, %v470_v31  ;;  %v474_v47 = vsel %vm462_vm10, %v456_v19, %v473_v32  ;;  %v4286_v51 = vshll.u32 %v436_v29, 8 }
 0x101   :  { %v536_v54 = vshrl.u32 %v535_v28, 23  ;;  %v3661_v58 = vadd.s32 4294967169, %v640_v37  ;;  %v475_v59 = vsel %vm461_vm11, %v472_v44, %v474_v47  ;;  %vm335_vm12 = vcmp.gt.s32.totalorder %v334_v36, 0 }
 0x102   :  { %v4291_v0 = vmul.u32.u64.low %v4286_v51, %v471_v43  ;;  %v4292_v40 = vmul.u32.u64.high %v4286_v51, %v471_v43, %v4291_v0  ;;  %v4295_v4 = vsub.s32 %v280_v5, %v283_v42  ;;  %v465_v7 = vsel %vm463_vm8, %v453_v21, 2102212464 }
 0x103   :  { %v646_v2 = vadd.s32 1, %v3661_v58  ;;  %v3657_v9 = vadd.s32 4294967169, %v536_v54  ;;  %v7385_v11 = vand.u32 2147483647, %v4246_v62  ;;  %v444_v12 = vshrl.u32 %v7396_v61, %v443_v56 }
 0x104   :  { %v4302_v46 = vmul.u32.u64.low %v4286_v51, %v475_v59  ;;  %v4303_v14 = vmul.u32.u64.high %v4286_v51, %v475_v59, %v4302_v46  ;;  %v4305_v16 = vsel %vm335_vm12, %v334_v36, 0  ;;  %v286_v5 = vsub.s32 0, %v4295_v4 }
 0x105   :  { %vm647_vm13 = vcmp.gt.s32.totalorder %v646_v2, 0  ;;  %v464_v19 = vsel %vm460_vm9, %v444_v12, %v447_v18  ;;  %v466_v21 = vsel %vm462_vm10, %v450_v20, %v465_v7  ;;  %v542_v22 = vadd.s32 1, %v3657_v9 }
 0x106   :  { %v648_v15 = vsel %vm647_vm13, %v646_v2, 0  ;;  %v4314_v56 = vadd.f32 %v4196_v48, %v4200_v50  ;;  %v4317_v24 = vand.u32 31, %v4305_v16  ;;  %v643_v26 = vand.u32 8388607, %v7385_v11 }
 0x107   :  { %v650_v17 = vand.u32 31, %v648_v15  ;;  %v467_v28 = vsel %vm461_vm11, %v464_v19, %v466_v21  ;;  %v486_v18 = vadd.s32 1, %v4292_v40  ;;  %v3646_v30 = vmin.u32 %v286_v5, %v4295_v4 }
 0x108   :  { %7654 = vst [vmem:[#allocation11_spill] sm:$0xff] %v4314_v56  ;;  %7655 = vst [vmem:[#allocation12_spill] sm:$0xff] %v4317_v24  ;;  %vm543_vm14 = vcmp.gt.s32.totalorder %v542_v22, 0  ;;  %v743_v42 = vand.u32 2139095040, %v4314_v56  ;;  %vm485_vm15 = vc.u32 %v4303_v14, %v4291_v0  ;;  %v649_v43 = vshrl.u32 %v648_v15, 5 }
 0x109   :  { %v651_v23 = vsub.s32 32, %v650_v17  ;;  %v653_v48 = vshll.u32 %v7396_v61, %v650_v17  ;;  %v656_v31 = vshll.u32 %v7388_v63, %v650_v17  ;;  %v659_v36 = vshll.u32 %v7386_v3, %v650_v17 }
 0x10a   :  { %v662_v60 = vshll.u32 %v7390_v6, %v650_v17  ;;  %v665_v59 = vshll.u32 %v7394_v10, %v650_v17  ;;  %v4339_v7 = vsub.s32 32, %v4317_v24  ;;  %v350_v9 = vshll.u32 %v7390_v6, %v4317_v24 }
 0x10b   :  { %v654_v29 = vshrl.u32 %v7388_v63, %v651_v23  ;;  %v657_v20 = vshrl.u32 %v7386_v3, %v651_v23  ;;  %v660_v32 = vshrl.u32 %v7390_v6, %v651_v23  ;;  %v663_v37 = vshrl.u32 %v7394_v10, %v651_v23 }
 0x10c   :  { %v666_v2 = vshrl.u32 %v7392_v13, %v651_v23  ;;  %7656 = vst [vmem:[#allocation13_spill] sm:$0xff] %v4339_v7  ;;  %v483_v12 = vmul.u32 %v4286_v51, %v467_v28  ;;  %v644_v46 = vor.u32 8388608, %v643_v26  ;;  %v487_v5 = vsel %vm485_vm15, %v486_v18, %v4292_v40 }
 0x10d   :  { %v655_v44 = vor.u32 %v654_v29, %v653_v48  ;;  %v658_v47 = vor.u32 %v657_v20, %v656_v31  ;;  %v661_v54 = vor.u32 %v660_v32, %v659_v36  ;;  %v664_v58 = vor.u32 %v663_v37, %v662_v60 }
 0x10e   :  { %v667_v15 = vor.u32 %v666_v2, %v665_v59  ;;  %v7384_v19 = vand.u32 2147483647, %v4314_v56  ;;  %v744_v21 = vshrl.u32 %v743_v42, 23  ;;  %v288_v29 = vclz %v3646_v30  ;;  %v4358_v59 = vpop.f32.mrb[12].mxu0 }
 0x10f   :  { %vm668_vm0 = vcmp.lt.s32.totalorder %v649_v43, 1  ;;  %vm670_vm1 = vcmp.lt.s32.totalorder %v649_v43, 3  ;;  %vm671_vm2 = vcmp.lt.s32.totalorder %v649_v43, 4  ;;  %v4348_v32 = vadd.s32 %v487_v5, %v483_v12 }
 0x110   :  { %v676_v17 = vsel %vm668_vm0, %v655_v44, %v658_v47  ;;  %v677_v20 = vsel %vm671_vm2, %v664_v58, 920167782  ;;  %v680_v48 = vsel %vm668_vm0, %v658_v47, %v661_v54  ;;  %v681_v31 = vsel %vm671_vm2, %v667_v15, 1326507024 }
 0x111   :  { %v652_v51 = vshrl.u32 %v7396_v61, %v651_v23  ;;  %v673_v26 = vsel %vm671_vm2, %v661_v54, 2102212464  ;;  %v678_v40 = vsel %vm670_vm1, %v661_v54, %v677_v20  ;;  %vm669_vm3 = vcmp.lt.s32.totalorder %v649_v43, 2 }
 0x112   :  { %v682_v28 = vsel %vm670_vm1, %v664_v58, %v681_v31  ;;  %v684_v18 = vshll.u32 %v644_v46, 8  ;;  %v3665_v30 = vadd.s32 4294967169, %v744_v21  ;;  %v351_v36 = vshrl.u32 %v7394_v10, %v4339_v7 }
 0x113   :  { %v672_v60 = vsel %vm668_vm0, %v652_v51, %v655_v44  ;;  %v679_v37 = vsel %vm669_vm3, %v676_v17, %v678_v40  ;;  %v683_v42 = vsel %vm669_vm3, %v680_v48, %v682_v28  ;;  %v674_v23 = vsel %vm670_vm1, %v658_v47, %v673_v26 }
 0x114   :  { %v4361_v2 = vmul.u32.u64.low %v684_v18, %v683_v42  ;;  %v4362_v54 = vmul.u32.u64.high %v684_v18, %v683_v42, %v4361_v2  ;;  %v750_v12 = vadd.s32 1, %v3665_v30  ;;  %v3647_v58 = vadd.s32 4294967294, %v288_v29 }
 0x115   :  { %v489_v46 = vadd.s32 536870912, %v4348_v32  ;;  %v4366_v5 = vsel %vm543_vm14, %v542_v22, 0  ;;  %v747_v44 = vand.u32 8388607, %v7384_v19  ;;  %v4376_v47 = vadd.f32 %v4198_v49, %v4181_v33 }
 0x116   :  { %v4370_v15 = vmul.u32.u64.low %v684_v18, %v679_v37  ;;  %v4371_v21 = vmul.u32.u64.high %v684_v18, %v679_v37, %v4370_v15  ;;  %vm751_vm4 = vcmp.gt.s32.totalorder %v750_v12, 0  ;;  %v4379_v17 = vshrl.u32 %v4305_v16, 5 }
 0x117   :  { %7657 = vst [vmem:[#allocation14_spill] sm:$0xff] %v4376_v47  ;;  %v4383_v29 = vshll.u32 %v7394_v10, %v4317_v24  ;;  %v675_v22 = vsel %vm669_vm3, %v672_v60, %v674_v23  ;;  %v752_v20 = vsel %vm751_vm4, %v750_v12, 0  ;;  %v4386_v48 = vor.u32 %v351_v36, %v350_v9 }
 0x118   :  { %7658 = vst [vmem:[#allocation15_spill] sm:$0xff] %v4379_v17  ;;  %v4390_v31 = vshrl.u32 %v7392_v13, %v4339_v7  ;;  %v4393_v51 = vand.u32 31, %v4366_v5  ;;  %v754_v49 = vand.u32 31, %v752_v20  ;;  %vm3648_vm5 = vcmp.lt.s32.totalorder %v3647_v58, 0 }
 0x119   :  { %7659 = vst [vmem:[#allocation16_spill] sm:$0xff] %v4386_v48  ;;  %v4395_v16 = vshrl.u32 %v489_v46, 30  ;;  %vm693_vm6 = vc.u32 %v4362_v54, %v4370_v15  ;;  %v748_v26 = vor.u32 8388608, %v747_v44  ;;  %v691_v43 = vmul.u32 %v684_v18, %v675_v22 }
 0x11a   :  { %7660 = vst [vmem:[#allocation17_spill] sm:$0xff] %v4393_v51  ;;  %v694_v40 = vadd.s32 1, %v4371_v21  ;;  %v755_v9 = vsub.s32 32, %v754_v49  ;;  %v753_v30 = vshrl.u32 %v752_v20, 5  ;;  %v757_v36 = vshll.u32 %v7396_v61, %v754_v49 }
 0x11b   :  { %7661 = vst [vmem:[#allocation18_spill] sm:$0xff] %v4395_v16  ;;  %v760_v60 = vshll.u32 %v7388_v63, %v754_v49  ;;  %v847_v37 = vand.u32 2139095040, %v4376_v47  ;;  %v763_v18 = vshll.u32 %v7386_v3, %v754_v49  ;;  %vm7511_vm7 = vcmp.lt.s32.totalorder %v4379_v17, 4 }
 0x11c   :  { %v695_v42 = vsel %vm693_vm6, %v694_v40, %v4371_v21  ;;  %v758_v23 = vshrl.u32 %v7388_v63, %v755_v9  ;;  %v761_v2 = vshrl.u32 %v7386_v3, %v755_v9  ;;  %v764_v46 = vshrl.u32 %v7390_v6, %v755_v9 }
 0x11d   :  { %v696_v12 = vadd.s32 %v695_v42, %v691_v43  ;;  %v766_v44 = vshll.u32 %v7390_v6, %v754_v49  ;;  %v767_v22 = vshrl.u32 %v7394_v10, %v755_v9  ;;  %v769_v45 = vshll.u32 %v7394_v10, %v754_v49 }
 0x11e   :  { %v759_v20 = vor.u32 %v758_v23, %v757_v36  ;;  %v762_v55 = vor.u32 %v761_v2, %v760_v60  ;;  %v770_v21 = vshrl.u32 %v7392_v13, %v755_v9  ;;  %v4415_v40 = vsel %vm3648_vm5, 0, %v3647_v58 }
 0x11f   :  { %v697_v19 = vadd.s32 536870912, %v696_v12  ;;  %v765_v11 = vor.u32 %v764_v46, %v763_v18  ;;  %v768_v3 = vor.u32 %v767_v22, %v766_v44  ;;  %v756_v43 = vshrl.u32 %v7396_v61, %v755_v9 }
 0x120   :  { %v771_v42 = vor.u32 %v770_v21, %v769_v45  ;;  %v788_v63 = vshll.u32 %v748_v26, 8  ;;  %v848_v28 = vshrl.u32 %v847_v37, 23  ;;  %vm772_vm8 = vcmp.lt.s32.totalorder %v753_v30, 1  ;;  %v4422_v37 = vpop.f32.mrb[13].mxu0 }
 0x121   :  { %v4418_v6 = vshrl.u32 %v697_v19, 30  ;;  %vm773_vm9 = vcmp.lt.s32.totalorder %v753_v30, 2  ;;  %vm775_vm10 = vcmp.lt.s32.totalorder %v753_v30, 4  ;;  %vm774_vm11 = vcmp.lt.s32.totalorder %v753_v30, 3 }
 0x122   :  { %v777_v49 = vsel %vm775_vm10, %v765_v11, 2102212464  ;;  %v780_v36 = vsel %vm772_vm8, %v759_v20, %v762_v55  ;;  %v781_v60 = vsel %vm775_vm10, %v768_v3, 920167782  ;;  %v776_v23 = vsel %vm772_vm8, %v756_v43, %v759_v20 }
 0x123   :  { %7662 = vst [vmem:[#allocation19_spill] sm:$0xff] %v4418_v6  ;;  %v699_v58 = vshll.u32 %v4418_v6, 30  ;;  %v782_v2 = vsel %vm774_vm11, %v765_v11, %v781_v60  ;;  %v784_v18 = vsel %vm772_vm8, %v762_v55, %v765_v11  ;;  %v778_v46 = vsel %vm774_vm11, %v762_v55, %v777_v49 }
 0x124   :  { %v783_v9 = vsel %vm773_vm9, %v780_v36, %v782_v2  ;;  %v785_v45 = vsel %vm775_vm10, %v771_v42, 1326507024  ;;  %v3669_v26 = vadd.s32 4294967169, %v848_v28  ;;  %v355_v13 = vor.u32 %v4390_v31, %v4383_v29 }
 0x125   :  { %v4424_v19 = vsub.s32 %v696_v12, %v699_v58  ;;  %v786_v44 = vsel %vm774_vm11, %v768_v3, %v785_v45  ;;  %v4426_v22 = vmul.u32.u64.low %v788_v63, %v783_v9  ;;  %v4427_v21 = vmul.u32.u64.high %v788_v63, %v783_v9, %v4426_v22 }
 0x126   :  { %v4435_v55 = vsel %vm7511_vm7, %v4386_v48, 920167782  ;;  %v787_v11 = vsel %vm773_vm9, %v784_v18, %v786_v44  ;;  %v854_v28 = vadd.s32 1, %v3669_v26  ;;  %v4439_v20 = vsub.s32 32, %v4393_v51 }
 0x127   :  { %7663 = vst [vmem:[#allocation20_spill] sm:$0xff] %v4435_v55  ;;  %v702_v3 = vsub.s32 0, %v4424_v19  ;;  %v4442_v12 = vmul.u32.u64.low %v788_v63, %v787_v11  ;;  %v4443_v43 = vmul.u32.u64.high %v788_v63, %v787_v11, %v4442_v12  ;;  %v296_v42 = vsub.s32 4294967266, %v4415_v40 }
 0x128   :  { %7664 = vst [vmem:[#allocation21_spill] sm:$0xff] %v4439_v20  ;;  %v491_v29 = vshll.u32 %v4395_v16, 30  ;;  %v779_v31 = vsel %vm773_vm9, %v776_v23, %v778_v46  ;;  %vm855_vm12 = vcmp.gt.s32.totalorder %v854_v28, 0  ;;  %v798_v36 = vadd.s32 1, %v4427_v21 }
 0x129   :  { %v3662_v49 = vmin.u32 %v702_v3, %v4424_v19  ;;  %v7665_v60 = vand.u32 2147483647, %v4376_v47  ;;  %v856_v2 = vsel %vm855_vm12, %v854_v28, 0  ;;  %v276_v18 = vadd.s32 %v4229_v41, %v4227_v38 }
 0x12a   :  { %v4456_v9 = vsel %vm7511_vm7, %v355_v13, 1326507024  ;;  %v4459_v45 = vshrl.u32 %v4366_v5, 5  ;;  %v858_v30 = vand.u32 31, %v856_v2  ;;  %v292_v23 = vsub.s32 32, %v4415_v40 }
 0x12b   :  { %v851_v58 = vand.u32 8388607, %v7665_v60  ;;  %7666 = vst [vmem:[#allocation22_spill] sm:$0xff] %v4456_v9  ;;  %v4464_v46 = vshrl.u32 %v7394_v10, %v4439_v20  ;;  %v795_v26 = vmul.u32 %v788_v63, %v779_v31  ;;  %vm797_vm13 = vc.u32 %v4443_v43, %v4426_v22 }
 0x12c   :  { %7667 = vst [vmem:[#allocation23_spill] sm:$0xff] %v4459_v45  ;;  %v293_v38 = vshll.u32 %v4295_v4, %v4415_v40  ;;  %v704_v41 = vclz %v3662_v49  ;;  %v799_v13 = vsel %vm797_vm13, %v798_v36, %v4427_v21  ;;  %v859_v44 = vsub.s32 32, %v858_v30 }
 0x12d   :  { %v297_v5 = vadd.s32 127, %v296_v42  ;;  %v4472_v11 = vsub.s32 %v4348_v32, %v491_v29  ;;  %v800_v28 = vadd.s32 %v799_v13, %v795_v26  ;;  %v852_v3 = vor.u32 8388608, %v851_v58 }
 0x12e   :  { %v7668_v12 = vmov 2475754826   ;;  %v7669_v10 = vmov 2131351028   ;;  %v7670_v31 = vmov 2102212464   ;;  %v4479_v6 = vadd.f32 %v4202_v52, %v4200_v50 }
 0x12f   :  { %v862_v60 = vshrl.u32 %v7668_v12, %v859_v44  ;;  %v865_v63 = vshrl.u32 %v7669_v10, %v859_v44  ;;  %v868_v61 = vshrl.u32 %v7670_v31, %v859_v44  ;;  %v801_v4 = vadd.s32 536870912, %v800_v28 }
 0x130   :  { %v7671_v40 = vmov 683565275   ;;  %v864_v42 = vshll.u32 %v7668_v12, %v858_v30  ;;  %v7672_v49 = vmov 920167782   ;;  %v3663_v29 = vadd.s32 4294967294, %v704_v41 }
 0x131   :  { %v861_v21 = vshll.u32 %v7671_v40, %v858_v30  ;;  %v871_v32 = vshrl.u32 %v7672_v49, %v859_v44  ;;  %v857_v36 = vshrl.u32 %v856_v2, 5  ;;  %v867_v58 = vshll.u32 %v7669_v10, %v858_v30 }
 0x132   :  { %v870_v26 = vshll.u32 %v7670_v31, %v858_v30  ;;  %v294_v13 = vshrl.u32 %v276_v18, %v292_v23  ;;  %v4486_v16 = vshrl.u32 %v801_v4, 30  ;;  %v866_v39 = vor.u32 %v865_v63, %v864_v42 }
 0x133   :  { %v863_v27 = vor.u32 %v862_v60, %v861_v21  ;;  %v869_v52 = vor.u32 %v868_v61, %v867_v58  ;;  %v873_v48 = vshll.u32 %v7672_v49, %v858_v30  ;;  %v7674_v9 = vmov 1326507024  }
 0x134   :  { %7673 = vst [vmem:[#allocation24_spill] sm:$0xff] %v4486_v16  ;;  %v872_v53 = vor.u32 %v871_v32, %v870_v26  ;;  %v874_v55 = vshrl.u32 %v7674_v9, %v859_v44  ;;  %v298_v17 = vshll.u32 %v297_v5, 23  ;;  %v494_v24 = vsub.s32 0, %v4472_v11 }
 0x135   :  { %v803_v2 = vshll.u32 %v4486_v16, 30  ;;  %v892_v41 = vshll.u32 %v852_v3, 8  ;;  %vm3664_vm14 = vcmp.lt.s32.totalorder %v3663_v29, 0  ;;  %vm876_vm15 = vcmp.lt.s32.totalorder %v857_v36, 1 }
 0x136   :  { %v875_v7 = vor.u32 %v874_v55, %v873_v48  ;;  %v951_v18 = vand.u32 2139095040, %v4479_v6  ;;  %v860_v61 = vshrl.u32 %v7671_v40, %v859_v44  ;;  %vm879_vm0 = vcmp.lt.s32.totalorder %v857_v36, 4 }
 0x137   :  { %v4493_v23 = vsub.s32 %v800_v28, %v803_v2  ;;  %v884_v60 = vsel %vm876_vm15, %v863_v27, %v866_v39  ;;  %v881_v30 = vsel %vm879_vm0, %v869_v52, 2102212464  ;;  %v885_v63 = vsel %vm879_vm0, %v872_v53, 920167782 }
 0x138   :  { %v888_v4 = vsel %vm876_vm15, %v866_v39, %v869_v52  ;;  %v889_v5 = vsel %vm879_vm0, %v875_v7, 1326507024  ;;  %v4496_v21 = vsel %vm3664_vm14, 0, %v3663_v29  ;;  %vm877_vm1 = vcmp.lt.s32.totalorder %v857_v36, 2 }
 0x139   :  { %v806_v42 = vsub.s32 0, %v4493_v23  ;;  %vm878_vm2 = vcmp.lt.s32.totalorder %v857_v36, 3  ;;  %v880_v48 = vsel %vm876_vm15, %v860_v61, %v863_v27  ;;  %v952_v32 = vshrl.u32 %v951_v18, 23 }
 0x13a   :  { %v886_v55 = vsel %vm878_vm2, %v869_v52, %v885_v63  ;;  %v890_v3 = vsel %vm878_vm2, %v872_v53, %v889_v5  ;;  %v882_v58 = vsel %vm878_vm2, %v866_v39, %v881_v30  ;;  %v299_v57 = vor.u32 4788187, %v298_v17 }
 0x13b   :  { %v3666_v28 = vmin.u32 %v806_v42, %v4493_v23  ;;  %v887_v44 = vsel %vm877_vm1, %v884_v60, %v886_v55  ;;  %v891_v26 = vsel %vm877_vm1, %v888_v4, %v890_v3  ;;  %v3654_v27 = vmin.u32 %v494_v24, %v4472_v11  ;;  %v4520_v24 = vpop.f32.mrb[14].mxu0 }
 0x13c   :  { %v4502_v2 = vmul.u32.u64.low %v892_v41, %v891_v26  ;;  %v4503_v16 = vmul.u32.u64.high %v892_v41, %v891_v26, %v4502_v2  ;;  %v4505_v7 = vmul.u32.u64.low %v892_v41, %v887_v44  ;;  %v4506_v29 = vmul.u32.u64.high %v892_v41, %v887_v44, %v4505_v7 }
 0x13d   :  { %v558_v53 = vshll.u32 %v7670_v31, %v4393_v51  ;;  %v3673_v52 = vadd.s32 4294967169, %v952_v32  ;;  %v295_v18 = vor.u32 %v294_v13, %v293_v38  ;;  %v4514_v39 = vshll.u32 %v7672_v49, %v4393_v51 }
 0x13e   :  { %vm7498_vm3 = vcmp.lt.s32.totalorder %v4459_v45, 4  ;;  %v712_v61 = vsub.s32 4294967266, %v4496_v21  ;;  %v808_v60 = vclz %v3666_v28  ;;  %v883_v30 = vsel %vm877_vm1, %v880_v48, %v882_v58 }
 0x13f   :  { %v7419_v17 = vand.u32 2147483647, %v4479_v6  ;;  %v958_v63 = vadd.s32 1, %v3673_v52  ;;  %v4523_v4 = vor.u32 %v4464_v46, %v558_v53  ;;  %v4527_v38 = vshrl.u32 %v7674_v9, %v4439_v20 }
 0x140   :  { %vm901_vm4 = vc.u32 %v4503_v16, %v4505_v7  ;;  %v902_v13 = vadd.s32 1, %v4506_v29  ;;  %v300_v5 = vand.u32 2147483647, %v299_v57  ;;  %v496_v36 = vclz %v3654_v27 }
 0x141   :  { %7675 = vst [vmem:[#allocation25_spill] sm:$0xff] %v4523_v4  ;;  %v708_v42 = vsub.s32 32, %v4496_v21  ;;  %vm959_vm5 = vcmp.gt.s32.totalorder %v958_v63, 0  ;;  %v4533_v48 = vadd.s32 127, %v712_v61  ;;  %v899_v55 = vmul.u32 %v892_v41, %v883_v30 }
 0x142   :  { %v903_v46 = vsel %vm901_vm4, %v902_v13, %v4506_v29  ;;  %v960_v3 = vsel %vm959_vm5, %v958_v63, 0  ;;  %v302_v32 = vcvt.s32.f32 %v295_v18  ;;  %v4538_v28 = vadd.s32 %v4291_v0, %v4303_v14 }
 0x143   :  { %v3667_v58 = vadd.s32 4294967294, %v808_v60  ;;  %v955_v44 = vand.u32 8388607, %v7419_v17  ;;  %v692_v26 = vadd.s32 %v4370_v15, %v4362_v54  ;;  %v904_v2 = vadd.s32 %v903_v46, %v899_v55 }
 0x144   :  { %v962_v41 = vand.u32 31, %v960_v3  ;;  %v4546_v27 = vmul.f32 %v302_v32, %v300_v5  ;;  %v4548_v29 = vadd.s32 4294967294, %v496_v36  ;;  %v4553_v0 = vsel %vm7498_vm3, %v4523_v4, 920167782 }
 0x145   :  { %7676 = vst [vmem:[#allocation26_spill] sm:$0xff] %v4553_v0  ;;  %v4557_v14 = vadd.f32 %v4211_v1, %v4181_v33  ;;  %v710_v53 = vshrl.u32 %v692_v26, %v708_v42  ;;  %v714_v52 = vshll.u32 %v4533_v48, 23  ;;  %v905_v18 = vadd.s32 536870912, %v904_v2 }
 0x146   :  { %v963_v54 = vsub.s32 32, %v962_v41  ;;  %vm3668_vm6 = vcmp.lt.s32.totalorder %v3667_v58, 0  ;;  %v956_v15 = vor.u32 8388608, %v955_v44  ;;  %v961_v61 = vshrl.u32 %v960_v3, 5 }
 0x147   :  { %7677 = vst [vmem:[#allocation27_spill] sm:$0xff] %v4557_v14  ;;  %v965_v60 = vshll.u32 %v7671_v40, %v962_v41  ;;  %v4561_v30 = vshrl.u32 %v905_v18, 30  ;;  %v968_v13 = vshll.u32 %v7668_v12, %v962_v41  ;;  %v971_v1 = vshll.u32 %v7669_v10, %v962_v41 }
 0x148   :  { %v966_v63 = vshrl.u32 %v7668_v12, %v963_v54  ;;  %v969_v5 = vshrl.u32 %v7669_v10, %v963_v54  ;;  %v972_v36 = vshrl.u32 %v7670_v31, %v963_v54  ;;  %v974_v42 = vshll.u32 %v7670_v31, %v962_v41 }
 0x149   :  { %7678 = vst [vmem:[#allocation28_spill] sm:$0xff] %v4561_v30  ;;  %v975_v48 = vshrl.u32 %v7672_v49, %v963_v54  ;;  %v907_v55 = vshll.u32 %v4561_v30, 30  ;;  %v1055_v32 = vand.u32 2139095040, %v4557_v14  ;;  %v977_v18 = vshll.u32 %v7672_v49, %v962_v41 }
 0x14a   :  { %v967_v46 = vor.u32 %v966_v63, %v965_v60  ;;  %v970_v3 = vor.u32 %v969_v5, %v968_v13  ;;  %v973_v44 = vor.u32 %v972_v36, %v971_v1  ;;  %v978_v17 = vshrl.u32 %v7674_v9, %v963_v54 }
 0x14b   :  { %v976_v26 = vor.u32 %v975_v48, %v974_v42  ;;  %v4575_v57 = vsel %vm3668_vm6, 0, %v3667_v58  ;;  %v4577_v4 = vsub.s32 %v904_v2, %v907_v55  ;;  %v964_v0 = vshrl.u32 %v7671_v40, %v963_v54 }
 0x14c   :  { %v996_v51 = vshll.u32 %v956_v15, 8  ;;  %v979_v20 = vor.u32 %v978_v17, %v977_v18  ;;  %vm980_vm8 = vcmp.lt.s32.totalorder %v961_v61, 1  ;;  %vm982_vm9 = vcmp.lt.s32.totalorder %v961_v61, 3 }
 0x14d   :  { %vm983_vm10 = vcmp.lt.s32.totalorder %v961_v61, 4  ;;  %v910_v60 = vsub.s32 0, %v4577_v4  ;;  %v988_v13 = vsel %vm980_vm8, %v967_v46, %v970_v3  ;;  %vm981_vm11 = vcmp.lt.s32.totalorder %v961_v61, 2 }
 0x14e   :  { %v985_v63 = vsel %vm983_vm10, %v973_v44, 2102212464  ;;  %v989_v5 = vsel %vm983_vm10, %v976_v26, 920167782  ;;  %v992_v1 = vsel %vm980_vm8, %v970_v3, %v973_v44  ;;  %v1056_v36 = vshrl.u32 %v1055_v32, 23 }
 0x14f   :  { %v990_v41 = vsel %vm982_vm9, %v973_v44, %v989_v5  ;;  %v3670_v58 = vmin.u32 %v910_v60, %v4577_v4  ;;  %v984_v2 = vsel %vm980_vm8, %v964_v0, %v967_v46  ;;  %v993_v54 = vsel %vm983_vm10, %v979_v20, 1326507024  ;;  %v4589_v44 = vpop.f32.mrb[15].mxu0 }
 0x150   :  { %v991_v42 = vsel %vm981_vm11, %v988_v13, %v990_v41  ;;  %v986_v15 = vsel %vm982_vm9, %v970_v3, %v985_v63  ;;  %v994_v17 = vsel %vm982_vm9, %v976_v26, %v993_v54  ;;  %vm3656_vm12 = vcmp.lt.s32.totalorder %v4548_v29, 0  ;;  %7679 = vst [vmem:[#allocation29_spill] sm:$0xff] %v4589_v44 }
 0x151   :  { %v4583_v48 = vmul.u32.u64.low %v996_v51, %v991_v42  ;;  %v4584_v55 = vmul.u32.u64.high %v996_v51, %v991_v42, %v4583_v48  ;;  %v715_v18 = vor.u32 4788187, %v714_v52  ;;  %v912_v30 = vclz %v3670_v58 }
 0x152   :  { %v995_v5 = vsel %vm981_vm11, %v992_v1, %v994_v17  ;;  %v709_v0 = vshll.u32 %v4424_v19, %v4496_v21  ;;  %v3677_v20 = vadd.s32 4294967169, %v1056_v36  ;;  %v816_v3 = vsub.s32 4294967266, %v4575_v57 }
 0x153   :  { %v4593_v46 = vmul.u32.u64.low %v996_v51, %v995_v5  ;;  %v4594_v32 = vmul.u32.u64.high %v996_v51, %v995_v5, %v4593_v46  ;;  %v3671_v26 = vadd.s32 4294967294, %v912_v30  ;;  %v987_v60 = vsel %vm981_vm11, %v984_v2, %v986_v15 }
 0x154   :  { %v7427_v63 = vand.u32 2147483647, %v4557_v14  ;;  %v7680_v52 = vor.u32 %v4527_v38, %v4514_v39  ;;  %v711_v41 = vor.u32 %v710_v53, %v709_v0  ;;  %v1006_v19 = vadd.s32 1, %v4584_v55 }
 0x155   :  { %v1062_v21 = vadd.s32 1, %v3677_v20  ;;  %v4611_v61 = vsel %vm3656_vm12, 0, %v4548_v29  ;;  %v716_v30 = vand.u32 2147483647, %v715_v18  ;;  %v812_v36 = vsub.s32 32, %v4575_v57 }
 0x156   :  { %v4604_v13 = vsel %vm7498_vm3, %v7680_v52, 1326507024  ;;  %vm3672_vm13 = vcmp.lt.s32.totalorder %v3671_v26, 0  ;;  %v1003_v39 = vmul.u32 %v996_v51, %v987_v60  ;;  %vm1005_vm14 = vc.u32 %v4594_v32, %v4583_v48 }
 0x157   :  { %7681 = vst [vmem:[#allocation30_spill] sm:$0xff] %v4604_v13  ;;  %vm1063_vm15 = vcmp.gt.s32.totalorder %v1062_v21, 0  ;;  %v817_v38 = vadd.s32 127, %v816_v3  ;;  %v1007_v53 = vsel %vm1005_vm14, %v1006_v19, %v4584_v55  ;;  %v1059_v58 = vand.u32 8388607, %v7427_v63 }
 0x158   :  { %v4621_v2 = vadd.f32 %v4217_v8, %v4200_v50  ;;  %v718_v29 = vcvt.s32.f32 %v711_v41  ;;  %v796_v42 = vadd.s32 %v4426_v22, %v4443_v43  ;;  %v1008_v54 = vadd.s32 %v1007_v53, %v1003_v39 }
 0x159   :  { %v1064_v51 = vsel %vm1063_vm15, %v1062_v21, 0  ;;  %v4627_v18 = vsel %vm3672_vm13, 0, %v3671_v26  ;;  %v813_v0 = vshll.u32 %v4493_v23, %v4575_v57  ;;  %v818_v20 = vshll.u32 %v817_v38, 23 }
 0x15a   :  { %7682 = vst [vmem:[#allocation31_spill] sm:$0xff] %v4621_v2  ;;  %v1066_v55 = vand.u32 31, %v1064_v51  ;;  %v4629_v5 = vmul.f32 %v718_v29, %v716_v30  ;;  %v814_v8 = vshrl.u32 %v796_v42, %v812_v36  ;;  %v1009_v46 = vadd.s32 536870912, %v1008_v54 }
 0x15b   :  { %v1060_v3 = vor.u32 8388608, %v1059_v58  ;;  %v1159_v22 = vand.u32 2139095040, %v4621_v2  ;;  %v920_v43 = vsub.s32 4294967266, %v4627_v18  ;;  %v1065_v41 = vshrl.u32 %v1064_v51, 5 }
 0x15c   :  { %v1067_v60 = vsub.s32 32, %v1066_v55  ;;  %v4635_v52 = vshrl.u32 %v1009_v46, 30  ;;  %v1069_v26 = vshll.u32 %v7671_v40, %v1066_v55  ;;  %v1072_v21 = vshll.u32 %v7668_v12, %v1066_v55 }
 0x15d   :  { %v1075_v23 = vshll.u32 %v7669_v10, %v1066_v55  ;;  %v1078_v57 = vshll.u32 %v7670_v31, %v1066_v55  ;;  %v1081_v58 = vshll.u32 %v7672_v49, %v1066_v55  ;;  %v7432_v42 = vand.u32 2147483647, %v4621_v2 }
 0x15e   :  { %7683 = vst [vmem:[#allocation32_spill] sm:$0xff] %v4635_v52  ;;  %v1070_v19 = vshrl.u32 %v7668_v12, %v1067_v60  ;;  %v1011_v30 = vshll.u32 %v4635_v52, 30  ;;  %v1073_v36 = vshrl.u32 %v7669_v10, %v1067_v60  ;;  %v1076_v39 = vshrl.u32 %v7670_v31, %v1067_v60 }
 0x15f   :  { %v1079_v38 = vshrl.u32 %v7672_v49, %v1067_v60  ;;  %v1082_v29 = vshrl.u32 %v7674_v9, %v1067_v60  ;;  %v815_v51 = vor.u32 %v814_v8, %v813_v0  ;;  %v819_v17 = vor.u32 4788187, %v818_v20 }
 0x160   :  { %v1071_v53 = vor.u32 %v1070_v19, %v1069_v26  ;;  %v1074_v46 = vor.u32 %v1073_v36, %v1072_v21  ;;  %v1077_v63 = vor.u32 %v1076_v39, %v1075_v23  ;;  %v4649_v15 = vsub.s32 %v1008_v54, %v1011_v30 }
 0x161   :  { %v1080_v1 = vor.u32 %v1079_v38, %v1078_v57  ;;  %v1083_v52 = vor.u32 %v1082_v29, %v1081_v58  ;;  %v1160_v13 = vshrl.u32 %v1159_v22, 23  ;;  %v921_v45 = vadd.s32 127, %v920_v43 }
 0x162   :  { %vm1084_vm0 = vcmp.lt.s32.totalorder %v1065_v41, 1  ;;  %vm1087_vm1 = vcmp.lt.s32.totalorder %v1065_v41, 4  ;;  %v1100_v44 = vshll.u32 %v1060_v3, 8  ;;  %v1068_v26 = vshrl.u32 %v7671_v40, %v1067_v60 }
 0x163   :  { %vm1086_vm2 = vcmp.lt.s32.totalorder %v1065_v41, 3  ;;  %v1092_v55 = vsel %vm1084_vm0, %v1071_v53, %v1074_v46  ;;  %v1093_v19 = vsel %vm1087_vm1, %v1080_v1, 920167782  ;;  %vm1085_vm4 = vcmp.lt.s32.totalorder %v1065_v41, 2 }
 0x164   :  { %v1089_v0 = vsel %vm1087_vm1, %v1077_v63, 2102212464  ;;  %v1094_v8 = vsel %vm1086_vm2, %v1077_v63, %v1093_v19  ;;  %v1096_v20 = vsel %vm1084_vm0, %v1074_v46, %v1077_v63  ;;  %vm7497_vm5 = vcmp.lt.s32.totalorder %v4184_v35, 0 }
 0x165   :  { %v1014_v54 = vsub.s32 0, %v4649_v15  ;;  %v1095_v22 = vsel %vm1085_vm4, %v1092_v55, %v1094_v8  ;;  %v1097_v43 = vsel %vm1087_vm1, %v1083_v52, 1326507024  ;;  %v3681_v3 = vadd.s32 4294967169, %v1160_v13 }
 0x166   :  { %v820_v21 = vand.u32 2147483647, %v819_v17  ;;  %v1088_v60 = vsel %vm1084_vm0, %v1068_v26, %v1071_v53  ;;  %v1098_v23 = vsel %vm1086_vm2, %v1080_v1, %v1097_v43  ;;  %v1163_v57 = vand.u32 8388607, %v7432_v42  ;;  %v4679_v26 = vpop.f32.mrb[16].mxu0 }
 0x167   :  { %vm7471_vm6 = vcmp.lt.s32.totalorder %v4246_v62, 0  ;;  %v1090_v63 = vsel %vm1086_vm2, %v1074_v46, %v1089_v0  ;;  %v1099_v30 = vsel %vm1085_vm4, %v1096_v20, %v1098_v23  ;;  %v916_v13 = vsub.s32 32, %v4627_v18 }
 0x168   :  { %v4665_v36 = vmul.u32.u64.low %v1100_v44, %v1095_v22  ;;  %v4666_v39 = vmul.u32.u64.high %v1100_v44, %v1095_v22, %v4665_v36  ;;  %v922_v17 = vshll.u32 %v921_v45, 23  ;;  %v501_v1 = vshll.u32 %v4472_v11, %v4611_v61 }
 0x169   :  { %v4670_v52 = vmul.u32.u64.low %v1100_v44, %v1099_v30  ;;  %v4671_v38 = vmul.u32.u64.high %v1100_v44, %v1099_v30, %v4670_v52  ;;  %v7684_v53 = vsub.s32 32, %v4611_v61  ;;  %v3674_v29 = vmin.u32 %v1014_v54, %v4649_v15 }
 0x16a   :  { %v1166_v46 = vadd.s32 1, %v3681_v3  ;;  %v822_v55 = vcvt.s32.f32 %v815_v51  ;;  %v900_v19 = vadd.s32 %v4505_v7, %v4503_v16  ;;  %v1091_v45 = vsel %vm1085_vm4, %v1088_v60, %v1090_v63 }
 0x16b   :  { %v502_v58 = vshrl.u32 %v4538_v28, %v7684_v53  ;;  %v4686_v0 = vadd.f32 %v4223_v25, %v4181_v33  ;;  %v7686_v11 = vsub.s32 4294967266, %v4611_v61  ;;  %v720_v28 = vxor.u32 2147483648, %v4629_v5 }
 0x16c   :  { %v1110_v20 = vadd.s32 1, %v4666_v39  ;;  %vm1167_vm8 = vcmp.gt.s32.totalorder %v1166_v46, 0  ;;  %v4694_v54 = vmul.f32 %v822_v55, %v820_v21  ;;  %v918_v51 = vshrl.u32 %v900_v19, %v916_v13 }
 0x16d   :  { %7685 = vst [vmem:[#allocation33_spill] sm:$0xff] %v4686_v0  ;;  %v4690_v8 = vadd.s32 127, %v7686_v11  ;;  %v4696_v22 = vor.u32 4788187, %v922_v17  ;;  %v1164_v16 = vor.u32 8388608, %v1163_v57  ;;  %v1016_v7 = vclz %v3674_v29 }
 0x16e   :  { %v1107_v41 = vmul.u32 %v1100_v44, %v1091_v45  ;;  %vm1109_vm9 = vc.u32 %v4671_v38, %v4665_v36  ;;  %v1168_v25 = vsel %vm1167_vm8, %v1166_v46, 0  ;;  %v7687_v61 = vxor.u32 2147483648, %v4546_v27 }
 0x16f   :  { %v917_v3 = vshll.u32 %v4577_v4, %v4627_v18  ;;  %v1111_v21 = vsel %vm1109_vm9, %v1110_v20, %v4666_v39  ;;  %v1263_v60 = vand.u32 2139095040, %v4686_v0  ;;  %v4711_v23 = vor.u32 %v502_v58, %v501_v1 }
 0x170   :  { %v4705_v43 = vsel %vm7497_vm5, %v7687_v61, %v4546_v27  ;;  %v506_v44 = vshll.u32 %v4690_v8, 23  ;;  %v1112_v57 = vadd.s32 %v1111_v21, %v1107_v41  ;;  %v1170_v63 = vand.u32 31, %v1168_v25 }
 0x171   :  { %7688 = vst [vmem:[#allocation34_spill] sm:$0xff] %v4705_v43  ;;  %7689 = vst [vmem:[#allocation35_spill] sm:$0xff] %v4711_v23  ;;  %v721_v30 = vsel %vm7471_vm6, %v720_v28, %v4629_v5  ;;  %v824_v27 = vxor.u32 2147483648, %v4694_v54  ;;  %v4718_v13 = vor.u32 %v918_v51, %v917_v3  ;;  %v4720_v17 = vshll.u32 %v1164_v16, 8 }
 0x172   :  { %v924_v4 = vand.u32 2147483647, %v4696_v22  ;;  %v3675_v18 = vadd.s32 4294967294, %v1016_v7  ;;  %v1113_v39 = vadd.s32 536870912, %v1112_v57  ;;  %v1171_v52 = vsub.s32 32, %v1170_v63 }
 0x173   :  { %v1169_v1 = vshrl.u32 %v1168_v25, 5  ;;  %v1173_v53 = vshll.u32 %v7671_v40, %v1170_v63  ;;  %v1176_v58 = vshll.u32 %v7668_v12, %v1170_v63  ;;  %v1264_v29 = vshrl.u32 %v1263_v60, 23 }
 0x174   :  { %v4725_v46 = vshrl.u32 %v1113_v39, 30  ;;  %v1174_v5 = vshrl.u32 %v7668_v12, %v1171_v52  ;;  %v1177_v55 = vshrl.u32 %v7669_v10, %v1171_v52  ;;  %v1179_v19 = vshll.u32 %v7669_v10, %v1170_v63 }
 0x175   :  { %v1180_v45 = vshrl.u32 %v7670_v31, %v1171_v52  ;;  %v1182_v11 = vshll.u32 %v7670_v31, %v1170_v63  ;;  %v1183_v28 = vshrl.u32 %v7672_v49, %v1171_v52  ;;  %v1185_v20 = vshll.u32 %v7672_v49, %v1170_v63 }
 0x176   :  { %7690 = vst [vmem:[#allocation36_spill] sm:$0xff] %v4725_v46  ;;  %v7691_v51 = vand.u32 2147483647, %v4246_v62  ;;  %v7692_v22 = vmov 0  ;;  %v1115_v16 = vshll.u32 %v4725_v46, 30  ;;  %v1175_v7 = vor.u32 %v1174_v5, %v1173_v53 }
 0x177   :  { %v1178_v41 = vor.u32 %v1177_v55, %v1176_v58  ;;  %v1186_v25 = vshrl.u32 %v7674_v9, %v1171_v52  ;;  %vm7484_vm11 = vcmp.lt.s32.totalorder %v4314_v56, 0  ;;  %v1181_v61 = vor.u32 %v1180_v45, %v1179_v19 }
 0x178   :  { %vm4736_vm10 = vcmp.le.f32.partialorder %v7691_v51, 0.7853982  ;;  %v1184_v3 = vor.u32 %v1183_v28, %v1182_v11  ;;  %vm1188_vm12 = vcmp.lt.s32.totalorder %v1169_v1, 1  ;;  %v3685_v21 = vadd.s32 4294967169, %v1264_v29  ;;  %v4757_v28 = vpop.f32.mrb[17].mxu0 }
 0x179   :  { %v7693_v22 = vsel %vm4736_vm10, 4294967295, %v7692_v22  ;;  %v4743_v60 = vsub.s32 %v1112_v57, %v1115_v16  ;;  %v1187_v63 = vor.u32 %v1186_v25, %v1185_v20  ;;  %vm1189_vm13 = vcmp.lt.s32.totalorder %v1169_v1, 2 }
 0x17a   :  { %7694 = vst [vmem:[#allocation37_spill] sm:$0xff] %v7693_v22  ;;  %vm1191_vm14 = vcmp.lt.s32.totalorder %v1169_v1, 4  ;;  %vm1190_vm15 = vcmp.lt.s32.totalorder %v1169_v1, 3  ;;  %v1196_v51 = vsel %vm1188_vm12, %v1175_v7, %v1178_v41  ;;  %v7695_v53 = vand.u32 2147483647, %v4314_v56 }
 0x17b   :  { %v1193_v39 = vsel %vm1191_vm14, %v1181_v61, 2102212464  ;;  %v1197_v42 = vsel %vm1191_vm14, %v1184_v3, 920167782  ;;  %v7696_v58 = vmov 0  ;;  %v1118_v5 = vsub.s32 0, %v4743_v60 }
 0x17c   :  { %vm4748_vm0 = vcmp.le.f32.partialorder %v7695_v53, 0.7853982  ;;  %v1172_v29 = vshrl.u32 %v7671_v40, %v1171_v52  ;;  %v1198_v57 = vsel %vm1190_vm15, %v1181_v61, %v1197_v42  ;;  %v1200_v55 = vsel %vm1188_vm12, %v1178_v41, %v1181_v61 }
 0x17d   :  { %v7697_v58 = vsel %vm4748_vm0, 4294967295, %v7696_v58  ;;  %vm3676_vm1 = vcmp.lt.s32.totalorder %v3675_v18, 0  ;;  %v1199_v19 = vsel %vm1189_vm13, %v1196_v51, %v1198_v57  ;;  %v1201_v45 = vsel %vm1191_vm14, %v1187_v63, 1326507024 }
 0x17e   :  { %7698 = vst [vmem:[#allocation38_spill] sm:$0xff] %v7697_v58  ;;  %v1270_v11 = vadd.s32 1, %v3685_v21  ;;  %v3678_v20 = vmin.u32 %v1118_v5, %v4743_v60  ;;  %v1192_v16 = vsel %vm1188_vm12, %v1172_v29, %v1175_v7  ;;  %v1194_v25 = vsel %vm1190_vm15, %v1178_v41, %v1193_v39 }
 0x17f   :  { %v1202_v53 = vsel %vm1190_vm15, %v1184_v3, %v1201_v45  ;;  %v4765_v42 = vmul.u32.u64.low %v4720_v17, %v1199_v19  ;;  %v4766_v61 = vmul.u32.u64.high %v4720_v17, %v1199_v19, %v4765_v42  ;;  %v7433_v63 = vand.u32 2147483647, %v4686_v0 }
 0x180   :  { %v1203_v52 = vsel %vm1189_vm13, %v1200_v55, %v1202_v53  ;;  %v926_v21 = vcvt.s32.f32 %v4718_v13  ;;  %v4771_v51 = vsel %vm3676_vm1, 0, %v3675_v18  ;;  %v4780_v41 = vsel %vm4736_vm10, %v4246_v62, %v721_v30 }
 0x181   :  { %v4774_v5 = vmul.u32.u64.low %v4720_v17, %v1203_v52  ;;  %v4775_v7 = vmul.u32.u64.high %v4720_v17, %v1203_v52, %v4774_v5  ;;  %v1120_v3 = vclz %v3678_v20  ;;  %v1195_v39 = vsel %vm1189_vm13, %v1192_v16, %v1194_v25 }
 0x182   :  { %vm1271_vm2 = vcmp.gt.s32.totalorder %v1270_v11, 0  ;;  %v4785_v29 = vor.u32 4788187, %v506_v44  ;;  %v825_v13 = vsel %vm7484_vm11, %v824_v27, %v4694_v54  ;;  %v4792_v18 = vmul.f32 %v926_v21, %v924_v4 }
 0x183   :  { %v1272_v57 = vsel %vm1271_vm2, %v1270_v11, 0  ;;  %v1024_v30 = vsub.s32 4294967266, %v4771_v51  ;;  %v1214_v55 = vadd.s32 1, %v4766_v61  ;;  %v1267_v1 = vand.u32 8388607, %v7433_v63 }
 0x184   :  { %v1274_v19 = vand.u32 31, %v1272_v57  ;;  %3920 = vcosq.f32 %v4780_v41  ;;  %v1211_v8 = vmul.u32 %v4720_v17, %v1195_v39  ;;  %vm1213_vm4 = vc.u32 %v4775_v7, %v4765_v42 }
 0x185   :  { %v4804_v54 = vadd.f32 %v4276_v34, %v4200_v50  ;;  %v4809_v44 = vsel %vm4748_vm0, %v4314_v56, %v825_v13  ;;  %v3679_v27 = vadd.s32 4294967294, %v1120_v3  ;;  %v1215_v4 = vsel %vm1213_vm4, %v1214_v55, %v4766_v61 }
 0x186   :  { %v1275_v45 = vsub.s32 32, %v1274_v19  ;;  %v1004_v17 = vadd.s32 %v4583_v48, %v4594_v32  ;;  %v1020_v20 = vsub.s32 32, %v4771_v51  ;;  %v1216_v16 = vadd.s32 %v1215_v4, %v1211_v8 }
 0x187   :  { %7699 = vst [vmem:[#allocation39_spill] sm:$0xff] %v4804_v54  ;;  %v4816_v25 = vadd.s32 127, %v1024_v30  ;;  %v1268_v34 = vor.u32 8388608, %v1267_v1  ;;  %v1273_v5 = vshrl.u32 %v1272_v57, 5  ;;  %v1277_v61 = vshll.u32 %v7671_v40, %v1274_v19 }
 0x188   :  { %v1278_v53 = vshrl.u32 %v7668_v12, %v1275_v45  ;;  %v1281_v52 = vshrl.u32 %v7669_v10, %v1275_v45  ;;  %v1217_v21 = vadd.s32 536870912, %v1216_v16  ;;  %v1367_v3 = vand.u32 2139095040, %v4804_v54 }
 0x189   :  { %vm3680_vm8 = vcmp.lt.s32.totalorder %v3679_v27, 0  ;;  %v1280_v39 = vshll.u32 %v7668_v12, %v1274_v19  ;;  %v1283_v48 = vshll.u32 %v7669_v10, %v1274_v19  ;;  %v1284_v32 = vshrl.u32 %v7670_v31, %v1275_v45 }
 0x18a   :  { %v4825_v13 = vshrl.u32 %v1217_v21, 30  ;;  %v1279_v30 = vor.u32 %v1278_v53, %v1277_v61  ;;  %v1286_v55 = vshll.u32 %v7670_v31, %v1274_v19  ;;  %v1287_v1 = vshrl.u32 %v7672_v49, %v1275_v45 }
 0x18b   :  { %v1282_v8 = vor.u32 %v1281_v52, %v1280_v39  ;;  %v1285_v57 = vor.u32 %v1284_v32, %v1283_v48  ;;  %v1289_v4 = vshll.u32 %v7672_v49, %v1274_v19  ;;  %v1290_v63 = vshrl.u32 %v7674_v9, %v1275_v45  ;;  %v4848_v39 = vpop.f32.mrb[18].mxu0 }
 0x18c   :  { %7700 = vst [vmem:[#allocation40_spill] sm:$0xff] %v4825_v13  ;;  %v1022_v11 = vshrl.u32 %v1004_v17, %v1020_v20  ;;  %v1219_v46 = vshll.u32 %v4825_v13, 30  ;;  %v1288_v22 = vor.u32 %v1287_v1, %v1286_v55  ;;  %v1308_v62 = vshll.u32 %v1268_v34, 8  ;;  %7702 = vst [vmem:[#allocation42_spill] sm:$0xff] %v4848_v39 }
 0x18d   :  { %v1026_v58 = vshll.u32 %v4816_v25, 23  ;;  %v4834_v21 = vsel %vm3680_vm8, 0, %v3679_v27  ;;  %v1291_v53 = vor.u32 %v1290_v63, %v1289_v4  ;;  %v1368_v61 = vshrl.u32 %v1367_v3, 23 }
 0x18e   :  { %v4836_v56 = vpop.eup %3920  ;;  %vm7470_vm9 = vcmp.lt.s32.totalorder %v4376_v47, 0  ;;  %v4839_v52 = vsub.s32 %v1216_v16, %v1219_v46  ;;  %v1276_v19 = vshrl.u32 %v7671_v40, %v1275_v45  ;;  %vm1292_vm12 = vcmp.lt.s32.totalorder %v1273_v5, 1 }
 0x18f   :  { %7701 = vst [vmem:[#allocation41_spill] sm:$0xff] %v4836_v56  ;;  %vm1295_vm13 = vcmp.lt.s32.totalorder %v1273_v5, 4  ;;  %vm1294_vm14 = vcmp.lt.s32.totalorder %v1273_v5, 3  ;;  %v1300_v20 = vsel %vm1292_vm12, %v1279_v30, %v1282_v8  ;;  %vm1293_vm15 = vcmp.lt.s32.totalorder %v1273_v5, 2 }
 0x190   :  { %v1297_v17 = vsel %vm1295_vm13, %v1285_v57, 2102212464  ;;  %v1301_v25 = vsel %vm1295_vm13, %v1288_v22, 920167782  ;;  %v1222_v27 = vsub.s32 0, %v4839_v52  ;;  %v1304_v34 = vsel %vm1292_vm12, %v1282_v8, %v1285_v57 }
 0x191   :  { %v1302_v63 = vsel %vm1294_vm14, %v1285_v57, %v1301_v25  ;;  %v1128_v3 = vsub.s32 4294967266, %v4834_v21  ;;  %v1305_v16 = vsel %vm1295_vm13, %v1291_v53, 1326507024  ;;  %v3689_v45 = vadd.s32 4294967169, %v1368_v61 }
 0x192   :  { %v1303_v46 = vsel %vm1293_vm15, %v1300_v20, %v1302_v63  ;;  %v3682_v48 = vmin.u32 %v1222_v27, %v4839_v52  ;;  %v1296_v32 = vsel %vm1292_vm12, %v1276_v19, %v1279_v30  ;;  %v1298_v55 = vsel %vm1294_vm14, %v1282_v8, %v1297_v17 }
 0x193   :  { %v1306_v1 = vsel %vm1294_vm14, %v1288_v22, %v1305_v16  ;;  %v4855_v25 = vmul.u32.u64.low %v1308_v62, %v1303_v46  ;;  %v4856_v57 = vmul.u32.u64.high %v1308_v62, %v1303_v46, %v4855_v25  ;;  %v1374_v13 = vadd.s32 1, %v3689_v45 }
 0x194   :  { %v1307_v4 = vsel %vm1293_vm15, %v1304_v34, %v1306_v1  ;;  %v1021_v53 = vshll.u32 %v4649_v15, %v4771_v51  ;;  %v7444_v27 = vand.u32 2147483647, %v4804_v54  ;;  %3922 = vsinq.f32 %v4780_v41 }
 0x195   :  { %v4861_v61 = vmul.u32.u64.low %v1308_v62, %v1307_v4  ;;  %v4862_v20 = vmul.u32.u64.high %v1308_v62, %v1307_v4, %v4861_v61  ;;  %v1224_v30 = vclz %v3682_v48  ;;  %v1299_v22 = vsel %vm1293_vm15, %v1296_v32, %v1298_v55 }
 0x196   :  { %vm1375_vm1 = vcmp.gt.s32.totalorder %v1374_v13, 0  ;;  %3924 = vcosq.f32 %v4809_v44  ;;  %v4868_v8 = vor.u32 %v1022_v11, %v1021_v53  ;;  %v4870_v19 = vor.u32 4788187, %v1026_v58 }
 0x197   :  { %v1376_v17 = vsel %vm1375_vm1, %v1374_v13, 0  ;;  %v7703_v15 = vxor.u32 2147483648, %v4792_v18  ;;  %v1129_v63 = vadd.s32 127, %v1128_v3  ;;  %v1318_v41 = vadd.s32 1, %v4856_v57 }
 0x198   :  { %v1378_v5 = vand.u32 31, %v1376_v17  ;;  %v1315_v34 = vmul.u32 %v1308_v62, %v1299_v22  ;;  %vm1317_vm2 = vc.u32 %v4862_v20, %v4855_v25  ;;  %v1371_v58 = vand.u32 8388607, %v7444_v27 }
 0x199   :  { %v4877_v51 = vsel %vm7470_vm9, %v7703_v15, %v4792_v18  ;;  %v4886_v11 = vadd.f32 %v4358_v59, %v4181_v33  ;;  %v1108_v13 = vadd.s32 %v4665_v36, %v4671_v38  ;;  %v3683_v18 = vadd.s32 4294967294, %v1224_v30 }
 0x19a   :  { %v1319_v3 = vsel %vm1317_vm2, %v1318_v41, %v4856_v57  ;;  %v1379_v46 = vsub.s32 32, %v1378_v5  ;;  %v1124_v45 = vsub.s32 32, %v4834_v21  ;;  %v1125_v32 = vshll.u32 %v4743_v60, %v4834_v21 }
 0x19b   :  { %7704 = vst [vmem:[#allocation43_spill] sm:$0xff] %v4886_v11  ;;  %v1320_v48 = vadd.s32 %v1319_v3, %v1315_v34  ;;  %v1130_v55 = vshll.u32 %v1129_v63, 23  ;;  %v1372_v38 = vor.u32 8388608, %v1371_v58  ;;  %v1377_v4 = vshrl.u32 %v1376_v17, 5 }
 0x19c   :  { %v1382_v59 = vshrl.u32 %v7668_v12, %v1379_v46  ;;  %v1385_v1 = vshrl.u32 %v7669_v10, %v1379_v46  ;;  %v1381_v57 = vshll.u32 %v7671_v40, %v1378_v5  ;;  %vm3684_vm4 = vcmp.lt.s32.totalorder %v3683_v18, 0 }
 0x19d   :  { %v1321_v36 = vadd.s32 536870912, %v1320_v48  ;;  %v1384_v53 = vshll.u32 %v7668_v12, %v1378_v5  ;;  %v1387_v61 = vshll.u32 %v7669_v10, %v1378_v5  ;;  %v1388_v30 = vshrl.u32 %v7670_v31, %v1379_v46 }
 0x19e   :  { %v1383_v60 = vor.u32 %v1382_v59, %v1381_v57  ;;  %v1390_v21 = vshll.u32 %v7670_v31, %v1378_v5  ;;  %v1391_v15 = vshrl.u32 %v7672_v49, %v1379_v46  ;;  %v4906_v63 = vpop.eup %3922  ;;  %v1393_v34 = vshll.u32 %v7672_v49, %v1378_v5 }
 0x19f   :  { %v4902_v22 = vshrl.u32 %v1321_v36, 30  ;;  %7706 = vst [vmem:[#allocation45_spill] sm:$0xff] %v4906_v63  ;;  %v1386_v41 = vor.u32 %v1385_v1, %v1384_v53  ;;  %v1389_v17 = vor.u32 %v1388_v30, %v1387_v61  ;;  %v1394_v58 = vshrl.u32 %v7674_v9, %v1379_v46 }
 0x1a0   :  { %v4910_v3 = vpop.eup %3924  ;;  %v7708_v27 = vand.u32 2147483647, %v4376_v47  ;;  %v7709_v36 = vmov 0  ;;  %v1126_v59 = vshrl.u32 %v1108_v13, %v1124_v45  ;;  %v1131_v57 = vor.u32 4788187, %v1130_v55 }
 0x1a1   :  { %7705 = vst [vmem:[#allocation44_spill] sm:$0xff] %v4902_v22  ;;  %7707 = vst [vmem:[#allocation46_spill] sm:$0xff] %v4910_v3  ;;  %v1323_v62 = vshll.u32 %v4902_v22, 30  ;;  %v1392_v16 = vor.u32 %v1391_v15, %v1390_v21  ;;  %v4920_v1 = vsel %vm3684_vm4, 0, %v3683_v18  ;;  %v1395_v53 = vor.u32 %v1394_v58, %v1393_v34 }
 0x1a2   :  { %vm4914_vm8 = vcmp.le.f32.partialorder %v7708_v27, 0.7853982  ;;  %v1412_v5 = vshll.u32 %v1372_v38, 8  ;;  %v1471_v61 = vand.u32 2139095040, %v4886_v11  ;;  %v1380_v56 = vshrl.u32 %v7671_v40, %v1379_v46 }
 0x1a3   :  { %v7710_v36 = vsel %vm4914_vm8, 4294967295, %v7709_v36  ;;  %v4923_v30 = vsub.s32 %v1320_v48, %v1323_v62  ;;  %vm1396_vm12 = vcmp.lt.s32.totalorder %v1377_v4, 1  ;;  %vm1399_vm13 = vcmp.lt.s32.totalorder %v1377_v4, 4 }
 0x1a4   :  { %7711 = vst [vmem:[#allocation47_spill] sm:$0xff] %v7710_v36  ;;  %vm1398_vm14 = vcmp.lt.s32.totalorder %v1377_v4, 3  ;;  %v1401_v27 = vsel %vm1399_vm13, %v1389_v17, 2102212464  ;;  %v1404_v13 = vsel %vm1396_vm12, %v1383_v60, %v1386_v41  ;;  %v1405_v45 = vsel %vm1399_vm13, %v1392_v16, 920167782 }
 0x1a5   :  { %v1326_v55 = vsub.s32 0, %v4923_v30  ;;  %vm1397_vm15 = vcmp.lt.s32.totalorder %v1377_v4, 2  ;;  %v1406_v21 = vsel %vm1398_vm14, %v1389_v17, %v1405_v45  ;;  %v1408_v18 = vsel %vm1396_vm12, %v1386_v41, %v1389_v17 }
 0x1a6   :  { %v1232_v15 = vsub.s32 4294967266, %v4920_v1  ;;  %v1407_v38 = vsel %vm1397_vm15, %v1404_v13, %v1406_v21  ;;  %v1409_v34 = vsel %vm1399_vm13, %v1395_v53, 1326507024  ;;  %v1472_v62 = vshrl.u32 %v1471_v61, 23  ;;  %v4938_v13 = vpop.f32.mrb[19].mxu0 }
 0x1a7   :  { %v3686_v48 = vmin.u32 %v1326_v55, %v4923_v30  ;;  %v1400_v46 = vsel %vm1396_vm12, %v1380_v56, %v1383_v60  ;;  %v1402_v58 = vsel %vm1398_vm14, %v1386_v41, %v1401_v27  ;;  %v1410_v22 = vsel %vm1398_vm14, %v1392_v16, %v1409_v34 }
 0x1a8   :  { %v1411_v63 = vsel %vm1397_vm15, %v1408_v18, %v1410_v22  ;;  %v4931_v3 = vmul.u32.u64.low %v1412_v5, %v1407_v38  ;;  %v4932_v43 = vmul.u32.u64.high %v1412_v5, %v1407_v38, %v4931_v3  ;;  %v3693_v35 = vadd.s32 4294967169, %v1472_v62 }
 0x1a9   :  { %v1127_v45 = vor.u32 %v1126_v59, %v1125_v32  ;;  %v1328_v17 = vclz %v3686_v48  ;;  %v4935_v23 = vmul.u32.u64.low %v1412_v5, %v1411_v63  ;;  %v4936_v39 = vmul.u32.u64.high %v1412_v5, %v1411_v63, %v4935_v23 }
 0x1aa   :  { %3926 = vsinq.f32 %v4809_v44  ;;  %v4945_v56 = vsel %vm4914_vm8, %v4376_v47, %v4877_v51  ;;  %v1403_v16 = vsel %vm1397_vm15, %v1400_v46, %v1402_v58  ;;  %v1478_v22 = vadd.s32 1, %v3693_v35 }
 0x1ab   :  { %v7712_v60 = vand.u32 2147483647, %v4870_v19  ;;  %v7713_v32 = vcvt.s32.f32 %v4868_v8  ;;  %v1132_v23 = vand.u32 2147483647, %v1131_v57  ;;  %v3687_v63 = vadd.s32 4294967294, %v1328_v17 }
 0x1ac   :  { %v7453_v59 = vand.u32 2147483647, %v4886_v11  ;;  %v1228_v44 = vsub.s32 32, %v4920_v1  ;;  %v1233_v53 = vadd.s32 127, %v1232_v15  ;;  %v1422_v61 = vadd.s32 1, %v4932_v43 }
 0x1ad   :  { %v4952_v41 = vmul.f32 %v7713_v32, %v7712_v60  ;;  %vm1479_vm1 = vcmp.gt.s32.totalorder %v1478_v22, 0  ;;  %v1134_v51 = vcvt.s32.f32 %v1127_v45  ;;  %v1419_v4 = vmul.u32 %v1412_v5, %v1403_v16 }
 0x1ae   :  { %vm1421_vm2 = vc.u32 %v4936_v39, %v4931_v3  ;;  %v1480_v35 = vsel %vm1479_vm1, %v1478_v22, 0  ;;  %v1212_v8 = vadd.s32 %v4765_v42, %v4775_v7  ;;  %vm3688_vm4 = vcmp.lt.s32.totalorder %v3687_v63, 0 }
 0x1af   :  { %v1423_v19 = vsel %vm1421_vm2, %v1422_v61, %v4932_v43  ;;  %v1482_v57 = vand.u32 31, %v1480_v35  ;;  %v1032_v27 = vxor.u32 2147483648, %v4952_v41  ;;  %v4963_v55 = vmul.f32 %v1134_v51, %v1132_v23 }
 0x1b0   :  { %v1229_v21 = vshll.u32 %v4839_v52, %v4920_v1  ;;  %v1424_v18 = vadd.s32 %v1423_v19, %v1419_v4  ;;  %v1230_v5 = vshrl.u32 %v1212_v8, %v1228_v44  ;;  %v1234_v15 = vshll.u32 %v1233_v53, 23 }
 0x1b1   :  { %v1475_v38 = vand.u32 8388607, %v7453_v59  ;;  %v1483_v34 = vsub.s32 32, %v1482_v57  ;;  %v4969_v62 = vsel %vm3688_vm4, 0, %v3687_v63  ;;  %v1485_v43 = vshll.u32 %v7671_v40, %v1482_v57 }
 0x1b2   :  { %v1425_v42 = vadd.s32 536870912, %v1424_v18  ;;  %v1488_v7 = vshll.u32 %v7668_v12, %v1482_v57  ;;  %v1491_v52 = vshll.u32 %v7669_v10, %v1482_v57  ;;  %v1481_v45 = vshrl.u32 %v1480_v35, 5 }
 0x1b3   :  { %v1486_v48 = vshrl.u32 %v7668_v12, %v1483_v34  ;;  %v1489_v46 = vshrl.u32 %v7669_v10, %v1483_v34  ;;  %v1492_v1 = vshrl.u32 %v7670_v31, %v1483_v34  ;;  %v1494_v17 = vshll.u32 %v7670_v31, %v1482_v57 }
 0x1b4   :  { %v4977_v58 = vshrl.u32 %v1425_v42, 30  ;;  %v1495_v16 = vshrl.u32 %v7672_v49, %v1483_v34  ;;  %v4981_v22 = vpop.eup %3926  ;;  %v1231_v60 = vor.u32 %v1230_v5, %v1229_v21  ;;  %v1235_v44 = vor.u32 4788187, %v1234_v15 }
 0x1b5   :  { %v1487_v32 = vor.u32 %v1486_v48, %v1485_v43  ;;  %v1490_v23 = vor.u32 %v1489_v46, %v1488_v7  ;;  %v1493_v63 = vor.u32 %v1492_v1, %v1491_v52  ;;  %v1476_v61 = vor.u32 8388608, %v1475_v38 }
 0x1b6   :  { %7714 = vst [vmem:[#allocation48_spill] sm:$0xff] %v4977_v58  ;;  %v1427_v53 = vshll.u32 %v4977_v58, 30  ;;  %v1496_v51 = vor.u32 %v1495_v16, %v1494_v17  ;;  %v1336_v4 = vsub.s32 4294967266, %v4969_v62  ;;  %v1497_v8 = vshll.u32 %v7672_v49, %v1482_v57 }
 0x1b7   :  { %v1498_v35 = vshrl.u32 %v7674_v9, %v1483_v34  ;;  %v4989_v19 = vadd.f32 %v4422_v37, %v4200_v50  ;;  %vm7483_vm12 = vcmp.lt.s32.totalorder %v4479_v6, 0  ;;  %vm1500_vm13 = vcmp.lt.s32.totalorder %v1481_v45, 1 }
 0x1b8   :  { %v4992_v21 = vsub.s32 %v1424_v18, %v1427_v53  ;;  %vm1502_vm14 = vcmp.lt.s32.totalorder %v1481_v45, 3  ;;  %vm1503_vm15 = vcmp.lt.s32.totalorder %v1481_v45, 4  ;;  %v1508_v38 = vsel %vm1500_vm13, %v1487_v32, %v1490_v23 }
 0x1b9   :  { %7715 = vst [vmem:[#allocation49_spill] sm:$0xff] %v4989_v19  ;;  %v1499_v5 = vor.u32 %v1498_v35, %v1497_v8  ;;  %v1505_v15 = vsel %vm1503_vm15, %v1493_v63, 2102212464  ;;  %v1509_v42 = vsel %vm1503_vm15, %v1496_v51, 920167782  ;;  %vm7463_vm1 = vcmp.lt.s32.totalorder %v4557_v14, 0 }
 0x1ba   :  { %v1430_v57 = vsub.s32 0, %v4992_v21  ;;  %v1484_v43 = vshrl.u32 %v7671_v40, %v1483_v34  ;;  %vm1501_vm2 = vcmp.lt.s32.totalorder %v1481_v45, 2  ;;  %v1510_v37 = vsel %vm1502_vm14, %v1493_v63, %v1509_v42 }
 0x1bb   :  { %v7716_v18 = vand.u32 2147483647, %v4479_v6  ;;  %v7717_v7 = vmov 0  ;;  %v1511_v48 = vsel %vm1501_vm2, %v1508_v38, %v1510_v37  ;;  %v1512_v46 = vsel %vm1500_vm13, %v1490_v23, %v1493_v63 }
 0x1bc   :  { %v1513_v52 = vsel %vm1503_vm15, %v1499_v5, 1326507024  ;;  %v1516_v1 = vshll.u32 %v1476_v61, 8  ;;  %v3690_v17 = vmin.u32 %v1430_v57, %v4992_v21  ;;  %v1504_v16 = vsel %vm1500_vm13, %v1484_v43, %v1487_v32 }
 0x1bd   :  { %vm5001_vm4 = vcmp.le.f32.partialorder %v7716_v18, 0.7853982  ;;  %v1506_v34 = vsel %vm1502_vm14, %v1490_v23, %v1505_v15  ;;  %v1514_v53 = vsel %vm1502_vm14, %v1496_v51, %v1513_v52  ;;  %v1236_v8 = vand.u32 2147483647, %v1235_v44 }
 0x1be   :  { %v7718_v7 = vsel %vm5001_vm4, 4294967295, %v7717_v7  ;;  %v1515_v35 = vsel %vm1501_vm2, %v1512_v46, %v1514_v53  ;;  %v5012_v42 = vmul.u32.u64.low %v1516_v1, %v1511_v48  ;;  %v5013_v18 = vmul.u32.u64.high %v1516_v1, %v1511_v48, %v5012_v42 }
 0x1bf   :  { %7719 = vst [vmem:[#allocation50_spill] sm:$0xff] %v7718_v7  ;;  %v1332_v38 = vsub.s32 32, %v4969_v62  ;;  %v1337_v63 = vadd.s32 127, %v1336_v4  ;;  %v5017_v5 = vmul.u32.u64.low %v1516_v1, %v1515_v35  ;;  %v5018_v61 = vmul.u32.u64.high %v1516_v1, %v1515_v35, %v5017_v5 }
 0x1c0   :  { %v1136_v57 = vxor.u32 2147483648, %v4963_v55  ;;  %v1238_v32 = vcvt.s32.f32 %v1231_v60  ;;  %v1507_v23 = vsel %vm1501_vm2, %v1504_v16, %v1506_v34  ;;  %v1575_v51 = vand.u32 2139095040, %v4989_v19  ;;  %v5040_v34 = vpop.f32.mrb[20].mxu0 }
 0x1c1   :  { %3928 = vcosq.f32 %v4945_v56  ;;  %v7720_v44 = vand.u32 2147483647, %v4557_v14  ;;  %v7721_v15 = vmov 0  ;;  %v1316_v4 = vadd.s32 %v4855_v25, %v4862_v20 }
 0x1c2   :  { %v1432_v43 = vclz %v3690_v17  ;;  %v1033_v45 = vsel %vm7483_vm12, %v1032_v27, %v4952_v41  ;;  %v1239_v60 = vmul.f32 %v1238_v32, %v1236_v8  ;;  %v1526_v37 = vadd.s32 1, %v5013_v18 }
 0x1c3   :  { %vm5026_vm13 = vcmp.le.f32.partialorder %v7720_v44, 0.7853982  ;;  %v1576_v48 = vshrl.u32 %v1575_v51, 23  ;;  %v1334_v46 = vshrl.u32 %v1316_v4, %v1332_v38  ;;  %v1338_v52 = vshll.u32 %v1337_v63, 23 }
 0x1c4   :  { %v7722_v15 = vsel %vm5026_vm13, 4294967295, %v7721_v15  ;;  %v1523_v16 = vmul.u32 %v1516_v1, %v1507_v23  ;;  %vm1525_vm14 = vc.u32 %v5018_v61, %v5012_v42  ;;  %v1137_v25 = vsel %vm7463_vm1, %v1136_v57, %v4963_v55 }
 0x1c5   :  { %7723 = vst [vmem:[#allocation51_spill] sm:$0xff] %v7722_v15  ;;  %v1527_v20 = vsel %vm1525_vm14, %v1526_v37, %v5013_v18  ;;  %v7452_v41 = vand.u32 2147483647, %v4989_v19  ;;  %v3697_v27 = vadd.s32 4294967169, %v1576_v48  ;;  %v1036_v17 = vsel %vm5001_vm4, %v4479_v6, %v1033_v45  ;;  %v7727_v45 = vld [vmem:[#allocation29_spill] sm:$0xff] }
 0x1c6   :  { %v1333_v1 = vshll.u32 %v4923_v30, %v4969_v62  ;;  %v3691_v53 = vadd.s32 4294967294, %v1432_v43  ;;  %v1528_v8 = vadd.s32 %v1527_v20, %v1523_v16  ;;  %3930 = vsinq.f32 %v4945_v56 }
 0x1c7   :  { %vm7464_vm15 = vcmp.lt.s32.totalorder %v4621_v2, 0  ;;  %v1240_v35 = vxor.u32 2147483648, %v1239_v60  ;;  %v1582_v55 = vadd.s32 1, %v3697_v27  ;;  %v5057_v18 = vsel %vm5026_vm13, %v4557_v14, %v1137_v25 }
 0x1c8   :  { %v1335_v38 = vor.u32 %v1334_v46, %v1333_v1  ;;  %v1339_v63 = vor.u32 4788187, %v1338_v52  ;;  %v1529_v5 = vadd.s32 536870912, %v1528_v8  ;;  %3932 = vcosq.f32 %v1036_v17 }
 0x1c9   :  { %v1579_v30 = vand.u32 8388607, %v7452_v41  ;;  %vm1583_vm2 = vcmp.gt.s32.totalorder %v1582_v55, 0  ;;  %v5063_v56 = vadd.f32 %v4520_v24, %v4181_v33  ;;  %3934 = vsinq.f32 %v1036_v17 }
 0x1ca   :  { %vm3692_vm14 = vcmp.lt.s32.totalorder %v3691_v53, 0  ;;  %v5065_v62 = vshrl.u32 %v1529_v5, 30  ;;  %v1584_v57 = vsel %vm1583_vm2, %v1582_v55, 0  ;;  %3936 = vcosq.f32 %v5057_v18 }
 0x1cb   :  { %7724 = vst [vmem:[#allocation52_spill] sm:$0xff] %v5063_v56  ;;  %v5071_v23 = vsel %vm7464_vm15, %v1240_v35, %v1239_v60  ;;  %v1586_v51 = vand.u32 31, %v1584_v57  ;;  %v5073_v44 = vpop.eup %3928  ;;  %v1340_v4 = vand.u32 2147483647, %v1339_v63  ;;  %v1342_v43 = vcvt.s32.f32 %v1335_v38 }
 0x1cc   :  { %7725 = vst [vmem:[#allocation53_spill] sm:$0xff] %v5065_v62  ;;  %7726 = vst [vmem:[#allocation54_spill] sm:$0xff] %v5073_v44  ;;  %v1531_v24 = vshll.u32 %v5065_v62, 30  ;;  %v5078_v37 = vadd.f32 %v7727_v45, %v4200_v50  ;;  %v5080_v48 = vsel %vm3692_vm14, 0, %v3691_v53  ;;  %v1580_v46 = vor.u32 8388608, %v1579_v30 }
 0x1cd   :  { %v1587_v52 = vsub.s32 32, %v1586_v51  ;;  %v1679_v16 = vand.u32 2139095040, %v5063_v56  ;;  %v1585_v60 = vshrl.u32 %v1584_v57, 5  ;;  %v1589_v20 = vshll.u32 %v7671_v40, %v1586_v51 }
 0x1ce   :  { %7728 = vst [vmem:[#allocation29_spill] sm:$0xff] %v5078_v37  ;;  %v5083_v25 = vsub.s32 %v1528_v8, %v1531_v24  ;;  %v1592_v27 = vshll.u32 %v7668_v12, %v1586_v51  ;;  %v1595_v35 = vshll.u32 %v7669_v10, %v1586_v51  ;;  %v1598_v38 = vshll.u32 %v7670_v31, %v1586_v51 }
 0x1cf   :  { %v1590_v17 = vshrl.u32 %v7668_v12, %v1587_v52  ;;  %v1593_v1 = vshrl.u32 %v7669_v10, %v1587_v52  ;;  %v1596_v53 = vshrl.u32 %v7670_v31, %v1587_v52  ;;  %v1599_v8 = vshrl.u32 %v7672_v49, %v1587_v52 }
 0x1d0   :  { %v1534_v55 = vsub.s32 0, %v5083_v25  ;;  %v1602_v63 = vshrl.u32 %v7674_v9, %v1587_v52  ;;  %v5095_v5 = vpop.eup %3930  ;;  %v1601_v24 = vshll.u32 %v7672_v49, %v1586_v51  ;;  %v1680_v45 = vshrl.u32 %v1679_v16, 23 }
 0x1d1   :  { %7729 = vst [vmem:[#allocation55_spill] sm:$0xff] %v5095_v5  ;;  %v1591_v30 = vor.u32 %v1590_v17, %v1589_v20  ;;  %v1594_v57 = vor.u32 %v1593_v1, %v1592_v27  ;;  %v1343_v32 = vmul.f32 %v1342_v43, %v1340_v4  ;;  %v1420_v41 = vadd.s32 %v4931_v3, %v4936_v39 }
 0x1d2   :  { %v1597_v59 = vor.u32 %v1596_v53, %v1595_v35  ;;  %v1600_v62 = vor.u32 %v1599_v8, %v1598_v38  ;;  %v5100_v15 = vpop.eup %3932  ;;  %v3694_v14 = vmin.u32 %v1534_v55, %v5083_v25  ;;  %v1603_v58 = vor.u32 %v1602_v63, %v1601_v24  ;;  %v5113_v35 = vpop.f32.mrb[21].mxu0 }
 0x1d3   :  { %7730 = vst [vmem:[#allocation56_spill] sm:$0xff] %v5100_v15  ;;  %vm1604_vm2 = vcmp.lt.s32.totalorder %v1585_v60, 1  ;;  %v5104_v5 = vpop.eup %3934  ;;  %v1436_v20 = vsub.s32 32, %v5080_v48  ;;  %v1440_v51 = vsub.s32 4294967266, %v5080_v48  ;;  %vm1607_vm14 = vcmp.lt.s32.totalorder %v1585_v60, 4 }
 0x1d4   :  { %v1612_v4 = vsel %vm1604_vm2, %v1591_v30, %v1594_v57  ;;  %v5109_v39 = vpop.eup %3936  ;;  %vm1606_vm1 = vcmp.lt.s32.totalorder %v1585_v60, 3  ;;  %v1613_v3 = vsel %vm1607_vm14, %v1600_v62, 920167782  ;;  %v1620_v43 = vshll.u32 %v1580_v46, 8 }
 0x1d5   :  { %7731 = vst [vmem:[#allocation57_spill] sm:$0xff] %v5109_v39  ;;  %v3701_v16 = vadd.s32 4294967169, %v1680_v45  ;;  %vm1605_vm15 = vcmp.lt.s32.totalorder %v1585_v60, 2  ;;  %v1609_v27 = vsel %vm1607_vm14, %v1597_v59, 2102212464  ;;  %v1614_v17 = vsel %vm1606_vm1, %v1597_v59, %v1613_v3 }
 0x1d6   :  { %v1616_v1 = vsel %vm1604_vm2, %v1594_v57, %v1597_v59  ;;  %v1536_v53 = vclz %v3694_v14  ;;  %v1588_v55 = vshrl.u32 %v7671_v40, %v1587_v52  ;;  %v1615_v38 = vsel %vm1605_vm15, %v1612_v4, %v1614_v17 }
 0x1d7   :  { %v1617_v8 = vsel %vm1607_vm14, %v1603_v58, 1326507024  ;;  %v1344_v63 = vxor.u32 2147483648, %v1343_v32  ;;  %v5118_v44 = vmul.u32.u64.low %v1620_v43, %v1615_v38  ;;  %v5119_v46 = vmul.u32.u64.high %v1620_v43, %v1615_v38, %v5118_v44 }
 0x1d8   :  { %v1618_v24 = vsel %vm1606_vm1, %v1600_v62, %v1617_v8  ;;  %v1608_v45 = vsel %vm1604_vm2, %v1588_v55, %v1591_v30  ;;  %v1610_v3 = vsel %vm1606_vm1, %v1594_v57, %v1609_v27  ;;  %v1686_v39 = vadd.s32 1, %v3701_v16 }
 0x1d9   :  { %v1619_v59 = vsel %vm1605_vm15, %v1616_v1, %v1618_v24  ;;  %v1437_v14 = vshll.u32 %v4992_v21, %v5080_v48  ;;  %v1438_v52 = vshrl.u32 %v1420_v41, %v1436_v20  ;;  %v1441_v4 = vadd.s32 127, %v1440_v51 }
 0x1da   :  { %v7732_v58 = vand.u32 2147483647, %v5063_v56  ;;  %v3695_v62 = vadd.s32 4294967294, %v1536_v53  ;;  %v5129_v8 = vmul.u32.u64.low %v1620_v43, %v1619_v59  ;;  %v5130_v38 = vmul.u32.u64.high %v1620_v43, %v1619_v59, %v5129_v8 }
 0x1db   :  { %vm1687_vm14 = vcmp.gt.s32.totalorder %v1686_v39, 0  ;;  %v1611_v30 = vsel %vm1605_vm15, %v1608_v45, %v1610_v3  ;;  %v1630_v57 = vadd.s32 1, %v5119_v46  ;;  %v1783_v16 = vand.u32 2139095040, %v5078_v37 }
 0x1dc   :  { %v1683_v17 = vand.u32 8388607, %v7732_v58  ;;  %v1688_v27 = vsel %vm1687_vm14, %v1686_v39, 0  ;;  %3938 = vsinq.f32 %v5057_v18  ;;  %v7733_v21 = vand.u32 2147483647, %v4621_v2 }
 0x1dd   :  { %v7734_v41 = vmov 0  ;;  %vm7469_vm2 = vcmp.lt.s32.totalorder %v4686_v0, 0  ;;  %v1690_v48 = vand.u32 31, %v1688_v27  ;;  %v5153_v18 = vor.u32 %v1438_v52, %v1437_v14 }
 0x1de   :  { %vm5138_vm1 = vcmp.le.f32.partialorder %v7733_v21, 0.7853982  ;;  %v5151_v20 = vsel %vm7469_vm2, %v1344_v63, %v1343_v32  ;;  %v1684_v51 = vor.u32 8388608, %v1683_v17  ;;  %v1442_v39 = vshll.u32 %v1441_v4, 23 }
 0x1df   :  { %v7735_v41 = vsel %vm5138_vm1, 4294967295, %v7734_v41  ;;  %v5147_v60 = vsel %vm5138_vm1, %v4621_v2, %v5071_v23  ;;  %v1627_v1 = vmul.u32 %v1620_v43, %v1611_v30  ;;  %vm1629_vm15 = vc.u32 %v5130_v38, %v5118_v44 }
 0x1e0   :  { %7736 = vst [vmem:[#allocation58_spill] sm:$0xff] %v7735_v41  ;;  %v1691_v53 = vsub.s32 32, %v1690_v48  ;;  %vm3696_vm14 = vcmp.lt.s32.totalorder %v3695_v62, 0  ;;  %v1631_v55 = vsel %vm1629_vm15, %v1630_v57, %v5119_v46  ;;  %v1693_v24 = vshll.u32 %v7671_v40, %v1690_v48 }
 0x1e1   :  { %v1784_v23 = vshrl.u32 %v1783_v16, 23  ;;  %v1632_v45 = vadd.s32 %v1631_v55, %v1627_v1  ;;  %v1696_v32 = vshll.u32 %v7668_v12, %v1690_v48  ;;  %v1689_v59 = vshrl.u32 %v1688_v27, 5 }
 0x1e2   :  { %v1694_v3 = vshrl.u32 %v7668_v12, %v1691_v53  ;;  %v1697_v63 = vshrl.u32 %v7669_v10, %v1691_v53  ;;  %v1699_v43 = vshll.u32 %v7669_v10, %v1690_v48  ;;  %v1700_v14 = vshrl.u32 %v7670_v31, %v1691_v53 }
 0x1e3   :  { %v1702_v52 = vshll.u32 %v7670_v31, %v1690_v48  ;;  %v1633_v4 = vadd.s32 536870912, %v1632_v45  ;;  %v1703_v17 = vshrl.u32 %v7672_v49, %v1691_v53  ;;  %v1705_v30 = vshll.u32 %v7672_v49, %v1690_v48 }
 0x1e4   :  { %v1695_v58 = vor.u32 %v1694_v3, %v1693_v24  ;;  %v1698_v46 = vor.u32 %v1697_v63, %v1696_v32  ;;  %v1701_v8 = vor.u32 %v1700_v14, %v1699_v43  ;;  %v1706_v57 = vshrl.u32 %v7674_v9, %v1691_v53 }
 0x1e5   :  { %v1443_v21 = vor.u32 4788187, %v1442_v39  ;;  %v5169_v27 = vshrl.u32 %v1633_v4, 30  ;;  %v1704_v1 = vor.u32 %v1703_v17, %v1702_v52  ;;  %v1724_v55 = vshll.u32 %v1684_v51, 8  ;;  %v5189_v17 = vpop.f32.mrb[22].mxu0 }
 0x1e6   :  { %v1446_v41 = vcvt.s32.f32 %v5153_v18  ;;  %v5173_v2 = vsel %vm3696_vm14, 0, %v3695_v62  ;;  %v1707_v24 = vor.u32 %v1706_v57, %v1705_v30  ;;  %vm1708_vm15 = vcmp.lt.s32.totalorder %v1689_v59, 1  ;;  %v5175_v3 = vpop.eup %3938 }
 0x1e7   :  { %7737 = vst [vmem:[#allocation59_spill] sm:$0xff] %v5169_v27  ;;  %7738 = vst [vmem:[#allocation60_spill] sm:$0xff] %v5175_v3  ;;  %v7739_v48 = vand.u32 2147483647, %v4686_v0  ;;  %v7740_v32 = vmov 0  ;;  %v1635_v39 = vshll.u32 %v5169_v27, 30  ;;  %v1716_v51 = vsel %vm1708_vm15, %v1695_v58, %v1698_v46 }
 0x1e8   :  { %vm1711_vm9 = vcmp.lt.s32.totalorder %v1689_v59, 4  ;;  %v3705_v63 = vadd.s32 4294967169, %v1784_v23  ;;  %v1692_v18 = vshrl.u32 %v7671_v40, %v1691_v53  ;;  %vm1710_vm14 = vcmp.lt.s32.totalorder %v1689_v59, 3 }
 0x1e9   :  { %vm5179_vm2 = vcmp.le.f32.partialorder %v7739_v48, 0.7853982  ;;  %v1713_v62 = vsel %vm1711_vm9, %v1701_v8, 2102212464  ;;  %v1717_v43 = vsel %vm1711_vm9, %v1704_v1, 920167782  ;;  %v5186_v14 = vsub.s32 %v1632_v45, %v1635_v39 }
 0x1ea   :  { %v7741_v32 = vsel %vm5179_vm2, 4294967295, %v7740_v32  ;;  %vm1709_vm6 = vcmp.lt.s32.totalorder %v1689_v59, 2  ;;  %v1718_v52 = vsel %vm1710_vm14, %v1701_v8, %v1717_v43  ;;  %v1720_v4 = vsel %vm1708_vm15, %v1698_v46, %v1701_v8 }
 0x1eb   :  { %7742 = vst [vmem:[#allocation61_spill] sm:$0xff] %v7741_v32  ;;  %v1444_v30 = vand.u32 2147483647, %v1443_v21  ;;  %v1712_v57 = vsel %vm1708_vm15, %v1692_v18, %v1695_v58  ;;  %v1719_v48 = vsel %vm1709_vm6, %v1716_v51, %v1718_v52  ;;  %v1721_v16 = vsel %vm1711_vm9, %v1707_v24, 1326507024 }
 0x1ec   :  { %v1638_v23 = vsub.s32 0, %v5186_v14  ;;  %v1714_v53 = vsel %vm1710_vm14, %v1698_v46, %v1713_v62  ;;  %v1722_v27 = vsel %vm1710_vm14, %v1704_v1, %v1721_v16  ;;  %v1790_v3 = vadd.s32 1, %v3705_v63 }
 0x1ed   :  { %v1544_v45 = vsub.s32 4294967266, %v5173_v2  ;;  %v1723_v39 = vsel %vm1709_vm6, %v1720_v4, %v1722_v27  ;;  %v5196_v43 = vmul.u32.u64.low %v1724_v55, %v1719_v48  ;;  %v5197_v36 = vmul.u32.u64.high %v1724_v55, %v1719_v48, %v5196_v43 }
 0x1ee   :  { %v3698_v8 = vmin.u32 %v1638_v23, %v5186_v14  ;;  %v5201_v21 = vmul.u32.u64.low %v1724_v55, %v1723_v39  ;;  %v5202_v58 = vmul.u32.u64.high %v1724_v55, %v1723_v39, %v5201_v21  ;;  %vm1791_vm15 = vcmp.gt.s32.totalorder %v1790_v3, 0 }
 0x1ef   :  { %3940 = vcosq.f32 %v5147_v60  ;;  %v5205_v24 = vmul.f32 %v1446_v41, %v1444_v30  ;;  %v1715_v46 = vsel %vm1709_vm6, %v1712_v57, %v1714_v53  ;;  %v1792_v16 = vsel %vm1791_vm15, %v1790_v3, 0 }
 0x1f0   :  { %3942 = vsinq.f32 %v5147_v60  ;;  %v1640_v27 = vclz %v3698_v8  ;;  %v7743_v1 = vand.u32 2147483647, %v5078_v37  ;;  %v1794_v63 = vand.u32 31, %v1792_v16 }
 0x1f1   :  { %v5215_v18 = vsel %vm5179_vm2, %v4686_v0, %v5151_v20  ;;  %v1545_v62 = vadd.s32 127, %v1544_v45  ;;  %v1734_v41 = vadd.s32 1, %v5197_v36  ;;  %v5220_v59 = vadd.f32 %v4679_v26, %v4181_v33 }
 0x1f2   :  { %v1787_v51 = vand.u32 8388607, %v7743_v1  ;;  %v3699_v3 = vadd.s32 4294967294, %v1640_v27  ;;  %v1731_v60 = vmul.u32 %v1724_v55, %v1715_v46  ;;  %vm1733_vm6 = vc.u32 %v5202_v58, %v5196_v43 }
 0x1f3   :  { %7744 = vst [vmem:[#allocation62_spill] sm:$0xff] %v5220_v59  ;;  %v1795_v52 = vsub.s32 32, %v1794_v63  ;;  %v1524_v30 = vadd.s32 %v5012_v42, %v5018_v61  ;;  %v1540_v20 = vsub.s32 32, %v5173_v2  ;;  %v1735_v57 = vsel %vm1733_vm6, %v1734_v41, %v5197_v36 }
 0x1f4   :  { %v1736_v26 = vadd.s32 %v1735_v57, %v1731_v60  ;;  %v1788_v23 = vor.u32 8388608, %v1787_v51  ;;  %v1546_v53 = vshll.u32 %v1545_v62, 23  ;;  %vm3700_vm9 = vcmp.lt.s32.totalorder %v3699_v3, 0 }
 0x1f5   :  { %v1798_v55 = vshrl.u32 %v7668_v12, %v1795_v52  ;;  %v1801_v45 = vshrl.u32 %v7669_v10, %v1795_v52  ;;  %v1804_v39 = vshrl.u32 %v7670_v31, %v1795_v52  ;;  %v1797_v42 = vshll.u32 %v7671_v40, %v1794_v63 }
 0x1f6   :  { %v1737_v8 = vadd.s32 536870912, %v1736_v26  ;;  %v1800_v61 = vshll.u32 %v7668_v12, %v1794_v63  ;;  %v1887_v36 = vand.u32 2139095040, %v5220_v59  ;;  %v1793_v21 = vshrl.u32 %v1792_v16, 5 }
 0x1f7   :  { %v1803_v46 = vshll.u32 %v7669_v10, %v1794_v63  ;;  %v1806_v27 = vshll.u32 %v7670_v31, %v1794_v63  ;;  %v1807_v1 = vshrl.u32 %v7672_v49, %v1795_v52  ;;  %v5240_v51 = vsel %vm3700_vm9, 0, %v3699_v3 }
 0x1f8   :  { %v5242_v62 = vshrl.u32 %v1737_v8, 30  ;;  %v1799_v41 = vor.u32 %v1798_v55, %v1797_v42  ;;  %v1802_v60 = vor.u32 %v1801_v45, %v1800_v61  ;;  %v1809_v32 = vshll.u32 %v7672_v49, %v1794_v63 }
 0x1f9   :  { %v5244_v57 = vpop.eup %3940  ;;  %v1805_v4 = vor.u32 %v1804_v39, %v1803_v46  ;;  %v1808_v48 = vor.u32 %v1807_v1, %v1806_v27  ;;  %v1810_v16 = vshrl.u32 %v7674_v9, %v1795_v52  ;;  %v1542_v47 = vshrl.u32 %v1524_v30, %v1540_v20 }
 0x1fa   :  { %7745 = vst [vmem:[#allocation63_spill] sm:$0xff] %v5242_v62  ;;  %7746 = vst [vmem:[#allocation64_spill] sm:$0xff] %v5244_v57  ;;  %v5248_v0 = vpop.eup %3942  ;;  %v5250_v15 = vor.u32 4788187, %v1546_v53  ;;  %v1739_v3 = vshll.u32 %v5242_v62, 30  ;;  %v1828_v7 = vshll.u32 %v1788_v23, 8  ;;  %v1796_v61 = vshrl.u32 %v7671_v40, %v1795_v52 }
 0x1fb   :  { %vm7496_vm14 = vcmp.lt.s32.totalorder %v4804_v54, 0  ;;  %v1648_v55 = vsub.s32 4294967266, %v5240_v51  ;;  %v1811_v45 = vor.u32 %v1810_v16, %v1809_v32  ;;  %vm1812_vm15 = vcmp.lt.s32.totalorder %v1793_v21, 1 }
 0x1fc   :  { %v1888_v39 = vshrl.u32 %v1887_v36, 23  ;;  %v5255_v8 = vsub.s32 %v1736_v26, %v1739_v3  ;;  %vm1814_vm6 = vcmp.lt.s32.totalorder %v1793_v21, 3  ;;  %vm1815_vm9 = vcmp.lt.s32.totalorder %v1793_v21, 4 }
 0x1fd   :  { %v1820_v63 = vsel %vm1812_vm15, %v1799_v41, %v1802_v60  ;;  %v1817_v42 = vsel %vm1815_vm9, %v1805_v4, 2102212464  ;;  %v1821_v30 = vsel %vm1815_vm9, %v1808_v48, 920167782  ;;  %v1824_v20 = vsel %vm1812_vm15, %v1802_v60, %v1805_v4 }
 0x1fe   :  { %v1825_v53 = vsel %vm1815_vm9, %v1811_v45, 1326507024  ;;  %v1742_v23 = vsub.s32 0, %v5255_v8  ;;  %vm1813_vm12 = vcmp.lt.s32.totalorder %v1793_v21, 2  ;;  %v1822_v32 = vsel %vm1814_vm6, %v1805_v4, %v1821_v30 }
 0x1ff   :  { %v7747_v36 = vand.u32 2147483647, %v4804_v54  ;;  %v7748_v26 = vmov 0  ;;  %v1649_v46 = vadd.s32 127, %v1648_v55  ;;  %v1823_v27 = vsel %vm1813_vm12, %v1820_v63, %v1822_v32  ;;  %v5281_v55 = vpop.f32.mrb[23].mxu0 }
 0x200   :  { %v1826_v1 = vsel %vm1814_vm6, %v1808_v48, %v1825_v53  ;;  %v3709_v16 = vadd.s32 4294967169, %v1888_v39  ;;  %v3702_v3 = vmin.u32 %v1742_v23, %v5255_v8  ;;  %v1816_v45 = vsel %vm1812_vm15, %v1796_v61, %v1799_v41 }
 0x201   :  { %vm5264_vm11 = vcmp.le.f32.partialorder %v7747_v36, 0.7853982  ;;  %v1818_v52 = vsel %vm1814_vm6, %v1802_v60, %v1817_v42  ;;  %v1827_v4 = vsel %vm1813_vm12, %v1824_v20, %v1826_v1  ;;  %3944 = vcosq.f32 %v5215_v18 }
 0x202   :  { %v7749_v26 = vsel %vm5264_vm11, 4294967295, %v7748_v26  ;;  %v5274_v30 = vmul.u32.u64.low %v1828_v7, %v1827_v4  ;;  %v5275_v62 = vmul.u32.u64.high %v1828_v7, %v1827_v4, %v5274_v30  ;;  %v1644_v48 = vsub.s32 32, %v5240_v51 }
 0x203   :  { %7750 = vst [vmem:[#allocation65_spill] sm:$0xff] %v7749_v26  ;;  %v5277_v36 = vmul.u32.u64.low %v1828_v7, %v1823_v27  ;;  %v5278_v57 = vmul.u32.u64.high %v1828_v7, %v1823_v27, %v5277_v36  ;;  %v1744_v39 = vclz %v3702_v3  ;;  %v1894_v63 = vadd.s32 1, %v3709_v16 }
 0x204   :  { %v7751_v41 = vshll.u32 %v5083_v25, %v5173_v2  ;;  %v1650_v42 = vshll.u32 %v1649_v46, 23  ;;  %v1819_v20 = vsel %vm1813_vm12, %v1816_v45, %v1818_v52  ;;  %v7488_v53 = vand.u32 2147483647, %v5220_v59 }
 0x205   :  { %v7752_v23 = vxor.u32 2147483648, %v5205_v24  ;;  %v1628_v32 = vadd.s32 %v5118_v44, %v5130_v38  ;;  %v3703_v27 = vadd.s32 4294967294, %v1744_v39  ;;  %vm1895_vm15 = vcmp.gt.s32.totalorder %v1894_v63, 0 }
 0x206   :  { %v1543_v60 = vor.u32 %v1542_v47, %v7751_v41  ;;  %v1548_v1 = vand.u32 2147483647, %v5250_v15  ;;  %vm1837_vm6 = vc.u32 %v5275_v62, %v5277_v36  ;;  %v1838_v47 = vadd.s32 1, %v5278_v57 }
 0x207   :  { %v1449_v61 = vsel %vm7496_vm14, %v7752_v23, %v5205_v24  ;;  %v5303_v2 = vadd.f32 %v4757_v28, %v4200_v50  ;;  %v1646_v25 = vshrl.u32 %v1628_v32, %v1644_v48  ;;  %vm3704_vm12 = vcmp.lt.s32.totalorder %v3703_v27, 0 }
 0x208   :  { %v1835_v21 = vmul.u32 %v1828_v7, %v1819_v20  ;;  %v1896_v24 = vsel %vm1895_vm15, %v1894_v63, 0  ;;  %v1550_v46 = vcvt.s32.f32 %v1543_v60  ;;  %v5305_v16 = vor.u32 4788187, %v1650_v42 }
 0x209   :  { %7753 = vst [vmem:[#allocation66_spill] sm:$0xff] %v5303_v2  ;;  %v1839_v44 = vsel %vm1837_vm6, %v1838_v47, %v5278_v57  ;;  %v1891_v15 = vand.u32 8388607, %v7488_v53  ;;  %3946 = vsinq.f32 %v5215_v18  ;;  %v5314_v38 = vsel %vm5264_vm11, %v4804_v54, %v1449_v61 }
 0x20a   :  { %v1645_v28 = vshll.u32 %v5186_v14, %v5240_v51  ;;  %v1840_v7 = vadd.s32 %v1839_v44, %v1835_v21  ;;  %v5318_v3 = vmul.f32 %v1550_v46, %v1548_v1  ;;  %v5320_v45 = vsel %vm3704_vm12, 0, %v3703_v27 }
 0x20b   :  { %v1898_v52 = vand.u32 31, %v1896_v24  ;;  %v1732_v18 = vadd.s32 %v5196_v43, %v5202_v58  ;;  %v1991_v48 = vand.u32 2139095040, %v5303_v2  ;;  %v1892_v63 = vor.u32 8388608, %v1891_v15  ;;  %v5331_v41 = vpop.eup %3944 }
 0x20c   :  { %v5323_v4 = vor.u32 %v1646_v25, %v1645_v28  ;;  %v1841_v30 = vadd.s32 536870912, %v1840_v7  ;;  %v5329_v14 = vshrl.u32 %v1896_v24, 5  ;;  %7754 = vst [vmem:[#allocation67_spill] sm:$0xff] %v5331_v41  ;;  %v1752_v60 = vsub.s32 4294967266, %v5320_v45 }
 0x20d   :  { %v1899_v51 = vsub.s32 32, %v1898_v52  ;;  %v1901_v20 = vshll.u32 %v7671_v40, %v1898_v52  ;;  %v1904_v23 = vshll.u32 %v7668_v12, %v1898_v52  ;;  %v1907_v61 = vshll.u32 %v7669_v10, %v1898_v52 }
 0x20e   :  { %v5334_v42 = vshrl.u32 %v1841_v30, 30  ;;  %v1910_v1 = vshll.u32 %v7670_v31, %v1898_v52  ;;  %v1992_v25 = vshrl.u32 %v1991_v48, 23  ;;  %v1748_v21 = vsub.s32 32, %v5320_v45 }
 0x20f   :  { %v1902_v43 = vshrl.u32 %v7668_v12, %v1899_v51  ;;  %v1905_v58 = vshrl.u32 %v7669_v10, %v1899_v51  ;;  %v1908_v32 = vshrl.u32 %v7670_v31, %v1899_v51  ;;  %v1911_v47 = vshrl.u32 %v7672_v49, %v1899_v51 }
 0x210   :  { %7755 = vst [vmem:[#allocation68_spill] sm:$0xff] %v5334_v42  ;;  %v1843_v27 = vshll.u32 %v5334_v42, 30  ;;  %v1913_v30 = vshll.u32 %v7672_v49, %v1898_v52  ;;  %v1914_v53 = vshrl.u32 %v7674_v9, %v1899_v51  ;;  %v1753_v39 = vadd.s32 127, %v1752_v60 }
 0x211   :  { %v1903_v24 = vor.u32 %v1902_v43, %v1901_v20  ;;  %v1906_v46 = vor.u32 %v1905_v58, %v1904_v23  ;;  %v1909_v44 = vor.u32 %v1908_v32, %v1907_v61  ;;  %v1912_v28 = vor.u32 %v1911_v47, %v1910_v1 }
 0x212   :  { %v5346_v15 = vsub.s32 %v1840_v7, %v1843_v27  ;;  %vm1916_vm9 = vcmp.lt.s32.totalorder %v5329_v14, 1  ;;  %vm1917_vm15 = vcmp.lt.s32.totalorder %v5329_v14, 2  ;;  %vm1918_vm6 = vcmp.lt.s32.totalorder %v5329_v14, 3 }
 0x213   :  { %v5353_v48 = vpop.eup %3946  ;;  %v1915_v23 = vor.u32 %v1914_v53, %v1913_v30  ;;  %vm1919_vm12 = vcmp.lt.s32.totalorder %v5329_v14, 4  ;;  %v1924_v7 = vsel %vm1916_vm9, %v1903_v24, %v1906_v46  ;;  %v1900_v52 = vshrl.u32 %v7671_v40, %v1899_v51 }
 0x214   :  { %7756 = vst [vmem:[#allocation69_spill] sm:$0xff] %v5353_v48  ;;  %v1846_v20 = vsub.s32 0, %v5346_v15  ;;  %v1925_v43 = vsel %vm1919_vm12, %v1912_v28, 920167782  ;;  %v1928_v60 = vsel %vm1916_vm9, %v1906_v46, %v1909_v44  ;;  %v3713_v58 = vadd.s32 4294967169, %v1992_v25 }
 0x215   :  { %v1921_v32 = vsel %vm1919_vm12, %v1909_v44, 2102212464  ;;  %v1926_v27 = vsel %vm1918_vm6, %v1909_v44, %v1925_v43  ;;  %v1929_v1 = vsel %vm1919_vm12, %v1915_v23, 1326507024  ;;  %v1932_v30 = vshll.u32 %v1892_v63, 8 }
 0x216   :  { %v3706_v61 = vmin.u32 %v1846_v20, %v5346_v15  ;;  %v1927_v53 = vsel %vm1917_vm15, %v1924_v7, %v1926_v27  ;;  %v1930_v47 = vsel %vm1918_vm6, %v1912_v28, %v1929_v1  ;;  %v1998_v51 = vadd.s32 1, %v3713_v58 }
 0x217   :  { %v1750_v57 = vshrl.u32 %v1732_v18, %v1748_v21  ;;  %v1920_v25 = vsel %vm1916_vm9, %v1900_v52, %v1903_v24  ;;  %v1931_v20 = vsel %vm1917_vm15, %v1928_v60, %v1930_v47  ;;  %v1922_v44 = vsel %vm1918_vm6, %v1906_v46, %v1921_v32  ;;  %v5382_v18 = vpop.f32.mrb[24].mxu0 }
 0x218   :  { %v1848_v42 = vclz %v3706_v61  ;;  %v5375_v23 = vmul.u32.u64.low %v1932_v30, %v1931_v20  ;;  %v5376_v43 = vmul.u32.u64.high %v1932_v30, %v1931_v20, %v5375_v23  ;;  %vm1999_vm12 = vcmp.gt.s32.totalorder %v1998_v51, 0 }
 0x219   :  { %v1754_v7 = vshll.u32 %v1753_v39, 23  ;;  %v5378_v28 = vmul.u32.u64.low %v1932_v30, %v1927_v53  ;;  %v5379_v63 = vmul.u32.u64.high %v1932_v30, %v1927_v53, %v5378_v28  ;;  %v1654_v24 = vcvt.s32.f32 %v5323_v4  ;;  %v7759_v4 = vld [vmem:[#allocation42_spill] sm:$0xff] }
 0x21a   :  { %v3707_v27 = vadd.s32 4294967294, %v1848_v42  ;;  %v7757_v52 = vand.u32 2147483647, %v5303_v2  ;;  %v2000_v46 = vsel %vm1999_vm12, %v1998_v51, 0  ;;  %v1749_v58 = vshll.u32 %v5255_v8, %v5320_v45 }
 0x21b   :  { %v1923_v39 = vsel %vm1917_vm15, %v1920_v25, %v1922_v44  ;;  %v2002_v42 = vand.u32 31, %v2000_v46  ;;  %v7758_v61 = vand.u32 2147483647, %v5305_v16  ;;  %vm1941_vm6 = vc.u32 %v5376_v43, %v5378_v28 }
 0x21c   :  { %v1995_v60 = vand.u32 8388607, %v7757_v52  ;;  %vm3708_vm9 = vcmp.lt.s32.totalorder %v3707_v27, 0  ;;  %v5402_v53 = vadd.f32 %v7759_v4, %v4181_v33  ;;  %v5404_v47 = vor.u32 %v1750_v57, %v1749_v58 }
 0x21d   :  { %v5394_v32 = vmul.f32 %v1654_v24, %v7758_v61  ;;  %v5396_v1 = vsel %vm3708_vm9, 0, %v3707_v27  ;;  %v5406_v8 = vor.u32 4788187, %v1754_v7  ;;  %v1836_v45 = vadd.s32 %v5277_v36, %v5275_v62 }
 0x21e   :  { %7760 = vst [vmem:[#allocation42_spill] sm:$0xff] %v5402_v53  ;;  %v1942_v16 = vadd.s32 1, %v5379_v63  ;;  %v1939_v14 = vmul.u32 %v1932_v30, %v1923_v39  ;;  %v1996_v51 = vor.u32 8388608, %v1995_v60  ;;  %v2001_v25 = vshrl.u32 %v2000_v46, 5 }
 0x21f   :  { %v2003_v20 = vsub.s32 32, %v2002_v42  ;;  %v1852_v44 = vsub.s32 32, %v5396_v1  ;;  %v1856_v23 = vsub.s32 4294967266, %v5396_v1  ;;  %v2005_v57 = vshll.u32 %v7671_v40, %v2002_v42 }
 0x220   :  { %v1943_v27 = vsel %vm1941_vm6, %v1942_v16, %v5379_v63  ;;  %v2008_v52 = vshll.u32 %v7668_v12, %v2002_v42  ;;  %v2011_v36 = vshll.u32 %v7669_v10, %v2002_v42  ;;  %v2014_v60 = vshll.u32 %v7670_v31, %v2002_v42 }
 0x221   :  { %v1944_v24 = vadd.s32 %v1943_v27, %v1939_v14  ;;  %v2006_v7 = vshrl.u32 %v7668_v12, %v2003_v20  ;;  %v2009_v62 = vshrl.u32 %v7669_v10, %v2003_v20  ;;  %v2012_v30 = vshrl.u32 %v7670_v31, %v2003_v20 }
 0x222   :  { %v2015_v46 = vshrl.u32 %v7672_v49, %v2003_v20  ;;  %v1756_v58 = vand.u32 2147483647, %v5406_v8  ;;  %v1857_v4 = vadd.s32 127, %v1856_v23  ;;  %v2036_v27 = vshll.u32 %v1996_v51, 8 }
 0x223   :  { %v1945_v63 = vadd.s32 536870912, %v1944_v24  ;;  %v2007_v39 = vor.u32 %v2006_v7, %v2005_v57  ;;  %v2010_v61 = vor.u32 %v2009_v62, %v2008_v52  ;;  %v2013_v16 = vor.u32 %v2012_v30, %v2011_v36 }
 0x224   :  { %v2016_v14 = vor.u32 %v2015_v46, %v2014_v60  ;;  %vm7507_vm15 = vcmp.lt.s32.totalorder %v4886_v11, 0  ;;  %v2017_v41 = vshll.u32 %v7672_v49, %v2002_v42  ;;  %v2018_v48 = vshrl.u32 %v7674_v9, %v2003_v20 }
 0x225   :  { %v5424_v21 = vshrl.u32 %v1945_v63, 30  ;;  %v2095_v26 = vand.u32 2139095040, %v5402_v53  ;;  %v1854_v54 = vshrl.u32 %v1836_v45, %v1852_v44  ;;  %v2004_v8 = vshrl.u32 %v7671_v40, %v2003_v20 }
 0x226   :  { %vm2020_vm12 = vcmp.lt.s32.totalorder %v2001_v25, 1  ;;  %vm2023_vm9 = vcmp.lt.s32.totalorder %v2001_v25, 4  ;;  %v2019_v57 = vor.u32 %v2018_v48, %v2017_v41  ;;  %v1858_v52 = vshll.u32 %v1857_v4, 23 }
 0x227   :  { %7761 = vst [vmem:[#allocation70_spill] sm:$0xff] %v5424_v21  ;;  %v1947_v23 = vshll.u32 %v5424_v21, 30  ;;  %v2025_v7 = vsel %vm2023_vm9, %v2013_v16, 2102212464  ;;  %v2028_v51 = vsel %vm2020_vm12, %v2007_v39, %v2010_v61  ;;  %vm2022_vm6 = vcmp.lt.s32.totalorder %v2001_v25, 3 }
 0x228   :  { %v2029_v62 = vsel %vm2023_vm9, %v2016_v14, 920167782  ;;  %v2032_v36 = vsel %vm2020_vm12, %v2010_v61, %v2013_v16  ;;  %vm2021_vm14 = vcmp.lt.s32.totalorder %v2001_v25, 2  ;;  %v2033_v60 = vsel %vm2023_vm9, %v2019_v57, 1326507024 }
 0x229   :  { %v5431_v30 = vsub.s32 %v1944_v24, %v1947_v23  ;;  %v2030_v42 = vsel %vm2022_vm6, %v2013_v16, %v2029_v62  ;;  %v7762_v45 = vand.u32 2147483647, %v4886_v11  ;;  %v7763_v20 = vmov 0 }
 0x22a   :  { %v2024_v44 = vsel %vm2020_vm12, %v2004_v8, %v2007_v39  ;;  %v2026_v46 = vsel %vm2022_vm6, %v2010_v61, %v2025_v7  ;;  %v2031_v41 = vsel %vm2021_vm14, %v2028_v51, %v2030_v42  ;;  %v2034_v48 = vsel %vm2022_vm6, %v2016_v14, %v2033_v60 }
 0x22b   :  { %vm5435_vm5 = vcmp.le.f32.partialorder %v7762_v45, 0.7853982  ;;  %vm7508_vm3 = vcmp.lt.s32.totalorder %v4989_v19, 0  ;;  %v1950_v63 = vsub.s32 0, %v5431_v30  ;;  %v2035_v24 = vsel %vm2021_vm14, %v2032_v36, %v2034_v48 }
 0x22c   :  { %v7764_v20 = vsel %vm5435_vm5, 4294967295, %v7763_v20  ;;  %v5443_v4 = vmul.u32.u64.low %v2036_v27, %v2031_v41  ;;  %v5444_v16 = vmul.u32.u64.high %v2036_v27, %v2031_v41, %v5443_v4  ;;  %v7499_v62 = vand.u32 2147483647, %v5402_v53 }
 0x22d   :  { %7765 = vst [vmem:[#allocation71_spill] sm:$0xff] %v7764_v20  ;;  %v5447_v23 = vmul.u32.u64.low %v2036_v27, %v2035_v24  ;;  %v5448_v57 = vmul.u32.u64.high %v2036_v27, %v2035_v24, %v5447_v23  ;;  %v2096_v39 = vshrl.u32 %v2095_v26, 23  ;;  %v1853_v61 = vshll.u32 %v5346_v15, %v5396_v1 }
 0x22e   :  { %v1859_v14 = vor.u32 4788187, %v1858_v52  ;;  %v3710_v8 = vmin.u32 %v1950_v63, %v5431_v30  ;;  %v2027_v7 = vsel %vm2021_vm14, %v2024_v44, %v2026_v46  ;;  %3948 = vcosq.f32 %v5314_v38  ;;  %v5464_v52 = vpop.f32.mrb[25].mxu0 }
 0x22f   :  { %v7766_v51 = vxor.u32 2147483648, %v5318_v3  ;;  %v1758_v42 = vcvt.s32.f32 %v5404_v47  ;;  %v3717_v60 = vadd.s32 4294967169, %v2096_v39  ;;  %v1656_v26 = vxor.u32 2147483648, %v5394_v32 }
 0x230   :  { %v1855_v45 = vor.u32 %v1854_v54, %v1853_v61  ;;  %v1952_v15 = vclz %v3710_v8  ;;  %v2046_v1 = vadd.s32 1, %v5444_v16  ;;  %v2043_v44 = vmul.u32 %v2036_v27, %v2027_v7 }
 0x231   :  { %v1553_v36 = vsel %vm7507_vm15, %v7766_v51, %v5318_v3  ;;  %v5466_v25 = vmul.f32 %v1758_v42, %v1756_v58  ;;  %vm2045_vm14 = vc.u32 %v5448_v57, %v5443_v4  ;;  %v2102_v46 = vadd.s32 1, %v3717_v60 }
 0x232   :  { %v1860_v41 = vand.u32 2147483647, %v1859_v14  ;;  %v3711_v3 = vadd.s32 4294967294, %v1952_v15  ;;  %v2047_v47 = vsel %vm2045_vm14, %v2046_v1, %v5444_v16  ;;  %v2099_v48 = vand.u32 8388607, %v7499_v62 }
 0x233   :  { %3950 = vsinq.f32 %v5314_v38  ;;  %v2048_v54 = vadd.s32 %v2047_v47, %v2043_v44  ;;  %vm2103_vm12 = vcmp.gt.s32.totalorder %v2102_v46, 0  ;;  %v5476_v58 = vadd.f32 %v4938_v13, %v4200_v50 }
 0x234   :  { %v5481_v27 = vsel %vm5435_vm5, %v4886_v11, %v1553_v36  ;;  %v1862_v63 = vcvt.s32.f32 %v1855_v45  ;;  %vm3712_vm9 = vcmp.lt.s32.totalorder %v3711_v3, 0  ;;  %v2104_v24 = vsel %vm2103_vm12, %v2102_v46, 0 }
 0x235   :  { %v5486_v16 = vsel %vm7508_vm3, %v1656_v26, %v5394_v32  ;;  %v5488_v38 = vsel %vm3712_vm9, 0, %v3711_v3  ;;  %v2049_v23 = vadd.s32 536870912, %v2048_v54  ;;  %v2106_v39 = vand.u32 31, %v2104_v24 }
 0x236   :  { %v5491_v61 = vmul.f32 %v1862_v63, %v1860_v41  ;;  %v1940_v14 = vadd.s32 %v5378_v28, %v5376_v43  ;;  %v2100_v8 = vor.u32 8388608, %v2099_v48  ;;  %v2199_v32 = vand.u32 2139095040, %v5476_v58 }
 0x237   :  { %v5495_v7 = vshrl.u32 %v2049_v23, 30  ;;  %v2107_v51 = vsub.s32 32, %v2106_v39  ;;  %v1956_v42 = vsub.s32 32, %v5488_v38  ;;  %v1960_v60 = vsub.s32 4294967266, %v5488_v38 }
 0x238   :  { %v2105_v26 = vshrl.u32 %v2104_v24, 5  ;;  %v2109_v45 = vshll.u32 %v7671_v40, %v2106_v39  ;;  %v5502_v15 = vpop.eup %3948  ;;  %v2112_v28 = vshll.u32 %v7668_v12, %v2106_v39  ;;  %v2115_v46 = vshll.u32 %v7669_v10, %v2106_v39 }
 0x239   :  { %7767 = vst [vmem:[#allocation72_spill] sm:$0xff] %v5495_v7  ;;  %7768 = vst [vmem:[#allocation73_spill] sm:$0xff] %v5502_v15  ;;  %v2051_v1 = vshll.u32 %v5495_v7, 30  ;;  %v2110_v43 = vshrl.u32 %v7668_v12, %v2107_v51  ;;  %v2113_v44 = vshrl.u32 %v7669_v10, %v2107_v51  ;;  %v2116_v41 = vshrl.u32 %v7670_v31, %v2107_v51 }
 0x23a   :  { %v2118_v3 = vshll.u32 %v7670_v31, %v2106_v39  ;;  %v2119_v47 = vshrl.u32 %v7672_v49, %v2107_v51  ;;  %v5514_v23 = vshll.u32 %v2100_v8, 8  ;;  %v7769_v62 = vand.u32 2147483647, %v4989_v19 }
 0x23b   :  { %v5512_v48 = vsub.s32 %v2048_v54, %v2051_v1  ;;  %v2111_v63 = vor.u32 %v2110_v43, %v2109_v45  ;;  %v2114_v24 = vor.u32 %v2113_v44, %v2112_v28  ;;  %v7770_v36 = vmov 0 }
 0x23c   :  { %vm5518_vm6 = vcmp.le.f32.partialorder %v7769_v62, 0.7853982  ;;  %v1957_v13 = vshll.u32 %v5431_v30, %v5488_v38  ;;  %v1961_v21 = vadd.s32 127, %v1960_v60  ;;  %v2117_v7 = vor.u32 %v2116_v41, %v2115_v46 }
 0x23d   :  { %v7771_v36 = vsel %vm5518_vm6, 4294967295, %v7770_v36  ;;  %v2120_v20 = vor.u32 %v2119_v47, %v2118_v3  ;;  %v5524_v11 = vpop.eup %3950  ;;  %v2054_v54 = vsub.s32 0, %v5512_v48  ;;  %v2121_v45 = vshll.u32 %v7672_v49, %v2106_v39  ;;  %v5532_v47 = vpop.f32.mrb[26].mxu0 }
 0x23e   :  { %7772 = vst [vmem:[#allocation74_spill] sm:$0xff] %v7771_v36  ;;  %7773 = vst [vmem:[#allocation75_spill] sm:$0xff] %v5524_v11  ;;  %v2122_v8 = vshrl.u32 %v7674_v9, %v2107_v51  ;;  %v2200_v1 = vshrl.u32 %v2199_v32, 23  ;;  %vm7516_vm14 = vcmp.lt.s32.totalorder %v5063_v56, 0  ;;  %v1958_v62 = vshrl.u32 %v1940_v14, %v1956_v42 }
 0x23f   :  { %v2108_v43 = vshrl.u32 %v7671_v40, %v2107_v51  ;;  %vm2124_vm12 = vcmp.lt.s32.totalorder %v2105_v26, 1  ;;  %vm2127_vm9 = vcmp.lt.s32.totalorder %v2105_v26, 4  ;;  %v3714_v30 = vmin.u32 %v2054_v54, %v5512_v48 }
 0x240   :  { %v2123_v38 = vor.u32 %v2122_v8, %v2121_v45  ;;  %v2129_v60 = vsel %vm2127_vm9, %v2117_v7, 2102212464  ;;  %v2132_v28 = vsel %vm2124_vm12, %v2111_v63, %v2114_v24  ;;  %v1962_v44 = vshll.u32 %v1961_v21, 23 }
 0x241   :  { %vm2126_vm15 = vcmp.lt.s32.totalorder %v2105_v26, 3  ;;  %v2133_v46 = vsel %vm2127_vm9, %v2120_v20, 920167782  ;;  %v2136_v41 = vsel %vm2124_vm12, %v2114_v24, %v2117_v7  ;;  %v2056_v39 = vclz %v3714_v30 }
 0x242   :  { %vm2125_vm3 = vcmp.lt.s32.totalorder %v2105_v26, 2  ;;  %v2134_v3 = vsel %vm2126_vm15, %v2117_v7, %v2133_v46  ;;  %v2137_v32 = vsel %vm2127_vm9, %v2123_v38, 1326507024  ;;  %v2128_v14 = vsel %vm2124_vm12, %v2108_v43, %v2111_v63 }
 0x243   :  { %v2130_v42 = vsel %vm2126_vm15, %v2114_v24, %v2129_v60  ;;  %v2135_v51 = vsel %vm2125_vm3, %v2132_v28, %v2134_v3  ;;  %v2138_v15 = vsel %vm2126_vm15, %v2120_v20, %v2137_v32  ;;  %v3715_v11 = vadd.s32 4294967294, %v2056_v39 }
 0x244   :  { %v2139_v54 = vsel %vm2125_vm3, %v2136_v41, %v2138_v15  ;;  %v5537_v45 = vmul.u32.u64.low %v5514_v23, %v2135_v51  ;;  %v5538_v21 = vmul.u32.u64.high %v5514_v23, %v2135_v51, %v5537_v45  ;;  %v1963_v8 = vor.u32 4788187, %v1962_v44 }
 0x245   :  { %v5542_v30 = vmul.u32.u64.low %v5514_v23, %v2139_v54  ;;  %v5543_v7 = vmul.u32.u64.high %v5514_v23, %v2139_v54, %v5542_v30  ;;  %v3721_v38 = vadd.s32 4294967169, %v2200_v1  ;;  %3952 = vcosq.f32 %v5481_v27 }
 0x246   :  { %v1660_v20 = vsel %vm5518_vm6, %v4989_v19, %v5486_v16  ;;  %v7774_v15 = vand.u32 2147483647, %v5063_v56  ;;  %v7775_v63 = vmov 0  ;;  %vm7517_vm12 = vcmp.lt.s32.totalorder %v5078_v37, 0 }
 0x247   :  { %v1959_v24 = vor.u32 %v1958_v62, %v1957_v13  ;;  %vm3716_vm9 = vcmp.lt.s32.totalorder %v3715_v11, 0  ;;  %v2131_v43 = vsel %vm2125_vm3, %v2128_v14, %v2130_v42  ;;  %v2206_v1 = vadd.s32 1, %v3721_v38 }
 0x248   :  { %vm5552_vm15 = vcmp.le.f32.partialorder %v7774_v15, 0.7853982  ;;  %3954 = vsinq.f32 %v5481_v27  ;;  %v7778_v60 = vxor.u32 2147483648, %v5466_v25  ;;  %v1864_v28 = vxor.u32 2147483648, %v5491_v61 }
 0x249   :  { %v7776_v63 = vsel %vm5552_vm15, 4294967295, %v7775_v63  ;;  %v7779_v44 = vand.u32 2147483647, %v5476_v58  ;;  %v1964_v41 = vand.u32 2147483647, %v1963_v8  ;;  %vm2149_vm7 = vc.u32 %v5543_v7, %v5537_v45 }
 0x24a   :  { %7777 = vst [vmem:[#allocation76_spill] sm:$0xff] %v7776_v63  ;;  %v1761_v16 = vsel %vm7516_vm14, %v7778_v60, %v5466_v25  ;;  %v2150_v13 = vadd.s32 1, %v5538_v21  ;;  %vm2207_vm3 = vcmp.gt.s32.totalorder %v2206_v1, 0  ;;  %3956 = vcosq.f32 %v1660_v20 }
 0x24b   :  { %v2203_v46 = vand.u32 8388607, %v7779_v44  ;;  %v5570_v27 = vsel %vm3716_vm9, 0, %v3715_v11  ;;  %v2147_v26 = vmul.u32 %v5514_v23, %v2131_v43  ;;  %v2208_v62 = vsel %vm2207_vm3, %v2206_v1, 0 }
 0x24c   :  { %3958 = vsinq.f32 %v1660_v20  ;;  %v1966_v25 = vcvt.s32.f32 %v1959_v24  ;;  %v2151_v39 = vsel %vm2149_vm7, %v2150_v13, %v5538_v21  ;;  %v2210_v3 = vand.u32 31, %v2208_v62 }
 0x24d   :  { %v5577_v32 = vsel %vm5552_vm15, %v5063_v56, %v1761_v16  ;;  %v5582_v14 = vsel %vm7517_vm12, %v1864_v28, %v5491_v61  ;;  %v2152_v11 = vadd.s32 %v2151_v39, %v2147_v26  ;;  %v5586_v23 = vadd.f32 %v5040_v34, %v4181_v33 }
 0x24e   :  { %v5588_v42 = vmul.f32 %v1966_v25, %v1964_v41  ;;  %v2064_v51 = vsub.s32 4294967266, %v5570_v27  ;;  %v2204_v54 = vor.u32 8388608, %v2203_v46  ;;  %v2211_v21 = vsub.s32 32, %v2210_v3 }
 0x24f   :  { %7780 = vst [vmem:[#allocation77_spill] sm:$0xff] %v5586_v23  ;;  %v2153_v8 = vadd.s32 536870912, %v2152_v11  ;;  %v2209_v30 = vshrl.u32 %v2208_v62, 5  ;;  %v2213_v38 = vshll.u32 %v7671_v40, %v2210_v3  ;;  %v2216_v20 = vshll.u32 %v7668_v12, %v2210_v3  ;;  %v5597_v43 = vpop.eup %3952 }
 0x250   :  { %v2214_v61 = vshrl.u32 %v7668_v12, %v2211_v21  ;;  %v2217_v15 = vshrl.u32 %v7669_v10, %v2211_v21  ;;  %v2219_v24 = vshll.u32 %v7669_v10, %v2210_v3  ;;  %v2220_v34 = vshrl.u32 %v7670_v31, %v2211_v21  ;;  %7781 = vst [vmem:[#allocation78_spill] sm:$0xff] %v5597_v43 }
 0x251   :  { %v5599_v1 = vshrl.u32 %v2153_v8, 30  ;;  %v2222_v60 = vshll.u32 %v7670_v31, %v2210_v3  ;;  %v2223_v16 = vshrl.u32 %v7672_v49, %v2211_v21  ;;  %v2225_v28 = vshll.u32 %v7672_v49, %v2210_v3 }
 0x252   :  { %v2215_v44 = vor.u32 %v2214_v61, %v2213_v38  ;;  %v2218_v46 = vor.u32 %v2217_v15, %v2216_v20  ;;  %v2221_v41 = vor.u32 %v2220_v34, %v2219_v24  ;;  %v2226_v13 = vshrl.u32 %v7674_v9, %v2211_v21  ;;  %v5605_v26 = vpop.eup %3954 }
 0x253   :  { %7782 = vst [vmem:[#allocation79_spill] sm:$0xff] %v5599_v1  ;;  %7783 = vst [vmem:[#allocation80_spill] sm:$0xff] %v5605_v26  ;;  %v1968_v62 = vxor.u32 2147483648, %v5588_v42  ;;  %v2044_v25 = vadd.s32 %v5443_v4, %v5448_v57  ;;  %v2155_v39 = vshll.u32 %v5599_v1, 30  ;;  %v2224_v8 = vor.u32 %v2223_v16, %v2222_v60 }
 0x254   :  { %v2060_v63 = vsub.s32 32, %v5570_v27  ;;  %v2065_v56 = vadd.s32 127, %v2064_v51  ;;  %v2227_v43 = vor.u32 %v2226_v13, %v2225_v28  ;;  %v2244_v3 = vshll.u32 %v2204_v54, 8  ;;  %v5612_v38 = vpop.eup %3956 }
 0x255   :  { %7784 = vst [vmem:[#allocation81_spill] sm:$0xff] %v5612_v38  ;;  %v7785_v20 = vand.u32 2147483647, %v5078_v37  ;;  %v7786_v61 = vmov 0  ;;  %v5620_v15 = vsub.s32 %v2152_v11, %v2155_v39  ;;  %vm2228_vm9 = vcmp.lt.s32.totalorder %v2209_v30, 1 }
 0x256   :  { %vm2231_vm3 = vcmp.lt.s32.totalorder %v2209_v30, 4  ;;  %v2303_v4 = vand.u32 2139095040, %v5586_v23  ;;  %v5623_v57 = vpop.eup %3958  ;;  %vm2230_vm14 = vcmp.lt.s32.totalorder %v2209_v30, 3  ;;  %v2236_v54 = vsel %vm2228_vm9, %v2215_v44, %v2218_v46 }
 0x257   :  { %vm5616_vm7 = vcmp.le.f32.partialorder %v7785_v20, 0.7853982  ;;  %7789 = vst [vmem:[#allocation83_spill] sm:$0xff] %v5623_v57  ;;  %v2233_v51 = vsel %vm2231_vm3, %v2221_v41, 2102212464  ;;  %v2212_v34 = vshrl.u32 %v7671_v40, %v2211_v21  ;;  %vm2229_vm12 = vcmp.lt.s32.totalorder %v2209_v30, 2 }
 0x258   :  { %v7787_v61 = vsel %vm5616_vm7, 4294967295, %v7786_v61  ;;  %v2237_v24 = vsel %vm2231_vm3, %v2224_v8, 920167782  ;;  %v2240_v16 = vsel %vm2228_vm9, %v2218_v46, %v2221_v41  ;;  %v2066_v28 = vshll.u32 %v2065_v56, 23  ;;  %v5630_v20 = vpop.f32.mrb[27].mxu0 }
 0x259   :  { %7788 = vst [vmem:[#allocation82_spill] sm:$0xff] %v7787_v61  ;;  %v2238_v60 = vsel %vm2230_vm14, %v2221_v41, %v2237_v24  ;;  %v2158_v11 = vsub.s32 0, %v5620_v15  ;;  %v2241_v39 = vsel %vm2231_vm3, %v2227_v43, 1326507024  ;;  %v2232_v1 = vsel %vm2228_vm9, %v2212_v34, %v2215_v44 }
 0x25a   :  { %v2239_v13 = vsel %vm2229_vm12, %v2236_v54, %v2238_v60  ;;  %v2234_v26 = vsel %vm2230_vm14, %v2218_v46, %v2233_v51  ;;  %v2242_v38 = vsel %vm2230_vm14, %v2224_v8, %v2241_v39  ;;  %v2304_v57 = vshrl.u32 %v2303_v4, 23  ;;  %v7791_v51 = vld [vmem:[#allocation35_spill] sm:$0xff] }
 0x25b   :  { %v2062_v36 = vshrl.u32 %v2044_v25, %v2060_v63  ;;  %v2243_v21 = vsel %vm2229_vm12, %v2240_v16, %v2242_v38  ;;  %v5634_v19 = vmul.u32.u64.low %v2244_v3, %v2239_v13  ;;  %v5635_v24 = vmul.u32.u64.high %v2244_v3, %v2239_v13, %v5634_v19 }
 0x25c   :  { %v5638_v56 = vmul.u32.u64.low %v2244_v3, %v2243_v21  ;;  %v5639_v41 = vmul.u32.u64.high %v2244_v3, %v2243_v21, %v5638_v56  ;;  %v7526_v54 = vand.u32 2147483647, %v5586_v23  ;;  %v3725_v43 = vadd.s32 4294967169, %v2304_v57 }
 0x25d   :  { %v2061_v60 = vshll.u32 %v5512_v48, %v5570_v27  ;;  %v2067_v44 = vor.u32 4788187, %v2066_v28  ;;  %v3718_v46 = vmin.u32 %v2158_v11, %v5620_v15  ;;  %v2235_v63 = vsel %vm2229_vm12, %v2232_v1, %v2234_v26 }
 0x25e   :  { %3960 = vcosq.f32 %v5577_v32  ;;  %vm7528_vm14 = vcmp.lt.s32.totalorder %v5220_v59, 0  ;;  %v2310_v25 = vadd.s32 1, %v3725_v43  ;;  %v5650_v8 = vadd.f32 %v5113_v35, %v4200_v50 }
 0x25f   :  { %v1868_v38 = vsel %vm5616_vm7, %v5078_v37, %v5582_v14  ;;  %v1969_v48 = vsel %vm7528_vm14, %v1968_v62, %v5588_v42  ;;  %v2063_v27 = vor.u32 %v2062_v36, %v2061_v60  ;;  %v2254_v30 = vadd.s32 1, %v5635_v24 }
 0x260   :  { %7790 = vst [vmem:[#allocation84_spill] sm:$0xff] %v5650_v8  ;;  %v2251_v1 = vmul.u32 %v2244_v3, %v2235_v63  ;;  %vm2253_vm12 = vc.u32 %v5639_v41, %v5634_v19  ;;  %v2307_v35 = vand.u32 8388607, %v7526_v54  ;;  %vm2311_vm9 = vcmp.gt.s32.totalorder %v2310_v25, 0 }
 0x261   :  { %v2068_v26 = vand.u32 2147483647, %v2067_v44  ;;  %v2160_v4 = vclz %v3718_v46  ;;  %v2255_v57 = vsel %vm2253_vm12, %v2254_v30, %v5635_v24  ;;  %v2312_v14 = vsel %vm2311_vm9, %v2310_v25, 0 }
 0x262   :  { %v510_v34 = vcvt.s32.f32 %v7791_v51  ;;  %3962 = vsinq.f32 %v5577_v32  ;;  %v2256_v36 = vadd.s32 %v2255_v57, %v2251_v1  ;;  %v2407_v42 = vand.u32 2139095040, %v5650_v8 }
 0x263   :  { %3964 = vcosq.f32 %v1868_v38  ;;  %v7792_v62 = vand.u32 2147483647, %v5220_v59  ;;  %v7793_v3 = vmov 0  ;;  %v2070_v16 = vcvt.s32.f32 %v2063_v27 }
 0x264   :  { %v2314_v28 = vand.u32 31, %v2312_v14  ;;  %v7796_v11 = vand.u32 2147483647, %v4785_v29  ;;  %3966 = vsinq.f32 %v1868_v38  ;;  %v2257_v39 = vadd.s32 536870912, %v2256_v36 }
 0x265   :  { %vm5670_vm3 = vcmp.le.f32.partialorder %v7792_v62, 0.7853982  ;;  %v5683_v21 = vmul.f32 %v2070_v16, %v2068_v26  ;;  %v3719_v24 = vadd.s32 4294967294, %v2160_v4  ;;  %v2308_v56 = vor.u32 8388608, %v2307_v35 }
 0x266   :  { %v7794_v3 = vsel %vm5670_vm3, 4294967295, %v7793_v3  ;;  %v5676_v13 = vmul.f32 %v510_v34, %v7796_v11  ;;  %v5681_v32 = vsel %vm5670_vm3, %v5220_v59, %v1969_v48  ;;  %v2315_v43 = vsub.s32 32, %v2314_v28 }
 0x267   :  { %7795 = vst [vmem:[#allocation35_spill] sm:$0xff] %v7794_v3  ;;  %v5685_v60 = vshrl.u32 %v2257_v39, 30  ;;  %v2317_v44 = vshll.u32 %v7671_v40, %v2314_v28  ;;  %v2320_v29 = vshll.u32 %v7668_v12, %v2314_v28  ;;  %v2408_v46 = vshrl.u32 %v2407_v42, 23 }
 0x268   :  { %v2318_v63 = vshrl.u32 %v7668_v12, %v2315_v43  ;;  %v2321_v25 = vshrl.u32 %v7669_v10, %v2315_v43  ;;  %v2323_v38 = vshll.u32 %v7669_v10, %v2314_v28  ;;  %v2324_v48 = vshrl.u32 %v7670_v31, %v2315_v43  ;;  %v5693_v27 = vpop.eup %3960 }
 0x269   :  { %7797 = vst [vmem:[#allocation85_spill] sm:$0xff] %v5685_v60  ;;  %7798 = vst [vmem:[#allocation86_spill] sm:$0xff] %v5693_v27  ;;  %v2259_v30 = vshll.u32 %v5685_v60, 30  ;;  %v2313_v1 = vshrl.u32 %v2312_v14, 5  ;;  %v2326_v35 = vshll.u32 %v7670_v31, %v2314_v28  ;;  %v2327_v26 = vshrl.u32 %v7672_v49, %v2315_v43 }
 0x26a   :  { %v2072_v4 = vxor.u32 2147483648, %v5683_v21  ;;  %v2319_v57 = vor.u32 %v2318_v63, %v2317_v44  ;;  %v2322_v51 = vor.u32 %v2321_v25, %v2320_v29  ;;  %v2325_v34 = vor.u32 %v2324_v48, %v2323_v38 }
 0x26b   :  { %v5699_v42 = vsub.s32 %v2256_v36, %v2259_v30  ;;  %v2328_v62 = vor.u32 %v2327_v26, %v2326_v35  ;;  %v2329_v16 = vshll.u32 %v7672_v49, %v2314_v28  ;;  %v2330_v11 = vshrl.u32 %v7674_v9, %v2315_v43 }
 0x26c   :  { %vm3720_vm12 = vcmp.lt.s32.totalorder %v3719_v24, 0  ;;  %v2316_v39 = vshrl.u32 %v7671_v40, %v2315_v43  ;;  %v2348_v14 = vshll.u32 %v2308_v56, 8  ;;  %v3729_v54 = vadd.s32 4294967169, %v2408_v46  ;;  %v5704_v3 = vpop.eup %3962 }
 0x26d   :  { %7799 = vst [vmem:[#allocation87_spill] sm:$0xff] %v5704_v3  ;;  %vm7553_vm9 = vcmp.lt.s32.totalorder %v5303_v2, 0  ;;  %v2262_v44 = vsub.s32 0, %v5699_v42  ;;  %v2331_v29 = vor.u32 %v2330_v11, %v2329_v16  ;;  %vm2332_vm14 = vcmp.lt.s32.totalorder %v2313_v1, 1  ;;  %v5708_v36 = vpop.eup %3964 }
 0x26e   :  { %vm2335_vm3 = vcmp.lt.s32.totalorder %v2313_v1, 4  ;;  %7800 = vst [vmem:[#allocation88_spill] sm:$0xff] %v5708_v36  ;;  %vm2333_vm15 = vcmp.lt.s32.totalorder %v2313_v1, 2  ;;  %vm2334_vm5 = vcmp.lt.s32.totalorder %v2313_v1, 3  ;;  %v2340_v28 = vsel %vm2332_vm14, %v2319_v57, %v2322_v51  ;;  %v5711_v25 = vpop.eup %3966 }
 0x26f   :  { %v2341_v63 = vsel %vm2335_vm3, %v2328_v62, 920167782  ;;  %7801 = vst [vmem:[#allocation89_spill] sm:$0xff] %v5711_v25  ;;  %v3722_v56 = vmin.u32 %v2262_v44, %v5699_v42  ;;  %v2337_v43 = vsel %vm2335_vm3, %v2325_v34, 2102212464  ;;  %v2344_v38 = vsel %vm2332_vm14, %v2322_v51, %v2325_v34 }
 0x270   :  { %v2342_v46 = vsel %vm2334_vm5, %v2325_v34, %v2341_v63  ;;  %v2163_v48 = vsel %vm3720_vm12, 0, %v3719_v24  ;;  %v2345_v35 = vsel %vm2335_vm3, %v2331_v29, 1326507024  ;;  %v2414_v26 = vadd.s32 1, %v3729_v54 }
 0x271   :  { %v2343_v30 = vsel %vm2333_vm15, %v2340_v28, %v2342_v46  ;;  %v2264_v16 = vclz %v3722_v56  ;;  %v2336_v11 = vsel %vm2332_vm14, %v2316_v39, %v2319_v57  ;;  %v2346_v59 = vsel %vm2334_vm5, %v2328_v62, %v2345_v35 }
 0x272   :  { %v7538_v60 = vand.u32 2147483647, %v5650_v8  ;;  %v2338_v44 = vsel %vm2334_vm5, %v2322_v51, %v2337_v43  ;;  %v2347_v27 = vsel %vm2333_vm15, %v2344_v38, %v2346_v59  ;;  %v2164_v24 = vsub.s32 32, %v2163_v48 }
 0x273   :  { %v5723_v63 = vmul.u32.u64.low %v2348_v14, %v2343_v30  ;;  %v5724_v3 = vmul.u32.u64.high %v2348_v14, %v2343_v30, %v5723_v63  ;;  %v3723_v34 = vadd.s32 4294967294, %v2264_v16  ;;  %v2148_v54 = vadd.s32 %v5537_v45, %v5543_v7 }
 0x274   :  { %v5727_v28 = vmul.u32.u64.low %v2348_v14, %v2347_v27  ;;  %v5728_v29 = vmul.u32.u64.high %v2348_v14, %v2347_v27, %v5727_v28  ;;  %v2168_v57 = vsub.s32 4294967266, %v2163_v48  ;;  %vm2415_vm14 = vcmp.gt.s32.totalorder %v2414_v26, 0 }
 0x275   :  { %v5734_v62 = vadd.f32 %v5189_v17, %v4181_v33  ;;  %vm3724_vm5 = vcmp.lt.s32.totalorder %v3723_v34, 0  ;;  %v2339_v59 = vsel %vm2333_vm15, %v2336_v11, %v2338_v44  ;;  %v2411_v51 = vand.u32 8388607, %v7538_v60 }
 0x276   :  { %v2416_v39 = vsel %vm2415_vm14, %v2414_v26, 0  ;;  %3968 = vcosq.f32 %v5681_v32  ;;  %v5743_v27 = vsel %vm7553_vm9, %v2072_v4, %v5683_v21  ;;  %v2358_v45 = vadd.s32 1, %v5724_v3  ;;  %v5755_v21 = vpop.f32.mrb[28].mxu0 }
 0x277   :  { %7802 = vst [vmem:[#allocation90_spill] sm:$0xff] %v5734_v62  ;;  %v2418_v7 = vand.u32 31, %v2416_v39  ;;  %v2165_v17 = vshll.u32 %v5620_v15, %v2163_v48  ;;  %v2166_v56 = vshrl.u32 %v2148_v54, %v2164_v24  ;;  %v5747_v43 = vsel %vm3724_vm5, 0, %v3723_v34  ;;  %v5796_v61 = vpop.f32.mrb[29].mxu0 }
 0x278   :  { %v5751_v1 = vadd.f32 %v5281_v55, %v4200_v50  ;;  %v2169_v46 = vadd.s32 127, %v2168_v57  ;;  %v2355_v38 = vmul.u32 %v2348_v14, %v2339_v59  ;;  %vm2357_vm15 = vc.u32 %v5728_v29, %v5723_v63 }
 0x279   :  { %v2419_v30 = vsub.s32 32, %v2418_v7  ;;  %v2359_v4 = vsel %vm2357_vm15, %v2358_v45, %v5724_v3  ;;  %v2412_v35 = vor.u32 8388608, %v2411_v51  ;;  %v2417_v26 = vshrl.u32 %v2416_v39, 5 }
 0x27a   :  { %7803 = vst [vmem:[#allocation91_spill] sm:$0xff] %v5751_v1  ;;  %v2272_v48 = vsub.s32 4294967266, %v5747_v43  ;;  %v2360_v16 = vadd.s32 %v2359_v4, %v2355_v38  ;;  %v2421_v14 = vshll.u32 %v7671_v40, %v2418_v7  ;;  %v2424_v44 = vshll.u32 %v7668_v12, %v2418_v7 }
 0x27b   :  { %v2422_v55 = vshrl.u32 %v7668_v12, %v2419_v30  ;;  %v2425_v11 = vshrl.u32 %v7669_v10, %v2419_v30  ;;  %v2427_v24 = vshll.u32 %v7669_v10, %v2418_v7  ;;  %v2428_v34 = vshrl.u32 %v7670_v31, %v2419_v30 }
 0x27c   :  { %v5766_v3 = vor.u32 %v2166_v56, %v2165_v17  ;;  %v2361_v28 = vadd.s32 536870912, %v2360_v16  ;;  %v2430_v54 = vshll.u32 %v7670_v31, %v2418_v7  ;;  %v2431_v57 = vshrl.u32 %v7672_v49, %v2419_v30 }
 0x27d   :  { %v2170_v59 = vshll.u32 %v2169_v46, 23  ;;  %v2423_v51 = vor.u32 %v2422_v55, %v2421_v14  ;;  %v2426_v39 = vor.u32 %v2425_v11, %v2424_v44  ;;  %v2429_v45 = vor.u32 %v2428_v34, %v2427_v24 }
 0x27e   :  { %v5770_v38 = vshrl.u32 %v2361_v28, 30  ;;  %v2432_v4 = vor.u32 %v2431_v57, %v2430_v54  ;;  %v2433_v60 = vshll.u32 %v7672_v49, %v2418_v7  ;;  %v2434_v15 = vshrl.u32 %v7674_v9, %v2419_v30 }
 0x27f   :  { %v7805_v36 = vand.u32 2147483647, %v5303_v2  ;;  %v7806_v17 = vmov 0  ;;  %v2273_v56 = vadd.s32 127, %v2272_v48  ;;  %vm2439_vm12 = vcmp.lt.s32.totalorder %v2417_v26, 4 }
 0x280   :  { %7804 = vst [vmem:[#allocation92_spill] sm:$0xff] %v5770_v38  ;;  %v2452_v25 = vshll.u32 %v2412_v35, 8  ;;  %v2511_v46 = vand.u32 2139095040, %v5734_v62  ;;  %v5781_v55 = vpop.eup %3968  ;;  %v2363_v11 = vshll.u32 %v5770_v38, 30  ;;  %v2435_v14 = vor.u32 %v2434_v15, %v2433_v60 }
 0x281   :  { %vm5776_vm3 = vcmp.le.f32.partialorder %v7805_v36, 0.7853982  ;;  %7809 = vst [vmem:[#allocation94_spill] sm:$0xff] %v5781_v55  ;;  %vm2436_vm14 = vcmp.lt.s32.totalorder %v2417_v26, 1  ;;  %v2441_v7 = vsel %vm2439_vm12, %v2429_v45, 2102212464  ;;  %v2420_v44 = vshrl.u32 %v7671_v40, %v2419_v30 }
 0x282   :  { %v7807_v17 = vsel %vm5776_vm3, 4294967295, %v7806_v17  ;;  %vm2438_vm5 = vcmp.lt.s32.totalorder %v2417_v26, 3  ;;  %v2444_v36 = vsel %vm2436_vm14, %v2423_v51, %v2426_v39  ;;  %v2445_v24 = vsel %vm2439_vm12, %v2432_v4, 920167782 }
 0x283   :  { %7808 = vst [vmem:[#allocation93_spill] sm:$0xff] %v7807_v17  ;;  %v5787_v34 = vsub.s32 %v2360_v16, %v2363_v11  ;;  %vm2437_vm15 = vcmp.lt.s32.totalorder %v2417_v26, 2  ;;  %v2446_v35 = vsel %vm2438_vm5, %v2429_v45, %v2445_v24  ;;  %v2448_v48 = vsel %vm2436_vm14, %v2426_v39, %v2429_v45 }
 0x284   :  { %v2440_v28 = vsel %vm2436_vm14, %v2420_v44, %v2423_v51  ;;  %v2442_v54 = vsel %vm2438_vm5, %v2426_v39, %v2441_v7  ;;  %v2447_v57 = vsel %vm2437_vm15, %v2444_v36, %v2446_v35  ;;  %v2449_v60 = vsel %vm2439_vm12, %v2435_v14, 1326507024 }
 0x285   :  { %v2366_v15 = vsub.s32 0, %v5787_v34  ;;  %v2450_v38 = vsel %vm2438_vm5, %v2432_v4, %v2449_v60  ;;  %v5792_v55 = vmul.u32.u64.low %v2452_v25, %v2447_v57  ;;  %v5793_v30 = vmul.u32.u64.high %v2452_v25, %v2447_v57, %v5792_v55 }
 0x286   :  { %v2171_v16 = vor.u32 4788187, %v2170_v59  ;;  %v2268_v11 = vsub.s32 32, %v5747_v43  ;;  %v2451_v45 = vsel %vm2437_vm15, %v2448_v48, %v2450_v38  ;;  %v2512_v51 = vshrl.u32 %v2511_v46, 23 }
 0x287   :  { %v2274_v39 = vshll.u32 %v2273_v56, 23  ;;  %v3726_v7 = vmin.u32 %v2366_v15, %v5787_v34  ;;  %v5801_v44 = vmul.u32.u64.low %v2452_v25, %v2451_v45  ;;  %v5802_v14 = vmul.u32.u64.high %v2452_v25, %v2451_v45, %v5801_v44 }
 0x288   :  { %v2252_v4 = vadd.s32 %v5634_v19, %v5639_v41  ;;  %v2443_v36 = vsel %vm2437_vm15, %v2440_v28, %v2442_v54  ;;  %v3733_v24 = vadd.s32 4294967169, %v2512_v51  ;;  %v7810_v35 = vand.u32 2147483647, %v5734_v62 }
 0x289   :  { %3970 = vsinq.f32 %v5681_v32  ;;  %v5814_v38 = vsel %vm5776_vm3, %v5303_v2, %v5743_v27  ;;  %v2368_v56 = vclz %v3726_v7  ;;  %v2462_v46 = vadd.s32 1, %v5793_v30 }
 0x28a   :  { %v2515_v59 = vand.u32 8388607, %v7810_v35  ;;  %v2172_v48 = vand.u32 2147483647, %v2171_v16  ;;  %v2174_v19 = vcvt.s32.f32 %v5766_v3  ;;  %v2270_v41 = vshrl.u32 %v2252_v4, %v2268_v11 }
 0x28b   :  { %v2518_v26 = vadd.s32 1, %v3733_v24  ;;  %v5818_v28 = vor.u32 4788187, %v2274_v39  ;;  %v3727_v54 = vadd.s32 4294967294, %v2368_v56  ;;  %v2459_v57 = vmul.u32 %v2452_v25, %v2443_v36 }
 0x28c   :  { %vm2461_vm12 = vc.u32 %v5802_v14, %v5792_v55  ;;  %v2516_v60 = vor.u32 8388608, %v2515_v59  ;;  %v2615_v27 = vand.u32 2139095040, %v5751_v1  ;;  %v2269_v15 = vshll.u32 %v5699_v42, %v5747_v43 }
 0x28d   :  { %v2463_v32 = vsel %vm2461_vm12, %v2462_v46, %v5793_v30  ;;  %vm2519_vm14 = vcmp.gt.s32.totalorder %v2518_v26, 0  ;;  %vm3728_vm5 = vcmp.lt.s32.totalorder %v3727_v54, 0  ;;  %v5826_v11 = vmul.f32 %v2174_v19, %v2172_v48 }
 0x28e   :  { %v2464_v3 = vadd.s32 %v2463_v32, %v2459_v57  ;;  %v2520_v16 = vsel %vm2519_vm14, %v2518_v26, 0  ;;  %v2356_v25 = vadd.s32 %v5723_v63, %v5728_v29  ;;  %v5830_v45 = vsel %vm3728_vm5, 0, %v3727_v54 }
 0x28f   :  { %v2522_v51 = vand.u32 31, %v2520_v16  ;;  %v5832_v39 = vor.u32 %v2270_v41, %v2269_v15  ;;  %v7557_v44 = vand.u32 2147483647, %v5751_v1  ;;  %v2372_v42 = vsub.s32 32, %v5830_v45 }
 0x290   :  { %v2465_v7 = vadd.s32 536870912, %v2464_v3  ;;  %v5837_v4 = vshll.u32 %v2516_v60, 8  ;;  %v2616_v36 = vshrl.u32 %v2615_v27, 23  ;;  %v2376_v24 = vsub.s32 4294967266, %v5830_v45 }
 0x291   :  { %v2523_v43 = vsub.s32 32, %v2522_v51  ;;  %v2525_v63 = vshll.u32 %v7671_v40, %v2522_v51  ;;  %v2528_v29 = vshll.u32 %v7668_v12, %v2522_v51  ;;  %v2531_v46 = vshll.u32 %v7669_v10, %v2522_v51 }
 0x292   :  { %v5840_v35 = vshrl.u32 %v2465_v7, 30  ;;  %v2521_v26 = vshrl.u32 %v2520_v16, 5  ;;  %v2534_v54 = vshll.u32 %v7670_v31, %v2522_v51  ;;  %v2619_v15 = vand.u32 8388607, %v7557_v44 }
 0x293   :  { %v2526_v59 = vshrl.u32 %v7668_v12, %v2523_v43  ;;  %v2529_v56 = vshrl.u32 %v7669_v10, %v2523_v43  ;;  %v2532_v48 = vshrl.u32 %v7670_v31, %v2523_v43  ;;  %v5848_v19 = vpop.eup %3970  ;;  %v2535_v57 = vshrl.u32 %v7672_v49, %v2523_v43 }
 0x294   :  { %7811 = vst [vmem:[#allocation95_spill] sm:$0xff] %v5840_v35  ;;  %7812 = vst [vmem:[#allocation96_spill] sm:$0xff] %v5848_v19  ;;  %v2467_v41 = vshll.u32 %v5840_v35, 30  ;;  %v2373_v7 = vshll.u32 %v5787_v34, %v5830_v45  ;;  %v3737_v19 = vadd.s32 4294967169, %v2616_v36  ;;  %v2374_v2 = vshrl.u32 %v2356_v25, %v2372_v42 }
 0x295   :  { %v2527_v32 = vor.u32 %v2526_v59, %v2525_v63  ;;  %v2530_v60 = vor.u32 %v2529_v56, %v2528_v29  ;;  %v2533_v27 = vor.u32 %v2532_v48, %v2531_v46  ;;  %v2536_v17 = vor.u32 %v2535_v57, %v2534_v54 }
 0x296   :  { %v5857_v30 = vsub.s32 %v2464_v3, %v2467_v41  ;;  %v2377_v35 = vadd.s32 127, %v2376_v24  ;;  %v2537_v16 = vshll.u32 %v7672_v49, %v2522_v51  ;;  %v2538_v37 = vshrl.u32 %v7674_v9, %v2523_v43 }
 0x297   :  { %vm2540_vm15 = vcmp.lt.s32.totalorder %v2521_v26, 1  ;;  %vm2542_vm12 = vcmp.lt.s32.totalorder %v2521_v26, 3  ;;  %vm2543_vm14 = vcmp.lt.s32.totalorder %v2521_v26, 4  ;;  %v2524_v45 = vshrl.u32 %v7671_v40, %v2523_v43 }
 0x298   :  { %v2470_v63 = vsub.s32 0, %v5857_v30  ;;  %v2539_v29 = vor.u32 %v2538_v37, %v2537_v16  ;;  %v2545_v59 = vsel %vm2543_vm14, %v2533_v27, 2102212464  ;;  %v2548_v56 = vsel %vm2540_vm15, %v2527_v32, %v2530_v60 }
 0x299   :  { %v2549_v34 = vsel %vm2543_vm14, %v2536_v17, 920167782  ;;  %vm2541_vm5 = vcmp.lt.s32.totalorder %v2521_v26, 2  ;;  %v2378_v51 = vshll.u32 %v2377_v35, 23  ;;  %v2552_v36 = vsel %vm2540_vm15, %v2530_v60, %v2533_v27 }
 0x29a   :  { %v3730_v3 = vmin.u32 %v2470_v63, %v5857_v30  ;;  %v2550_v25 = vsel %vm2542_vm12, %v2533_v27, %v2549_v34  ;;  %v2553_v24 = vsel %vm2543_vm14, %v2539_v29, 1326507024  ;;  %v2544_v37 = vsel %vm2540_vm15, %v2524_v45, %v2527_v32 }
 0x29b   :  { %v2551_v42 = vsel %vm2541_vm5, %v2548_v56, %v2550_v25  ;;  %v2546_v48 = vsel %vm2542_vm12, %v2530_v60, %v2545_v59  ;;  %v2554_v41 = vsel %vm2542_vm12, %v2536_v17, %v2553_v24  ;;  %v2622_v35 = vadd.s32 1, %v3737_v19 }
 0x29c   :  { %v2472_v46 = vclz %v3730_v3  ;;  %v2555_v54 = vsel %vm2541_vm5, %v2552_v36, %v2554_v41  ;;  %v5873_v43 = vmul.u32.u64.low %v5837_v4, %v2551_v42  ;;  %v5874_v57 = vmul.u32.u64.high %v5837_v4, %v2551_v42, %v5873_v43 }
 0x29d   :  { %v2176_v16 = vxor.u32 2147483648, %v5826_v11  ;;  %v5879_v27 = vmul.u32.u64.low %v5837_v4, %v2555_v54  ;;  %v5880_v29 = vmul.u32.u64.high %v5837_v4, %v2555_v54, %v5879_v27  ;;  %v2278_v32 = vcvt.s32.f32 %v5832_v39  ;;  %v5895_v39 = vpop.f32.mrb[30].mxu0 }
 0x29e   :  { %v3731_v63 = vadd.s32 4294967294, %v2472_v46  ;;  %v5883_v60 = vor.u32 %v2374_v2, %v2373_v7  ;;  %v2620_v17 = vor.u32 8388608, %v2619_v15  ;;  %vm2623_vm15 = vcmp.gt.s32.totalorder %v2622_v35, 0 }
 0x29f   :  { %v5885_v59 = vor.u32 4788187, %v2378_v51  ;;  %v2547_v56 = vsel %vm2541_vm5, %v2544_v37, %v2546_v48  ;;  %v2624_v34 = vsel %vm2623_vm15, %v2622_v35, 0  ;;  %v7813_v19 = vand.u32 2147483647, %v5818_v28 }
 0x2a0   :  { %vm3732_vm12 = vcmp.lt.s32.totalorder %v3731_v63, 0  ;;  %v2566_v25 = vadd.s32 1, %v5874_v57  ;;  %v5893_v42 = vshrl.u32 %v2624_v34, 5  ;;  %v2460_v2 = vadd.s32 %v5792_v55, %v5802_v14 }
 0x2a1   :  { %v5890_v3 = vmul.f32 %v2278_v32, %v7813_v19  ;;  %v2475_v45 = vsel %vm3732_vm12, 0, %v3731_v63  ;;  %v5901_v26 = vadd.f32 %v5382_v18, %v4181_v33  ;;  %v2382_v28 = vcvt.s32.f32 %v5883_v60 }
 0x2a2   :  { %v2476_v15 = vsub.s32 32, %v2475_v45  ;;  %v2480_v7 = vsub.s32 4294967266, %v2475_v45  ;;  %v2563_v51 = vmul.u32 %v5837_v4, %v2547_v56  ;;  %vm2565_vm14 = vc.u32 %v5880_v29, %v5873_v43 }
 0x2a3   :  { %7814 = vst [vmem:[#allocation97_spill] sm:$0xff] %v5901_v26  ;;  %v2626_v36 = vand.u32 31, %v2624_v34  ;;  %v2380_v24 = vand.u32 2147483647, %v5885_v59  ;;  %v2477_v46 = vshll.u32 %v5857_v30, %v2475_v45  ;;  %v2567_v55 = vsel %vm2565_vm14, %v2566_v25, %v5874_v57 }
 0x2a4   :  { %v5910_v14 = vshll.u32 %v2620_v17, 8  ;;  %v2481_v37 = vadd.s32 127, %v2480_v7  ;;  %v2568_v48 = vadd.s32 %v2567_v55, %v2563_v51  ;;  %vm2644_vm5 = vcmp.lt.s32.totalorder %v5893_v42, 1 }
 0x2a5   :  { %v2627_v18 = vsub.s32 32, %v2626_v36  ;;  %v2478_v41 = vshrl.u32 %v2460_v2, %v2476_v15  ;;  %v2629_v4 = vshll.u32 %v7671_v40, %v2626_v36  ;;  %vm2646_vm12 = vcmp.lt.s32.totalorder %v5893_v42, 3 }
 0x2a6   :  { %v2569_v54 = vadd.s32 536870912, %v2568_v48  ;;  %v2632_v57 = vshll.u32 %v7668_v12, %v2626_v36  ;;  %v2635_v63 = vshll.u32 %v7669_v10, %v2626_v36  ;;  %v2638_v32 = vshll.u32 %v7670_v31, %v2626_v36 }
 0x2a7   :  { %v2630_v30 = vshrl.u32 %v7668_v12, %v2627_v18  ;;  %v2633_v35 = vshrl.u32 %v7669_v10, %v2627_v18  ;;  %v2636_v27 = vshrl.u32 %v7670_v31, %v2627_v18  ;;  %v2639_v60 = vshrl.u32 %v7672_v49, %v2627_v18 }
 0x2a8   :  { %v2482_v17 = vshll.u32 %v2481_v37, 23  ;;  %v5924_v59 = vshrl.u32 %v2569_v54, 30  ;;  %v2641_v25 = vshll.u32 %v7672_v49, %v2626_v36  ;;  %v2642_v2 = vshrl.u32 %v7674_v9, %v2627_v18 }
 0x2a9   :  { %v2631_v56 = vor.u32 %v2630_v30, %v2629_v4  ;;  %v2634_v34 = vor.u32 %v2633_v35, %v2632_v57  ;;  %v2637_v19 = vor.u32 %v2636_v27, %v2635_v63  ;;  %v2640_v45 = vor.u32 %v2639_v60, %v2638_v32 }
 0x2aa   :  { %7815 = vst [vmem:[#allocation98_spill] sm:$0xff] %v5924_v59  ;;  %v7816_v15 = vand.u32 2147483647, %v5402_v53  ;;  %v7817_v7 = vmov 0  ;;  %v2479_v51 = vor.u32 %v2478_v41, %v2477_v46  ;;  %v2571_v55 = vshll.u32 %v5924_v59, 30 }
 0x2ab   :  { %vm2647_vm15 = vcmp.lt.s32.totalorder %v5893_v42, 4  ;;  %v2652_v37 = vsel %vm2644_vm5, %v2631_v56, %v2634_v34  ;;  %v2628_v36 = vshrl.u32 %v7671_v40, %v2627_v18  ;;  %v2643_v4 = vor.u32 %v2642_v2, %v2641_v25 }
 0x2ac   :  { %vm5930_vm14 = vcmp.le.f32.partialorder %v7816_v15, 0.7853982  ;;  %v2649_v54 = vsel %vm2647_vm15, %v2637_v19, 2102212464  ;;  %v2653_v30 = vsel %vm2647_vm15, %v2640_v45, 920167782  ;;  %v5940_v35 = vsub.s32 %v2568_v48, %v2571_v55 }
 0x2ad   :  { %v7818_v7 = vsel %vm5930_vm14, 4294967295, %v7817_v7  ;;  %v2483_v57 = vor.u32 4788187, %v2482_v17  ;;  %v2654_v63 = vsel %vm2646_vm12, %v2637_v19, %v2653_v30  ;;  %v2656_v46 = vsel %vm2644_vm5, %v2634_v34, %v2637_v19 }
 0x2ae   :  { %7819 = vst [vmem:[#allocation99_spill] sm:$0xff] %v7818_v7  ;;  %v2648_v41 = vsel %vm2644_vm5, %v2628_v36, %v2631_v56  ;;  %v2650_v27 = vsel %vm2646_vm12, %v2634_v34, %v2649_v54  ;;  %vm7820_vm9 = vcmp.lt.s32.totalorder %v5893_v42, 2  ;;  %v2657_v32 = vsel %vm2647_vm15, %v2643_v4, 1326507024 }
 0x2af   :  { %v2655_v18 = vsel %vm7820_vm9, %v2652_v37, %v2654_v63  ;;  %v7821_v60 = vand.u32 2147483647, %v5476_v58  ;;  %v7822_v48 = vmov 0  ;;  %v2574_v17 = vsub.s32 0, %v5940_v35 }
 0x2b0   :  { %v2658_v19 = vsel %vm2646_vm12, %v2640_v45, %v2657_v32  ;;  %v5962_v56 = vmul.u32.u64.low %v5910_v14, %v2655_v18  ;;  %v5963_v25 = vmul.u32.u64.high %v5910_v14, %v2655_v18, %v5962_v56  ;;  %vm7825_vm9 = vcmp.lt.s32.totalorder %v5402_v53, 0 }
 0x2b1   :  { %vm5954_vm3 = vcmp.le.f32.partialorder %v7821_v60, 0.7853982  ;;  %v2177_v34 = vsel %vm7825_vm9, %v2176_v16, %v5826_v11  ;;  %v2280_v2 = vxor.u32 2147483648, %v5890_v3  ;;  %v2383_v15 = vmul.f32 %v2382_v28, %v2380_v24  ;;  %v5987_v28 = vpop.f32.mrb[31].mxu0 }
 0x2b2   :  { %v7823_v48 = vsel %vm5954_vm3, 4294967295, %v7822_v48  ;;  %vm7826_vm5 = vcmp.lt.s32.totalorder %v5893_v42, 2  ;;  %v2484_v37 = vand.u32 2147483647, %v2483_v57  ;;  %v3734_v45 = vmin.u32 %v2574_v17, %v5940_v35 }
 0x2b3   :  { %7824 = vst [vmem:[#allocation100_spill] sm:$0xff] %v7823_v48  ;;  %v2659_v55 = vsel %vm7826_vm5, %v2656_v46, %v2658_v19  ;;  %vm7827_vm15 = vmmov %vm7826_vm5  ;;  %v7556_v30 = vand.u32 2147483647, %v5901_v26  ;;  %v2719_v11 = vand.u32 2139095040, %v5901_v26  ;;  %v5985_v16 = vadd.f32 %v5464_v52, %v4200_v50 }
 0x2b4   :  { %v5976_v36 = vmul.u32.u64.low %v5910_v14, %v2659_v55  ;;  %v5977_v4 = vmul.u32.u64.high %v5910_v14, %v2659_v55, %v5976_v36  ;;  %v2651_v54 = vsel %vm7827_vm15, %v2648_v41, %v2650_v27  ;;  %3972 = vcosq.f32 %v5814_v38 }
 0x2b5   :  { %v7828_v24 = vand.u32 2147483647, %v5586_v23  ;;  %v7829_v57 = vmov 0  ;;  %v2486_v42 = vcvt.s32.f32 %v2479_v51  ;;  %v2576_v63 = vclz %v3734_v45 }
 0x2b6   :  { %v2670_v46 = vadd.s32 1, %v5963_v25  ;;  %v2180_v41 = vsel %vm5930_vm14, %v5402_v53, %v2177_v34  ;;  %vm7832_vm9 = vcmp.lt.s32.totalorder %v5476_v58, 0  ;;  %v2384_v27 = vxor.u32 2147483648, %v2383_v15 }
 0x2b7   :  { %vm5992_vm12 = vcmp.le.f32.partialorder %v7828_v24, 0.7853982  ;;  %v2281_v52 = vsel %vm7832_vm9, %v2280_v2, %v5890_v3  ;;  %v2720_v18 = vshrl.u32 %v2719_v11, 23  ;;  %v2487_v32 = vmul.f32 %v2486_v42, %v2484_v37 }
 0x2b8   :  { %v7830_v57 = vsel %vm5992_vm12, 4294967295, %v7829_v57  ;;  %v3735_v60 = vadd.s32 4294967294, %v2576_v63  ;;  %v2667_v17 = vmul.u32 %v5910_v14, %v2651_v54  ;;  %vm2669_vm5 = vc.u32 %v5977_v4, %v5962_v56 }
 0x2b9   :  { %7831 = vst [vmem:[#allocation101_spill] sm:$0xff] %v7830_v57  ;;  %v2671_v51 = vsel %vm2669_vm5, %v2670_v46, %v5963_v25  ;;  %v3741_v19 = vadd.s32 4294967169, %v2720_v18  ;;  %v2723_v55 = vand.u32 8388607, %v7556_v30  ;;  %v2823_v34 = vand.u32 2139095040, %v5985_v16 }
 0x2ba   :  { %3974 = vsinq.f32 %v5814_v38  ;;  %vm7569_vm15 = vcmp.lt.s32.totalorder %v5586_v23, 0  ;;  %vm3736_vm9 = vcmp.lt.s32.totalorder %v3735_v60, 0  ;;  %v2672_v3 = vadd.s32 %v2671_v51, %v2667_v17 }
 0x2bb   :  { %v2284_v14 = vsel %vm5954_vm3, %v5476_v58, %v2281_v52  ;;  %vm7570_vm14 = vcmp.lt.s32.totalorder %v5650_v8, 0  ;;  %v6016_v2 = vsel %vm3736_vm9, 0, %v3735_v60  ;;  %v2726_v25 = vadd.s32 1, %v3741_v19 }
 0x2bc   :  { %3976 = vcosq.f32 %v2180_v41  ;;  %v2385_v37 = vsel %vm7569_vm15, %v2384_v27, %v2383_v15  ;;  %v2488_v45 = vxor.u32 2147483648, %v2487_v32  ;;  %v2673_v36 = vadd.s32 536870912, %v2672_v3 }
 0x2bd   :  { %3978 = vsinq.f32 %v2180_v41  ;;  %v2724_v38 = vor.u32 8388608, %v2723_v55  ;;  %vm2727_vm5 = vcmp.gt.s32.totalorder %v2726_v25, 0  ;;  %v2824_v54 = vshrl.u32 %v2823_v34, 23 }
 0x2be   :  { %3980 = vcosq.f32 %v2284_v14  ;;  %v2584_v11 = vsub.s32 4294967266, %v6016_v2  ;;  %v6021_v24 = vshrl.u32 %v2673_v36, 30  ;;  %v2728_v42 = vsel %vm2727_vm5, %v2726_v25, 0  ;;  %v6030_v41 = vpop.eup %3972 }
 0x2bf   :  { %3982 = vsinq.f32 %v2284_v14  ;;  %v6026_v63 = vsel %vm5992_vm12, %v5586_v23, %v2385_v37  ;;  %v2564_v15 = vadd.s32 %v5873_v43, %v5880_v29  ;;  %v2730_v46 = vand.u32 31, %v2728_v42 }
 0x2c0   :  { %7833 = vst [vmem:[#allocation102_spill] sm:$0xff] %v6021_v24  ;;  %v6034_v52 = vsel %vm7570_vm14, %v2488_v45, %v2487_v32  ;;  %v2675_v27 = vshll.u32 %v6021_v24, 30  ;;  %v6040_v60 = vadd.f32 %v5532_v47, %v4181_v33  ;;  %v2580_v17 = vsub.s32 32, %v6016_v2 }
 0x2c1   :  { %v2731_v51 = vsub.s32 32, %v2730_v46  ;;  %v6043_v19 = vshll.u32 %v2724_v38, 8  ;;  %v3745_v43 = vadd.s32 4294967169, %v2824_v54  ;;  %v2585_v29 = vadd.s32 127, %v2584_v11 }
 0x2c2   :  { %7834 = vst [vmem:[#allocation103_spill] sm:$0xff] %v6040_v60  ;;  %v6045_v55 = vsub.s32 %v2672_v3, %v2675_v27  ;;  %v2729_v34 = vshrl.u32 %v2728_v42, 5  ;;  %v2733_v32 = vshll.u32 %v7671_v40, %v2730_v46  ;;  %v2736_v25 = vshll.u32 %v7668_v12, %v2730_v46 }
 0x2c3   :  { %v2734_v14 = vshrl.u32 %v7668_v12, %v2731_v51  ;;  %v2737_v37 = vshrl.u32 %v7669_v10, %v2731_v51  ;;  %v2740_v47 = vshrl.u32 %v7670_v31, %v2731_v51  ;;  %v2739_v38 = vshll.u32 %v7669_v10, %v2730_v46 }
 0x2c4   :  { %v6052_v45 = vpop.eup %3974  ;;  %v2678_v36 = vsub.s32 0, %v6045_v55  ;;  %v2742_v3 = vshll.u32 %v7670_v31, %v2730_v46  ;;  %v2743_v54 = vshrl.u32 %v7672_v49, %v2731_v51  ;;  %v2745_v27 = vshll.u32 %v7672_v49, %v2730_v46 }
 0x2c5   :  { %v2735_v11 = vor.u32 %v2734_v14, %v2733_v32  ;;  %v2738_v42 = vor.u32 %v2737_v37, %v2736_v25  ;;  %v2746_v30 = vshrl.u32 %v7674_v9, %v2731_v51  ;;  %v2741_v59 = vor.u32 %v2740_v47, %v2739_v38 }
 0x2c6   :  { %v6060_v44 = vpop.eup %3976  ;;  %v3738_v18 = vmin.u32 %v2678_v36, %v6045_v55  ;;  %v2744_v57 = vor.u32 %v2743_v54, %v2742_v3  ;;  %v7836_v23 = vand.u32 2147483647, %v5985_v16  ;;  %v2581_v53 = vshll.u32 %v5940_v35, %v6016_v2 }
 0x2c7   :  { %7835 = vst [vmem:[#allocation104_spill] sm:$0xff] %v6060_v44  ;;  %v6065_v7 = vpop.eup %3978  ;;  %v2582_v32 = vshrl.u32 %v2564_v15, %v2580_v17  ;;  %v2747_v14 = vor.u32 %v2746_v30, %v2745_v27  ;;  %v2830_v25 = vadd.s32 1, %v3745_v43  ;;  %v2586_v37 = vshll.u32 %v2585_v29, 23 }
 0x2c8   :  { %v2827_v24 = vand.u32 8388607, %v7836_v23  ;;  %7837 = vst [vmem:[#allocation105_spill] sm:$0xff] %v6065_v7  ;;  %v6069_v46 = vpop.eup %3980  ;;  %v2680_v48 = vclz %v3738_v18  ;;  %vm2748_vm9 = vcmp.lt.s32.totalorder %v2729_v34, 1  ;;  %vm2751_vm5 = vcmp.lt.s32.totalorder %v2729_v34, 4 }
 0x2c9   :  { %v6071_v36 = vpop.eup %3982  ;;  %v2732_v47 = vshrl.u32 %v7671_v40, %v2731_v51  ;;  %vm2750_vm15 = vcmp.lt.s32.totalorder %v2729_v34, 3  ;;  %v2756_v23 = vsel %vm2748_vm9, %v2735_v11, %v2738_v42  ;;  %v2757_v38 = vsel %vm2751_vm5, %v2744_v57, 920167782 }
 0x2ca   :  { %v3739_v3 = vadd.s32 4294967294, %v2680_v48  ;;  %v2753_v54 = vsel %vm2751_vm5, %v2741_v59, 2102212464  ;;  %v2758_v35 = vsel %vm2750_vm15, %v2741_v59, %v2757_v38  ;;  %v2760_v2 = vsel %vm2748_vm9, %v2738_v42, %v2741_v59 }
 0x2cb   :  { %vm2749_vm14 = vcmp.lt.s32.totalorder %v2729_v34, 2  ;;  %v2752_v30 = vsel %vm2748_vm9, %v2732_v47, %v2735_v11  ;;  %v2761_v15 = vsel %vm2751_vm5, %v2747_v14, 1326507024  ;;  %v2828_v17 = vor.u32 8388608, %v2827_v24 }
 0x2cc   :  { %vm3740_vm12 = vcmp.lt.s32.totalorder %v3739_v3, 0  ;;  %v2759_v18 = vsel %vm2749_vm14, %v2756_v23, %v2758_v35  ;;  %v2762_v43 = vsel %vm2750_vm15, %v2744_v57, %v2761_v15  ;;  %vm2831_vm3 = vcmp.gt.s32.totalorder %v2830_v25, 0 }
 0x2cd   :  { %v6077_v29 = vsel %vm3740_vm12, 0, %v3739_v3  ;;  %v2754_v51 = vsel %vm2750_vm15, %v2738_v42, %v2753_v54  ;;  %v2763_v48 = vsel %vm2749_vm14, %v2760_v2, %v2762_v43  ;;  %v2832_v27 = vsel %vm2831_vm3, %v2830_v25, 0 }
 0x2ce   :  { %3984 = vcosq.f32 %v6026_v63  ;;  %v7838_v59 = vand.u32 2147483647, %v5650_v8  ;;  %v7839_v11 = vmov 0  ;;  %v2583_v24 = vor.u32 %v2582_v32, %v2581_v53 }
 0x2cf   :  { %v2587_v14 = vor.u32 4788187, %v2586_v37  ;;  %v6089_v57 = vmul.u32.u64.low %v6043_v19, %v2763_v48  ;;  %v6090_v47 = vmul.u32.u64.high %v6043_v19, %v2763_v48, %v6089_v57  ;;  %v2684_v38 = vsub.s32 32, %v6077_v29 }
 0x2d0   :  { %vm6084_vm9 = vcmp.le.f32.partialorder %v7838_v59, 0.7853982  ;;  %v6093_v23 = vmul.u32.u64.low %v6043_v19, %v2759_v18  ;;  %v6094_v42 = vmul.u32.u64.high %v6043_v19, %v2759_v18, %v6093_v23  ;;  %v2755_v53 = vsel %vm2749_vm14, %v2752_v30, %v2754_v51 }
 0x2d1   :  { %v7840_v11 = vsel %vm6084_vm9, 4294967295, %v7839_v11  ;;  %v6101_v25 = vsel %vm6084_vm9, %v5650_v8, %v6034_v52  ;;  %v2834_v32 = vand.u32 31, %v2832_v27  ;;  %v2668_v37 = vadd.s32 %v5962_v56, %v5977_v4 }
 0x2d2   :  { %7841 = vst [vmem:[#allocation106_spill] sm:$0xff] %v7840_v11  ;;  %v6107_v3 = vshll.u32 %v2828_v17, 8  ;;  %v2927_v35 = vand.u32 2139095040, %v6040_v60  ;;  %v2588_v2 = vand.u32 2147483647, %v2587_v14  ;;  %v2590_v15 = vcvt.s32.f32 %v2583_v24 }
 0x2d3   :  { %v2688_v18 = vsub.s32 4294967266, %v6077_v29  ;;  %v2835_v52 = vsub.s32 32, %v2834_v32  ;;  %v2771_v43 = vmul.u32 %v6043_v19, %v2755_v53  ;;  %vm2773_vm3 = vc.u32 %v6090_v47, %v6093_v23 }
 0x2d4   :  { %v2774_v34 = vadd.s32 1, %v6094_v42  ;;  %v2833_v30 = vshrl.u32 %v2832_v27, 5  ;;  %v2686_v56 = vshrl.u32 %v2668_v37, %v2684_v38  ;;  %v2837_v4 = vshll.u32 %v7671_v40, %v2834_v32 }
 0x2d5   :  { %v2838_v17 = vshrl.u32 %v7668_v12, %v2835_v52  ;;  %v2840_v51 = vshll.u32 %v7668_v12, %v2834_v32  ;;  %v2841_v59 = vshrl.u32 %v7669_v10, %v2835_v52  ;;  %v2843_v24 = vshll.u32 %v7669_v10, %v2834_v32 }
 0x2d6   :  { %v2775_v48 = vsel %vm2773_vm3, %v2774_v34, %v6094_v42  ;;  %v2844_v19 = vshrl.u32 %v7670_v31, %v2835_v52  ;;  %v2689_v14 = vadd.s32 127, %v2688_v18  ;;  %v2928_v54 = vshrl.u32 %v2927_v35, 23 }
 0x2d7   :  { %v2776_v57 = vadd.s32 %v2775_v48, %v2771_v43  ;;  %v2839_v53 = vor.u32 %v2838_v17, %v2837_v4  ;;  %v2842_v27 = vor.u32 %v2841_v59, %v2840_v51  ;;  %v2846_v37 = vshll.u32 %v7670_v31, %v2834_v32 }
 0x2d8   :  { %v2845_v38 = vor.u32 %v2844_v19, %v2843_v24  ;;  %v2847_v11 = vshrl.u32 %v7672_v49, %v2835_v52  ;;  %v6125_v8 = vpop.eup %3984  ;;  %v2849_v42 = vshll.u32 %v7672_v49, %v2834_v32  ;;  %v2850_v34 = vshrl.u32 %v7674_v9, %v2835_v52 }
 0x2d9   :  { %7842 = vst [vmem:[#allocation107_spill] sm:$0xff] %v6125_v8  ;;  %v2777_v44 = vadd.s32 536870912, %v2776_v57  ;;  %vm2852_vm14 = vcmp.lt.s32.totalorder %v2833_v30, 1  ;;  %vm2853_vm12 = vcmp.lt.s32.totalorder %v2833_v30, 2  ;;  %vm2854_vm15 = vcmp.lt.s32.totalorder %v2833_v30, 3 }
 0x2da   :  { %v2848_v7 = vor.u32 %v2847_v11, %v2846_v37  ;;  %vm2855_vm5 = vcmp.lt.s32.totalorder %v2833_v30, 4  ;;  %v2690_v18 = vshll.u32 %v2689_v14, 23  ;;  %v2851_v43 = vor.u32 %v2850_v34, %v2849_v42 }
 0x2db   :  { %v6129_v35 = vshrl.u32 %v2777_v44, 30  ;;  %v2860_v4 = vsel %vm2852_vm14, %v2839_v53, %v2842_v27  ;;  %v2857_v17 = vsel %vm2855_vm5, %v2845_v38, 2102212464  ;;  %v2864_v48 = vsel %vm2852_vm14, %v2842_v27, %v2845_v38 }
 0x2dc   :  { %v2861_v51 = vsel %vm2855_vm5, %v2848_v7, 920167782  ;;  %v3749_v59 = vadd.s32 4294967169, %v2928_v54  ;;  %v2836_v24 = vshrl.u32 %v7671_v40, %v2835_v52  ;;  %v2865_v19 = vsel %vm2855_vm5, %v2851_v43, 1326507024 }
 0x2dd   :  { %7843 = vst [vmem:[#allocation108_spill] sm:$0xff] %v6129_v35  ;;  %v2779_v32 = vshll.u32 %v6129_v35, 30  ;;  %v2862_v11 = vsel %vm2854_vm15, %v2845_v38, %v2861_v51  ;;  %v6136_v37 = vmul.f32 %v2590_v15, %v2588_v2  ;;  %v2685_v44 = vshll.u32 %v6045_v55, %v6077_v29 }
 0x2de   :  { %v2863_v14 = vsel %vm2853_vm12, %v2860_v4, %v2862_v11  ;;  %v2866_v42 = vsel %vm2854_vm15, %v2848_v7, %v2865_v19  ;;  %v2856_v54 = vsel %vm2852_vm14, %v2836_v24, %v2839_v53  ;;  %v2858_v35 = vsel %vm2854_vm15, %v2842_v27, %v2857_v17 }
 0x2df   :  { %v6142_v34 = vsub.s32 %v2776_v57, %v2779_v32  ;;  %v2867_v52 = vsel %vm2853_vm12, %v2864_v48, %v2866_v42  ;;  %v2687_v8 = vor.u32 %v2686_v56, %v2685_v44  ;;  %v2934_v15 = vadd.s32 1, %v3749_v59 }
 0x2e0   :  { %v6148_v38 = vmul.u32.u64.low %v6107_v3, %v2867_v52  ;;  %v6149_v2 = vmul.u32.u64.high %v6107_v3, %v2867_v52, %v6148_v38  ;;  %v2691_v43 = vor.u32 4788187, %v2690_v18  ;;  %3986 = vsinq.f32 %v6026_v63 }
 0x2e1   :  { %v2782_v55 = vsub.s32 0, %v6142_v34  ;;  %v6153_v29 = vmul.u32.u64.low %v6107_v3, %v2863_v14  ;;  %v6154_v7 = vmul.u32.u64.high %v6107_v3, %v2863_v14, %v6153_v29  ;;  %v2859_v57 = vsel %vm2853_vm12, %v2856_v54, %v2858_v35 }
 0x2e2   :  { %v7844_v53 = vand.u32 2147483647, %v6040_v60  ;;  %vm2935_vm3 = vcmp.gt.s32.totalorder %v2934_v15, 0  ;;  %3988 = vcosq.f32 %v6101_v25  ;;  %v2592_v27 = vxor.u32 2147483648, %v6136_v37 }
 0x2e3   :  { %v3742_v18 = vmin.u32 %v2782_v55, %v6142_v34  ;;  %v2936_v4 = vsel %vm2935_vm3, %v2934_v15, 0  ;;  %v2694_v17 = vcvt.s32.f32 %v2687_v8  ;;  %v2772_v51 = vadd.s32 %v6093_v23, %v6090_v47 }
 0x2e4   :  { %v2931_v56 = vand.u32 8388607, %v7844_v53  ;;  %vm2877_vm14 = vc.u32 %v6149_v2, %v6153_v29  ;;  %v2938_v63 = vand.u32 31, %v2936_v4  ;;  %v2692_v30 = vand.u32 2147483647, %v2691_v43 }
 0x2e5   :  { %v2784_v35 = vclz %v3742_v18  ;;  %v2875_v48 = vmul.u32 %v6107_v3, %v2859_v57  ;;  %v2878_v59 = vadd.s32 1, %v6154_v7  ;;  %v6170_v24 = vshrl.u32 %v2936_v4, 5 }
 0x2e6   :  { %v2932_v32 = vor.u32 8388608, %v2931_v56  ;;  %v2939_v11 = vsub.s32 32, %v2938_v63  ;;  %v2941_v19 = vshll.u32 %v7671_v40, %v2938_v63  ;;  %v2944_v47 = vshll.u32 %v7668_v12, %v2938_v63 }
 0x2e7   :  { %v3743_v8 = vadd.s32 4294967294, %v2784_v35  ;;  %v2879_v44 = vsel %vm2877_vm14, %v2878_v59, %v6154_v7  ;;  %v2947_v23 = vshll.u32 %v7669_v10, %v2938_v63  ;;  %v2950_v54 = vshll.u32 %v7670_v31, %v2938_v63 }
 0x2e8   :  { %v2880_v14 = vadd.s32 %v2879_v44, %v2875_v48  ;;  %v2942_v42 = vshrl.u32 %v7668_v12, %v2939_v11  ;;  %v2945_v3 = vshrl.u32 %v7669_v10, %v2939_v11  ;;  %v2948_v52 = vshrl.u32 %v7670_v31, %v2939_v11 }
 0x2e9   :  { %vm3744_vm12 = vcmp.lt.s32.totalorder %v3743_v8, 0  ;;  %v2951_v38 = vshrl.u32 %v7672_v49, %v2939_v11  ;;  %v2954_v15 = vshrl.u32 %v7674_v9, %v2939_v11  ;;  %v6182_v53 = vmul.f32 %v2694_v17, %v2692_v30 }
 0x2ea   :  { %v2787_v43 = vsel %vm3744_vm12, 0, %v3743_v8  ;;  %v2881_v55 = vadd.s32 536870912, %v2880_v14  ;;  %v2943_v7 = vor.u32 %v2942_v42, %v2941_v19  ;;  %v2946_v57 = vor.u32 %v2945_v3, %v2944_v47  ;;  %v6190_v35 = vpop.eup %3986 }
 0x2eb   :  { %v2792_v56 = vsub.s32 4294967266, %v2787_v43  ;;  %v6184_v18 = vshll.u32 %v2932_v32, 8  ;;  %v6188_v4 = vadd.f32 %v5630_v20, %v4200_v50  ;;  %7846 = vst [vmem:[#allocation110_spill] sm:$0xff] %v6190_v35  ;;  %v2949_v59 = vor.u32 %v2948_v52, %v2947_v23 }
 0x2ec   :  { %v6193_v48 = vshrl.u32 %v2881_v55, 30  ;;  %v2952_v8 = vor.u32 %v2951_v38, %v2950_v54  ;;  %v2953_v19 = vshll.u32 %v7672_v49, %v2938_v63  ;;  %v6196_v44 = vpop.eup %3988  ;;  %v2788_v17 = vsub.s32 32, %v2787_v43 }
 0x2ed   :  { %7845 = vst [vmem:[#allocation109_spill] sm:$0xff] %v6188_v4  ;;  %v2793_v30 = vadd.s32 127, %v2792_v56  ;;  %vm2956_vm5 = vcmp.lt.s32.totalorder %v6170_v24, 1  ;;  %v6201_v20 = vadd.f32 %v5755_v21, %v4181_v33  ;;  %vm2959_vm3 = vcmp.lt.s32.totalorder %v6170_v24, 4 }
 0x2ee   :  { %7847 = vst [vmem:[#allocation111_spill] sm:$0xff] %v6193_v48  ;;  %v2883_v32 = vshll.u32 %v6193_v48, 30  ;;  %v2955_v47 = vor.u32 %v2954_v15, %v2953_v19  ;;  %v2964_v23 = vsel %vm2956_vm5, %v2943_v7, %v2946_v57  ;;  %vm2957_vm14 = vcmp.lt.s32.totalorder %v6170_v24, 2 }
 0x2ef   :  { %7848 = vst [vmem:[#allocation112_spill] sm:$0xff] %v6201_v20  ;;  %vm2958_vm12 = vcmp.lt.s32.totalorder %v6170_v24, 3  ;;  %v2965_v63 = vsel %vm2959_vm3, %v2952_v8, 920167782  ;;  %v7849_v21 = vand.u32 2147483647, %v5734_v62  ;;  %v2790_v55 = vshrl.u32 %v2772_v51, %v2788_v17 }
 0x2f0   :  { %v7850_v3 = vmov 0  ;;  %v2794_v54 = vshll.u32 %v2793_v30, 23  ;;  %v6218_v52 = vsub.s32 %v2880_v14, %v2883_v32  ;;  %v2961_v38 = vsel %vm2959_vm3, %v2949_v59, 2102212464 }
 0x2f1   :  { %vm6214_vm15 = vcmp.le.f32.partialorder %v7849_v21, 0.7853982  ;;  %v2966_v15 = vsel %vm2958_vm12, %v2949_v59, %v2965_v63  ;;  %v2940_v56 = vshrl.u32 %v7671_v40, %v2939_v11  ;;  %v2968_v21 = vsel %vm2956_vm5, %v2946_v57, %v2949_v59 }
 0x2f2   :  { %v7851_v3 = vsel %vm6214_vm15, 4294967295, %v7850_v3  ;;  %v2967_v19 = vsel %vm2957_vm14, %v2964_v23, %v2966_v15  ;;  %vm7594_vm9 = vcmp.lt.s32.totalorder %v5751_v1, 0  ;;  %v2886_v14 = vsub.s32 0, %v6218_v52 }
 0x2f3   :  { %7852 = vst [vmem:[#allocation113_spill] sm:$0xff] %v7851_v3  ;;  %v2969_v30 = vsel %vm2959_vm3, %v2955_v47, 1326507024  ;;  %v6234_v32 = vmul.u32.u64.low %v6184_v18, %v2967_v19  ;;  %v6235_v42 = vmul.u32.u64.high %v6184_v18, %v2967_v19, %v6234_v32  ;;  %v2789_v51 = vshll.u32 %v6142_v34, %v2787_v43 }
 0x2f4   :  { %v2960_v11 = vsel %vm2956_vm5, %v2940_v56, %v2943_v7  ;;  %v2962_v59 = vsel %vm2958_vm12, %v2946_v57, %v2961_v38  ;;  %v2970_v17 = vsel %vm2958_vm12, %v2952_v8, %v2969_v30  ;;  %v2795_v23 = vor.u32 4788187, %v2794_v54 }
 0x2f5   :  { %v3746_v63 = vmin.u32 %v2886_v14, %v6218_v52  ;;  %v2971_v47 = vsel %vm2957_vm14, %v2968_v21, %v2970_v17  ;;  %v3031_v15 = vand.u32 2139095040, %v6188_v4  ;;  %vm7853_vm3 = vcmp.lt.s32.totalorder %v5734_v62, 0 }
 0x2f6   :  { %v2593_v34 = vsel %vm7853_vm3, %v2592_v27, %v6136_v37  ;;  %v2791_v43 = vor.u32 %v2790_v55, %v2789_v51  ;;  %v6255_v7 = vmul.u32.u64.low %v6184_v18, %v2971_v47  ;;  %v6256_v57 = vmul.u32.u64.high %v6184_v18, %v2971_v47, %v6255_v7 }
 0x2f7   :  { %v2888_v8 = vclz %v3746_v63  ;;  %v2963_v54 = vsel %vm2957_vm14, %v2960_v11, %v2962_v59  ;;  %v2982_v38 = vadd.s32 1, %v6235_v42  ;;  %v3032_v56 = vshrl.u32 %v3031_v15, 23 }
 0x2f8   :  { %3990 = vsinq.f32 %v6101_v25  ;;  %v7854_v19 = vand.u32 2147483647, %v5751_v1  ;;  %v7855_v21 = vmov 0  ;;  %v2696_v37 = vxor.u32 2147483648, %v6182_v53 }
 0x2f9   :  { %v3135_v27 = vand.u32 2139095040, %v6201_v20  ;;  %v2796_v55 = vand.u32 2147483647, %v2795_v23  ;;  %v3747_v14 = vadd.s32 4294967294, %v2888_v8  ;;  %v3753_v30 = vadd.s32 4294967169, %v3032_v56 }
 0x2fa   :  { %vm6264_vm5 = vcmp.le.f32.partialorder %v7854_v19, 0.7853982  ;;  %v7858_v24 = vand.u32 2147483647, %v6188_v4  ;;  %v6275_v25 = vsel %vm6214_vm15, %v5734_v62, %v2593_v34  ;;  %v2979_v11 = vmul.u32 %v6184_v18, %v2963_v54 }
 0x2fb   :  { %v7856_v21 = vsel %vm6264_vm5, 4294967295, %v7855_v21  ;;  %vm2981_vm14 = vc.u32 %v6256_v57, %v6234_v32  ;;  %v3136_v59 = vshrl.u32 %v3135_v27, 23  ;;  %v2798_v17 = vcvt.s32.f32 %v2791_v43 }
 0x2fc   :  { %7857 = vst [vmem:[#allocation114_spill] sm:$0xff] %v7856_v21  ;;  %v3035_v51 = vand.u32 8388607, %v7858_v24  ;;  %vm3748_vm12 = vcmp.lt.s32.totalorder %v3747_v14, 0  ;;  %v2983_v23 = vsel %vm2981_vm14, %v2982_v38, %v6235_v42  ;;  %v3038_v63 = vadd.s32 1, %v3753_v30 }
 0x2fd   :  { %v2697_v47 = vsel %vm7594_vm9, %v2696_v37, %v6182_v53  ;;  %v2891_v15 = vsel %vm3748_vm12, 0, %v3747_v14  ;;  %v2984_v7 = vadd.s32 %v2983_v23, %v2979_v11  ;;  %v3757_v8 = vadd.s32 4294967169, %v3136_v59 }
 0x2fe   :  { %v6284_v34 = vmul.f32 %v2798_v17, %v2796_v55  ;;  %v2896_v56 = vsub.s32 4294967266, %v2891_v15  ;;  %v3036_v18 = vor.u32 8388608, %v3035_v51  ;;  %v7582_v54 = vand.u32 2147483647, %v6201_v20 }
 0x2ff   :  { %3992 = vcosq.f32 %v6275_v25  ;;  %v2892_v43 = vsub.s32 32, %v2891_v15  ;;  %v2985_v19 = vadd.s32 536870912, %v2984_v7  ;;  %vm3039_vm3 = vcmp.gt.s32.totalorder %v3038_v63, 0 }
 0x300   :  { %v6291_v42 = vsel %vm6264_vm5, %v5751_v1, %v2697_v47  ;;  %v2897_v53 = vadd.s32 127, %v2896_v56  ;;  %v3040_v38 = vsel %vm3039_vm3, %v3038_v63, 0  ;;  %v3142_v37 = vadd.s32 1, %v3757_v8 }
 0x301   :  { %v2876_v27 = vadd.s32 %v6153_v29, %v6149_v2  ;;  %v6295_v55 = vshrl.u32 %v2985_v19, 30  ;;  %v3042_v14 = vand.u32 31, %v3040_v38  ;;  %v6299_v30 = vadd.f32 %v5796_v61, %v4200_v50 }
 0x302   :  { %v2893_v51 = vshll.u32 %v6218_v52, %v2891_v15  ;;  %v6303_v11 = vshll.u32 %v3036_v18, 8  ;;  %v6307_v59 = vand.u32 8388607, %v7582_v54  ;;  %v6309_v17 = vpop.eup %3990  ;;  %v3041_v23 = vshrl.u32 %v3040_v38, 5 }
 0x303   :  { %7859 = vst [vmem:[#allocation115_spill] sm:$0xff] %v6295_v55  ;;  %v2894_v2 = vshrl.u32 %v2876_v27, %v2892_v43  ;;  %v2987_v29 = vshll.u32 %v6295_v55, 30  ;;  %v3043_v63 = vsub.s32 32, %v3042_v14  ;;  %v2898_v47 = vshll.u32 %v2897_v53, 23 }
 0x304   :  { %v3045_v61 = vshll.u32 %v7671_v40, %v3042_v14  ;;  %v3048_v8 = vshll.u32 %v7668_v12, %v3042_v14  ;;  %v3051_v18 = vshll.u32 %v7669_v10, %v3042_v14  ;;  %v3054_v19 = vshll.u32 %v7670_v31, %v3042_v14 }
 0x305   :  { %v6314_v52 = vsub.s32 %v2984_v7, %v2987_v29  ;;  %v3046_v15 = vshrl.u32 %v7668_v12, %v3043_v63  ;;  %v3049_v56 = vshrl.u32 %v7669_v10, %v3043_v63  ;;  %v3052_v43 = vshrl.u32 %v7670_v31, %v3043_v63 }
 0x306   :  { %v3055_v38 = vshrl.u32 %v7672_v49, %v3043_v63  ;;  %v3057_v53 = vshll.u32 %v7672_v49, %v3042_v14  ;;  %v3058_v7 = vshrl.u32 %v7674_v9, %v3043_v63  ;;  %v2895_v29 = vor.u32 %v2894_v2, %v2893_v51 }
 0x307   :  { %v2990_v27 = vsub.s32 0, %v6314_v52  ;;  %v3047_v54 = vor.u32 %v3046_v15, %v3045_v61  ;;  %v3050_v24 = vor.u32 %v3049_v56, %v3048_v8  ;;  %v2899_v55 = vor.u32 4788187, %v2898_v47 }
 0x308   :  { %v3053_v3 = vor.u32 %v3052_v43, %v3051_v18  ;;  %v3056_v48 = vor.u32 %v3055_v38, %v3054_v19  ;;  %v3044_v21 = vshrl.u32 %v7671_v40, %v3043_v63  ;;  %v3059_v1 = vor.u32 %v3058_v7, %v3057_v53 }
 0x309   :  { %v6325_v62 = vpop.eup %3992  ;;  %v3750_v35 = vmin.u32 %v2990_v27, %v6314_v52  ;;  %vm3060_vm12 = vcmp.lt.s32.totalorder %v3041_v23, 1  ;;  %vm3061_vm3 = vcmp.lt.s32.totalorder %v3041_v23, 2  ;;  %vm3062_vm9 = vcmp.lt.s32.totalorder %v3041_v23, 3 }
 0x30a   :  { %vm3063_vm14 = vcmp.lt.s32.totalorder %v3041_v23, 4  ;;  %v3068_v14 = vsel %vm3060_vm12, %v3047_v54, %v3050_v24  ;;  %v3064_v8 = vsel %vm3060_vm12, %v3044_v21, %v3047_v54  ;;  %v3072_v47 = vsel %vm3060_vm12, %v3050_v24, %v3053_v3 }
 0x30b   :  { %v2992_v61 = vclz %v3750_v35  ;;  %v3065_v15 = vsel %vm3063_vm14, %v3053_v3, 2102212464  ;;  %v3069_v56 = vsel %vm3063_vm14, %v3056_v48, 920167782  ;;  %v3073_v18 = vsel %vm3063_vm14, %v3059_v1, 1326507024 }
 0x30c   :  { %v3066_v51 = vsel %vm3062_vm9, %v3050_v24, %v3065_v15  ;;  %v3070_v2 = vsel %vm3062_vm9, %v3053_v3, %v3069_v56  ;;  %v3140_v63 = vor.u32 8388608, %v6307_v59  ;;  %vm7860_vm15 = vcmp.gt.s32.totalorder %v3142_v37, 0 }
 0x30d   :  { %v3751_v43 = vadd.s32 4294967294, %v2992_v61  ;;  %v3071_v19 = vsel %vm3061_vm3, %v3068_v14, %v3070_v2  ;;  %v3144_v38 = vsel %vm7860_vm15, %v3142_v37, 0  ;;  %v2900_v53 = vand.u32 2147483647, %v2899_v55 }
 0x30e   :  { %v3074_v27 = vsel %vm3062_vm9, %v3056_v48, %v3073_v18  ;;  %v6336_v35 = vmul.u32.u64.low %v6303_v11, %v3071_v19  ;;  %v6337_v21 = vmul.u32.u64.high %v6303_v11, %v3071_v19, %v6336_v35  ;;  %v2902_v54 = vcvt.s32.f32 %v2895_v29 }
 0x30f   :  { %vm3752_vm5 = vcmp.lt.s32.totalorder %v3751_v43, 0  ;;  %v3067_v3 = vsel %vm3061_vm3, %v3064_v8, %v3066_v51  ;;  %v3075_v1 = vsel %vm3061_vm3, %v3072_v47, %v3074_v27  ;;  %v6346_v37 = vshrl.u32 %v3144_v38, 5 }
 0x310   :  { %v2995_v24 = vsel %vm3752_vm5, 0, %v3751_v43  ;;  %v6343_v7 = vmul.u32.u64.low %v6303_v11, %v3075_v1  ;;  %v6344_v59 = vmul.u32.u64.high %v6303_v11, %v3075_v1, %v6343_v7  ;;  %v2980_v48 = vadd.s32 %v6234_v32, %v6256_v57 }
 0x311   :  { %v2996_v55 = vsub.s32 32, %v2995_v24  ;;  %v3000_v14 = vsub.s32 4294967266, %v2995_v24  ;;  %v3146_v61 = vand.u32 31, %v3144_v38  ;;  %v6350_v15 = vmul.f32 %v2902_v54, %v2900_v53 }
 0x312   :  { %v3083_v29 = vmul.u32 %v6303_v11, %v3067_v3  ;;  %v3086_v23 = vadd.s32 1, %v6337_v21  ;;  %v6354_v8 = vshll.u32 %v3140_v63, 8  ;;  %v2997_v56 = vshll.u32 %v6314_v52, %v2995_v24 }
 0x313   :  { %v2998_v51 = vshrl.u32 %v2980_v48, %v2996_v55  ;;  %v3001_v2 = vadd.s32 127, %v3000_v14  ;;  %v3147_v47 = vsub.s32 32, %v3146_v61  ;;  %vm3085_vm9 = vc.u32 %v6344_v59, %v6336_v35 }
 0x314   :  { %v3149_v32 = vshll.u32 %v7671_v40, %v3146_v61  ;;  %vm3164_vm15 = vcmp.lt.s32.totalorder %v6346_v37, 1  ;;  %vm3165_vm5 = vcmp.lt.s32.totalorder %v6346_v37, 2  ;;  %v3087_v11 = vsel %vm3085_vm9, %v3086_v23, %v6337_v21 }
 0x315   :  { %v3002_v57 = vshll.u32 %v3001_v2, 23  ;;  %v3152_v18 = vshll.u32 %v7668_v12, %v3146_v61  ;;  %v3155_v43 = vshll.u32 %v7669_v10, %v3146_v61  ;;  %v3088_v52 = vadd.s32 %v3087_v11, %v3083_v29 }
 0x316   :  { %v3150_v19 = vshrl.u32 %v7668_v12, %v3147_v47  ;;  %v3153_v63 = vshrl.u32 %v7669_v10, %v3147_v47  ;;  %v3156_v38 = vshrl.u32 %v7670_v31, %v3147_v47  ;;  %v2999_v53 = vor.u32 %v2998_v51, %v2997_v56 }
 0x317   :  { %v3003_v27 = vor.u32 4788187, %v3002_v57  ;;  %v3158_v54 = vshll.u32 %v7670_v31, %v3146_v61  ;;  %v3159_v3 = vshrl.u32 %v7672_v49, %v3147_v47  ;;  %v3089_v21 = vadd.s32 536870912, %v3088_v52 }
 0x318   :  { %v3151_v1 = vor.u32 %v3150_v19, %v3149_v32  ;;  %v3154_v24 = vor.u32 %v3153_v63, %v3152_v18  ;;  %v3157_v7 = vor.u32 %v3156_v38, %v3155_v43  ;;  %v3161_v55 = vshll.u32 %v7672_v49, %v3146_v61 }
 0x319   :  { %v3160_v48 = vor.u32 %v3159_v3, %v3158_v54  ;;  %v3162_v14 = vshrl.u32 %v7674_v9, %v3147_v47  ;;  %vm3166_vm12 = vcmp.lt.s32.totalorder %v6346_v37, 3  ;;  %v7861_v29 = vand.u32 2147483647, %v5901_v26 }
 0x31a   :  { %v7862_v23 = vmov 0  ;;  %v6381_v56 = vshrl.u32 %v3089_v21, 30  ;;  %v3148_v51 = vshrl.u32 %v7671_v40, %v3147_v47  ;;  %vm3167_vm14 = vcmp.lt.s32.totalorder %v6346_v37, 4 }
 0x31b   :  { %vm6376_vm3 = vcmp.le.f32.partialorder %v7861_v29, 0.7853982  ;;  %v3172_v61 = vsel %vm3164_vm15, %v3151_v1, %v3154_v24  ;;  %v3006_v2 = vcvt.s32.f32 %v2999_v53  ;;  %v3163_v32 = vor.u32 %v3162_v14, %v3161_v55 }
 0x31c   :  { %v7863_v23 = vsel %vm6376_vm3, 4294967295, %v7862_v23  ;;  %7865 = vst [vmem:[#allocation117_spill] sm:$0xff] %v6381_v56  ;;  %v3169_v57 = vsel %vm3167_vm14, %v3157_v7, 2102212464  ;;  %v3173_v11 = vsel %vm3167_vm14, %v3160_v48, 920167782  ;;  %v3176_v63 = vsel %vm3164_vm15, %v3154_v24, %v3157_v7 }
 0x31d   :  { %7864 = vst [vmem:[#allocation116_spill] sm:$0xff] %v7863_v23  ;;  %v3004_v18 = vand.u32 2147483647, %v3003_v27  ;;  %v3091_v43 = vshll.u32 %v6381_v56, 30  ;;  %v3174_v19 = vsel %vm3166_vm12, %v3157_v7, %v3173_v11  ;;  %v3168_v47 = vsel %vm3164_vm15, %v3148_v51, %v3151_v1 }
 0x31e   :  { %v3170_v38 = vsel %vm3166_vm12, %v3154_v24, %v3169_v57  ;;  %v3175_v53 = vsel %vm3165_vm5, %v3172_v61, %v3174_v19  ;;  %v3177_v54 = vsel %vm3167_vm14, %v3163_v32, 1326507024  ;;  %v7866_v27 = vand.u32 2147483647, %v5985_v16 }
 0x31f   :  { %v7867_v3 = vmov 0  ;;  %v6404_v21 = vsub.s32 %v3088_v52, %v3091_v43  ;;  %v3178_v7 = vsel %vm3166_vm12, %v3160_v48, %v3177_v54  ;;  %v7870_v24 = vxor.u32 2147483648, %v6284_v34 }
 0x320   :  { %vm6400_vm9 = vcmp.le.f32.partialorder %v7866_v27, 0.7853982  ;;  %v6409_v1 = vmul.u32.u64.low %v6354_v8, %v3175_v53  ;;  %v6410_v55 = vmul.u32.u64.high %v6354_v8, %v3175_v53, %v6409_v1  ;;  %vm7871_vm15 = vcmp.lt.s32.totalorder %v5901_v26, 0 }
 0x321   :  { %v7868_v3 = vsel %vm6400_vm9, 4294967295, %v7867_v3  ;;  %v2801_v14 = vsel %vm7871_vm15, %v7870_v24, %v6284_v34  ;;  %v2904_v29 = vxor.u32 2147483648, %v6350_v15  ;;  %v3179_v52 = vsel %vm3165_vm5, %v3176_v63, %v3178_v7 }
 0x322   :  { %7869 = vst [vmem:[#allocation118_spill] sm:$0xff] %v7868_v3  ;;  %v6423_v51 = vadd.f32 %v5895_v39, %v4181_v33  ;;  %v3007_v48 = vmul.f32 %v3006_v2, %v3004_v18  ;;  %v3094_v61 = vsub.s32 0, %v6404_v21  ;;  %3994 = vsinq.f32 %v6275_v25 }
 0x323   :  { %v6427_v32 = vmul.u32.u64.low %v6354_v8, %v3179_v52  ;;  %v6428_v57 = vmul.u32.u64.high %v6354_v8, %v3179_v52, %v6427_v32  ;;  %v3171_v34 = vsel %vm3165_vm5, %v3168_v47, %v3170_v38  ;;  %v7598_v11 = vand.u32 2147483647, %v6299_v30 }
 0x324   :  { %7872 = vst [vmem:[#allocation119_spill] sm:$0xff] %v6423_v51  ;;  %v3239_v43 = vand.u32 2139095040, %v6299_v30  ;;  %3996 = vcosq.f32 %v6291_v42  ;;  %vm7609_vm14 = vcmp.lt.s32.totalorder %v6040_v60, 0  ;;  %v3754_v33 = vmin.u32 %v3094_v61, %v6404_v21 }
 0x325   :  { %v3190_v39 = vadd.s32 1, %v6410_v55  ;;  %v2804_v2 = vsel %vm6376_vm3, %v5901_v26, %v2801_v14  ;;  %vm7873_vm12 = vcmp.lt.s32.totalorder %v5985_v16, 0  ;;  %v3343_v18 = vand.u32 2139095040, %v6423_v51 }
 0x326   :  { %v2905_v25 = vsel %vm7873_vm12, %v2904_v29, %v6350_v15  ;;  %v3240_v37 = vshrl.u32 %v3239_v43, 23  ;;  %v3008_v19 = vxor.u32 2147483648, %v3007_v48  ;;  %v3096_v63 = vclz %v3754_v33 }
 0x327   :  { %v3187_v47 = vmul.u32 %v6354_v8, %v3171_v34  ;;  %vm3189_vm5 = vc.u32 %v6428_v57, %v6409_v1  ;;  %3998 = vsinq.f32 %v6291_v42  ;;  %v3243_v54 = vand.u32 8388607, %v7598_v11 }
 0x328   :  { %v3191_v38 = vsel %vm3189_vm5, %v3190_v39, %v6410_v55  ;;  %v3761_v53 = vadd.s32 4294967169, %v3240_v37  ;;  %4000 = vcosq.f32 %v2804_v2  ;;  %v3755_v15 = vadd.s32 4294967294, %v3096_v63 }
 0x329   :  { %v3192_v27 = vadd.s32 %v3191_v38, %v3187_v47  ;;  %v3344_v7 = vshrl.u32 %v3343_v18, 23  ;;  %4002 = vsinq.f32 %v2804_v2  ;;  %v6456_v8 = vsel %vm6400_vm9, %v5985_v16, %v2905_v25 }
 0x32a   :  { %v3246_v24 = vadd.s32 1, %v3761_v53  ;;  %v6460_v42 = vadd.f32 %v5987_v28, %v4200_v50  ;;  %v3009_v55 = vsel %vm7609_vm14, %v3008_v19, %v3007_v48  ;;  %v3084_v14 = vadd.s32 %v6336_v35, %v6344_v59 }
 0x32b   :  { %vm3756_vm15 = vcmp.lt.s32.totalorder %v3755_v15, 0  ;;  %v3193_v29 = vadd.s32 536870912, %v3192_v27  ;;  %v3244_v61 = vor.u32 8388608, %v3243_v54  ;;  %v7597_v32 = vand.u32 2147483647, %v6423_v51 }
 0x32c   :  { %v3099_v52 = vsel %vm3756_vm15, 0, %v3755_v15  ;;  %vm3247_vm12 = vcmp.gt.s32.totalorder %v3246_v24, 0  ;;  %v3765_v39 = vadd.s32 4294967169, %v3344_v7  ;;  %v6469_v50 = vpop.eup %3994  ;;  %4004 = vcosq.f32 %v6456_v8 }
 0x32d   :  { %v3100_v34 = vsub.s32 32, %v3099_v52  ;;  %v3104_v43 = vsub.s32 4294967266, %v3099_v52  ;;  %v6467_v33 = vshrl.u32 %v3193_v29, 30  ;;  %v7875_v35 = vand.u32 2147483647, %v6040_v60 }
 0x32e   :  { %v7876_v59 = vmov 0  ;;  %v3248_v48 = vsel %vm3247_vm12, %v3246_v24, 0  ;;  %v6479_v2 = vpop.eup %3996  ;;  %v3101_v63 = vshll.u32 %v6404_v21, %v3099_v52  ;;  %v6488_v38 = vshll.u32 %v3244_v61, 8 }
 0x32f   :  { %7874 = vst [vmem:[#allocation120_spill] sm:$0xff] %v6467_v33  ;;  %vm6475_vm5 = vcmp.le.f32.partialorder %v7875_v35, 0.7853982  ;;  %v3102_v37 = vshrl.u32 %v3084_v14, %v3100_v34  ;;  %v3105_v18 = vadd.s32 127, %v3104_v43  ;;  %v3195_v19 = vshll.u32 %v6467_v33, 30 }
 0x330   :  { %v7877_v59 = vsel %vm6475_vm5, 4294967295, %v7876_v59  ;;  %v6484_v25 = vsel %vm6475_vm5, %v6040_v60, %v3009_v55  ;;  %v3250_v47 = vand.u32 31, %v3248_v48  ;;  %v6492_v53 = vand.u32 8388607, %v7597_v32 }
 0x331   :  { %7878 = vst [vmem:[#allocation121_spill] sm:$0xff] %v7877_v59  ;;  %v3106_v54 = vshll.u32 %v3105_v18, 23  ;;  %v6494_v15 = vsub.s32 %v3192_v27, %v3195_v19  ;;  %v3350_v7 = vadd.s32 1, %v3765_v39  ;;  %v6497_v55 = vpop.eup %3998  ;;  %v3103_v14 = vor.u32 %v3102_v37, %v3101_v63 }
 0x332   :  { %v3249_v29 = vshrl.u32 %v3248_v48, 5  ;;  %v3251_v34 = vsub.s32 32, %v3250_v47  ;;  %v3253_v21 = vshll.u32 %v7671_v40, %v3250_v47  ;;  %v6500_v52 = vpop.eup %4000  ;;  %v3256_v35 = vshll.u32 %v7668_v12, %v3250_v47 }
 0x333   :  { %7879 = vst [vmem:[#allocation122_spill] sm:$0xff] %v6500_v52  ;;  %v3107_v61 = vor.u32 4788187, %v3106_v54  ;;  %v3198_v43 = vsub.s32 0, %v6494_v15  ;;  %v3259_v27 = vshll.u32 %v7669_v10, %v3250_v47  ;;  %v6505_v18 = vpop.eup %4002  ;;  %v3262_v37 = vshll.u32 %v7670_v31, %v3250_v47 }
 0x334   :  { %7880 = vst [vmem:[#allocation123_spill] sm:$0xff] %v6505_v18  ;;  %v3254_v39 = vshrl.u32 %v7668_v12, %v3251_v34  ;;  %v3257_v19 = vshrl.u32 %v7669_v10, %v3251_v34  ;;  %v3260_v48 = vshrl.u32 %v7670_v31, %v3251_v34  ;;  %v3263_v54 = vshrl.u32 %v7672_v49, %v3251_v34 }
 0x335   :  { %v3108_v63 = vand.u32 2147483647, %v3107_v61  ;;  %v3758_v32 = vmin.u32 %v3198_v43, %v6494_v15  ;;  %v3265_v28 = vshll.u32 %v7672_v49, %v3250_v47  ;;  %v3266_v59 = vshrl.u32 %v7674_v9, %v3251_v34 }
 0x336   :  { %v3255_v11 = vor.u32 %v3254_v39, %v3253_v21  ;;  %v3258_v24 = vor.u32 %v3257_v19, %v3256_v35  ;;  %v3261_v33 = vor.u32 %v3260_v48, %v3259_v27  ;;  %v3264_v52 = vor.u32 %v3263_v54, %v3262_v37  ;;  %v6516_v23 = vpop.eup %4004 }
 0x337   :  { %v3200_v60 = vclz %v3758_v32  ;;  %v3447_v18 = vand.u32 2139095040, %v6460_v42  ;;  %7881 = vst [vmem:[#allocation124_spill] sm:$0xff] %v6516_v23  ;;  %v3110_v26 = vcvt.s32.f32 %v3103_v14  ;;  %v3252_v61 = vshrl.u32 %v7671_v40, %v3251_v34 }
 0x338   :  { %v3267_v43 = vor.u32 %v3266_v59, %v3265_v28  ;;  %vm3268_vm12 = vcmp.lt.s32.totalorder %v3249_v29, 1  ;;  %vm3270_vm5 = vcmp.lt.s32.totalorder %v3249_v29, 3  ;;  %vm3271_vm3 = vcmp.lt.s32.totalorder %v3249_v29, 4 }
 0x339   :  { %v3759_v47 = vadd.s32 4294967294, %v3200_v60  ;;  %v3276_v21 = vsel %vm3268_vm12, %v3255_v11, %v3258_v24  ;;  %v3111_v35 = vmul.f32 %v3110_v26, %v3108_v63  ;;  %v3273_v32 = vsel %vm3271_vm3, %v3261_v33, 2102212464 }
 0x33a   :  { %v3277_v27 = vsel %vm3271_vm3, %v3264_v52, 920167782  ;;  %v3281_v39 = vsel %vm3271_vm3, %v3267_v43, 1326507024  ;;  %vm3269_vm9 = vcmp.lt.s32.totalorder %v3249_v29, 2  ;;  %v3280_v14 = vsel %vm3268_vm12, %v3258_v24, %v3261_v33 }
 0x33b   :  { %vm3760_vm15 = vcmp.lt.s32.totalorder %v3759_v47, 0  ;;  %v3278_v19 = vsel %vm3270_vm5, %v3261_v33, %v3277_v27  ;;  %v3282_v60 = vsel %vm3270_vm5, %v3264_v52, %v3281_v39  ;;  %v3348_v59 = vor.u32 8388608, %v6492_v53 }
 0x33c   :  { %v6523_v34 = vsel %vm3760_vm15, 0, %v3759_v47  ;;  %v3279_v28 = vsel %vm3269_vm9, %v3276_v21, %v3278_v19  ;;  %v3272_v48 = vsel %vm3268_vm12, %v3252_v61, %v3255_v11  ;;  %v3274_v26 = vsel %vm3270_vm5, %v3258_v24, %v3273_v32 }
 0x33d   :  { %vm7882_vm14 = vcmp.gt.s32.totalorder %v3350_v7, 0  ;;  %v3448_v63 = vshrl.u32 %v3447_v18, 23  ;;  %v3112_v54 = vxor.u32 2147483648, %v3111_v35  ;;  %v3283_v43 = vsel %vm3269_vm9, %v3280_v14, %v3282_v60 }
 0x33e   :  { %v3352_v37 = vsel %vm7882_vm14, %v3350_v7, 0  ;;  %v6533_v33 = vmul.u32.u64.low %v6488_v38, %v3279_v28  ;;  %v6534_v47 = vmul.u32.u64.high %v6488_v38, %v3279_v28, %v6533_v33  ;;  %4006 = vsinq.f32 %v6456_v8 }
 0x33f   :  { %v3208_v52 = vsub.s32 4294967266, %v6523_v34  ;;  %v6540_v53 = vmul.u32.u64.low %v6488_v38, %v3283_v43  ;;  %v6541_v11 = vmul.u32.u64.high %v6488_v38, %v3283_v43, %v6540_v53  ;;  %4008 = vcosq.f32 %v6484_v25 }
 0x340   :  { %v7883_v7 = vand.u32 2147483647, %v6188_v4  ;;  %v7884_v24 = vmov 0  ;;  %v3275_v18 = vsel %vm3269_vm9, %v3272_v48, %v3274_v26  ;;  %v3354_v61 = vand.u32 31, %v3352_v37 }
 0x341   :  { %v3188_v8 = vadd.s32 %v6409_v1, %v6428_v57  ;;  %v6553_v21 = vshll.u32 %v3348_v59, 8  ;;  %v3769_v32 = vadd.s32 4294967169, %v3448_v63  ;;  %v7887_v27 = vand.u32 2147483647, %v6460_v42 }
 0x342   :  { %vm6546_vm3 = vcmp.le.f32.partialorder %v7883_v7, 0.7853982  ;;  %vm7888_vm14 = vcmp.lt.s32.totalorder %v6188_v4, 0  ;;  %v3204_v14 = vsub.s32 32, %v6523_v34  ;;  %v3294_v28 = vadd.s32 1, %v6534_v47 }
 0x343   :  { %v7885_v24 = vsel %vm6546_vm3, 4294967295, %v7884_v24  ;;  %v6557_v39 = vand.u32 8388607, %v7887_v27  ;;  %v3113_v19 = vsel %vm7888_vm14, %v3112_v54, %v3111_v35  ;;  %v3355_v29 = vsub.s32 32, %v3354_v61 }
 0x344   :  { %7886 = vst [vmem:[#allocation125_spill] sm:$0xff] %v7885_v24  ;;  %v3209_v60 = vadd.s32 127, %v3208_v52  ;;  %v3291_v48 = vmul.u32 %v6488_v38, %v3275_v18  ;;  %vm3293_vm9 = vc.u32 %v6541_v11, %v6533_v33  ;;  %v3357_v1 = vshll.u32 %v7671_v40, %v3354_v61 }
 0x345   :  { %v3295_v57 = vsel %vm3293_vm9, %v3294_v28, %v6534_v47  ;;  %v3358_v59 = vshrl.u32 %v7668_v12, %v3355_v29  ;;  %v3360_v26 = vshll.u32 %v7668_v12, %v3354_v61  ;;  %v3361_v35 = vshrl.u32 %v7669_v10, %v3355_v29 }
 0x346   :  { %v3296_v63 = vadd.s32 %v3295_v57, %v3291_v48  ;;  %v3353_v54 = vshrl.u32 %v3352_v37, 5  ;;  %v3363_v43 = vshll.u32 %v7669_v10, %v3354_v61  ;;  %v3364_v52 = vshrl.u32 %v7670_v31, %v3355_v29 }
 0x347   :  { %v3359_v38 = vor.u32 %v3358_v59, %v3357_v1  ;;  %v3362_v53 = vor.u32 %v3361_v35, %v3360_v26  ;;  %v3366_v7 = vshll.u32 %v7670_v31, %v3354_v61  ;;  %v3367_v18 = vshrl.u32 %v7672_v49, %v3355_v29 }
 0x348   :  { %v6578_v47 = vsel %vm6546_vm3, %v6188_v4, %v3113_v19  ;;  %v3297_v27 = vadd.s32 536870912, %v3296_v63  ;;  %v3365_v28 = vor.u32 %v3364_v52, %v3363_v43  ;;  %v3454_v56 = vadd.s32 1, %v3769_v32  ;;  %v6582_v1 = vpop.eup %4006 }
 0x349   :  { %v3206_v48 = vshrl.u32 %v3188_v8, %v3204_v14  ;;  %v3368_v37 = vor.u32 %v3367_v18, %v3366_v7  ;;  %v3369_v57 = vshll.u32 %v7672_v49, %v3354_v61  ;;  %v3370_v23 = vshrl.u32 %v7674_v9, %v3355_v29  ;;  %7889 = vst [vmem:[#allocation126_spill] sm:$0xff] %v6582_v1  ;;  %v6586_v35 = vpop.eup %4008 }
 0x34a   :  { %v3210_v59 = vshll.u32 %v3209_v60, 23  ;;  %v6584_v26 = vshrl.u32 %v3297_v27, 30  ;;  %vm3372_vm5 = vcmp.lt.s32.totalorder %v3353_v54, 1  ;;  %vm3375_vm15 = vcmp.lt.s32.totalorder %v3353_v54, 4  ;;  %7891 = vst [vmem:[#allocation128_spill] sm:$0xff] %v6586_v35 }
 0x34b   :  { %v3356_v19 = vshrl.u32 %v7671_v40, %v3355_v29  ;;  %v3371_v24 = vor.u32 %v3370_v23, %v3369_v57  ;;  %v3377_v32 = vsel %vm3375_vm15, %v3365_v28, 2102212464  ;;  %v3380_v8 = vsel %vm3372_vm5, %v3359_v38, %v3362_v53 }
 0x34c   :  { %7890 = vst [vmem:[#allocation127_spill] sm:$0xff] %v6584_v26  ;;  %v3299_v14 = vshll.u32 %v6584_v26, 30  ;;  %vm3374_vm12 = vcmp.lt.s32.totalorder %v3353_v54, 3  ;;  %v3381_v61 = vsel %vm3375_vm15, %v3368_v37, 920167782  ;;  %vm3455_vm14 = vcmp.gt.s32.totalorder %v3454_v56, 0 }
 0x34d   :  { %vm3373_vm9 = vcmp.lt.s32.totalorder %v3353_v54, 2  ;;  %v3376_v60 = vsel %vm3372_vm5, %v3356_v19, %v3359_v38  ;;  %v3382_v43 = vsel %vm3374_vm12, %v3365_v28, %v3381_v61  ;;  %v3384_v52 = vsel %vm3372_vm5, %v3362_v53, %v3365_v28 }
 0x34e   :  { %v6592_v7 = vsub.s32 %v3296_v63, %v3299_v14  ;;  %v3378_v18 = vsel %vm3374_vm12, %v3362_v53, %v3377_v32  ;;  %v3383_v27 = vsel %vm3373_vm9, %v3380_v8, %v3382_v43  ;;  %v3385_v29 = vsel %vm3375_vm15, %v3371_v24, 1326507024  ;;  %v7892_v8 = vld [vmem:[#allocation7_spill] sm:$0xff] }
 0x34f   :  { %v6595_v23 = vor.u32 4788187, %v3210_v59  ;;  %v3386_v57 = vsel %vm3374_vm12, %v3368_v37, %v3385_v29  ;;  %v6598_v35 = vmul.u32.u64.low %v6553_v21, %v3383_v27  ;;  %v6599_v26 = vmul.u32.u64.high %v6553_v21, %v3383_v27, %v6598_v35 }
 0x350   :  { %v3205_v4 = vshll.u32 %v6494_v15, %v6523_v34  ;;  %v3302_v38 = vsub.s32 0, %v6592_v7  ;;  %v3387_v28 = vsel %vm3373_vm9, %v3384_v52, %v3386_v57  ;;  %v3456_v63 = vsel %vm3455_vm14, %v3454_v56, 0 }
 0x351   :  { %v3379_v19 = vsel %vm3373_vm9, %v3376_v60, %v3378_v18  ;;  %v6606_v53 = vmul.u32.u64.low %v6553_v21, %v3387_v28  ;;  %v6607_v54 = vmul.u32.u64.high %v6553_v21, %v3387_v28, %v6606_v53  ;;  %v3458_v24 = vand.u32 31, %v3456_v63 }
 0x352   :  { %v6609_v59 = vor.u32 %v3206_v48, %v3205_v4  ;;  %v3762_v37 = vmin.u32 %v3302_v38, %v6592_v7  ;;  %v3452_v32 = vor.u32 8388608, %v6557_v39  ;;  %v3292_v34 = vadd.s32 %v6533_v33, %v6541_v11 }
 0x353   :  { %v3398_v56 = vadd.s32 1, %v6599_v26  ;;  %v3459_v61 = vsub.s32 32, %v3458_v24  ;;  %v3395_v43 = vmul.u32 %v6553_v21, %v3379_v19  ;;  %v3457_v52 = vshrl.u32 %v3456_v63, 5 }
 0x354   :  { %v3304_v60 = vclz %v3762_v37  ;;  %v3461_v4 = vshll.u32 %v7671_v40, %v3458_v24  ;;  %vm3397_vm5 = vc.u32 %v6607_v54, %v6598_v35  ;;  %v3464_v48 = vshll.u32 %v7668_v12, %v3458_v24 }
 0x355   :  { %v3462_v39 = vshrl.u32 %v7668_v12, %v3459_v61  ;;  %v3467_v18 = vshll.u32 %v7669_v10, %v3458_v24  ;;  %v3399_v33 = vsel %vm3397_vm5, %v3398_v56, %v6599_v26  ;;  %v3465_v11 = vshrl.u32 %v7669_v10, %v3459_v61 }
 0x356   :  { %v3763_v27 = vadd.s32 4294967294, %v3304_v60  ;;  %v3468_v29 = vshrl.u32 %v7670_v31, %v3459_v61  ;;  %v3400_v21 = vadd.s32 %v3399_v33, %v3395_v43  ;;  %v3470_v57 = vshll.u32 %v7670_v31, %v3458_v24 }
 0x357   :  { %v3471_v38 = vshrl.u32 %v7672_v49, %v3459_v61  ;;  %v3474_v28 = vshrl.u32 %v7674_v9, %v3459_v61  ;;  %v3463_v63 = vor.u32 %v3462_v39, %v3461_v4  ;;  %v3466_v19 = vor.u32 %v3465_v11, %v3464_v48 }
 0x358   :  { %vm3764_vm15 = vcmp.lt.s32.totalorder %v3763_v27, 0  ;;  %v3469_v53 = vor.u32 %v3468_v29, %v3467_v18  ;;  %v3401_v14 = vadd.s32 536870912, %v3400_v21  ;;  %v3473_v26 = vshll.u32 %v7672_v49, %v3458_v24 }
 0x359   :  { %v3307_v37 = vsel %vm3764_vm15, 0, %v3763_v27  ;;  %v3472_v60 = vor.u32 %v3471_v38, %v3470_v57  ;;  %v3460_v15 = vshrl.u32 %v7671_v40, %v3459_v61  ;;  %vm3476_vm12 = vcmp.lt.s32.totalorder %v3457_v52, 1 }
 0x35a   :  { %v3312_v56 = vsub.s32 4294967266, %v3307_v37  ;;  %v3492_v43 = vshll.u32 %v3452_v32, 8  ;;  %v3308_v33 = vsub.s32 32, %v3307_v37  ;;  %v6633_v1 = vshrl.u32 %v3401_v14, 30 }
 0x35b   :  { %v3475_v3 = vor.u32 %v3474_v28, %v3473_v26  ;;  %vm3479_vm14 = vcmp.lt.s32.totalorder %v3457_v52, 4  ;;  %vm3478_vm9 = vcmp.lt.s32.totalorder %v3457_v52, 3  ;;  %v3484_v39 = vsel %vm3476_vm12, %v3463_v63, %v3466_v19 }
 0x35c   :  { %7893 = vst [vmem:[#allocation7_spill] sm:$0xff] %v6633_v1  ;;  %v3313_v9 = vadd.s32 127, %v3312_v56  ;;  %v3481_v4 = vsel %vm3479_vm14, %v3469_v53, 2102212464  ;;  %v3403_v48 = vshll.u32 %v6633_v1, 30  ;;  %v3480_v49 = vsel %vm3476_vm12, %v3460_v15, %v3463_v63 }
 0x35d   :  { %v3482_v24 = vsel %vm3478_vm9, %v3466_v19, %v3481_v4  ;;  %v3485_v61 = vsel %vm3479_vm14, %v3472_v60, 920167782  ;;  %vm3477_vm5 = vcmp.lt.s32.totalorder %v3457_v52, 2  ;;  %v3488_v18 = vsel %vm3476_vm12, %v3466_v19, %v3469_v53 }
 0x35e   :  { %v3314_v32 = vshll.u32 %v3313_v9, 23  ;;  %v3486_v14 = vsel %vm3478_vm9, %v3469_v53, %v3485_v61  ;;  %v3310_v27 = vshrl.u32 %v3292_v34, %v3308_v33  ;;  %v6643_v11 = vsub.s32 %v3400_v21, %v3403_v48  ;;  %v7896_v33 = vld [vmem:[#allocation13_spill] sm:$0xff] }
 0x35f   :  { %v3487_v29 = vsel %vm3477_vm5, %v3484_v39, %v3486_v14  ;;  %v3489_v57 = vsel %vm3479_vm14, %v3475_v3, 1326507024  ;;  %v3214_v38 = vcvt.s32.f32 %v6609_v59  ;;  %v3309_v15 = vshll.u32 %v6592_v7, %v3307_v37 }
 0x360   :  { %v3483_v28 = vsel %vm3477_vm5, %v3480_v49, %v3482_v24  ;;  %v3490_v63 = vsel %vm3478_vm9, %v3472_v60, %v3489_v57  ;;  %v3406_v26 = vsub.s32 0, %v6643_v11  ;;  %4010 = vsinq.f32 %v6484_v25  ;;  %v7897_v24 = vld [vmem:[#allocation12_spill] sm:$0xff] }
 0x361   :  { %v3491_v56 = vsel %vm3477_vm5, %v3488_v18, %v3490_v63  ;;  %v6650_v9 = vmul.u32.u64.low %v3492_v43, %v3487_v29  ;;  %v6651_v4 = vmul.u32.u64.high %v3492_v43, %v3487_v29, %v6650_v9  ;;  %v3315_v34 = vor.u32 4788187, %v3314_v32 }
 0x362   :  { %v6655_v21 = vmul.u32.u64.low %v3492_v43, %v3491_v56  ;;  %v6656_v19 = vmul.u32.u64.high %v3492_v43, %v3491_v56, %v6655_v21  ;;  %4012 = vcosq.f32 %v6578_v47  ;;  %v7894_v3 = vand.u32 2147483647, %v6595_v23 }
 0x363   :  { %v3311_v59 = vor.u32 %v3310_v27, %v3309_v15  ;;  %v3766_v52 = vmin.u32 %v3406_v26, %v6643_v11  ;;  %v3499_v53 = vmul.u32 %v3492_v43, %v3483_v28  ;;  %v7895_v37 = vand.u32 2147483647, %v7892_v8 }
 0x364   :  { %v3215_v7 = vmul.f32 %v3214_v38, %v7894_v3  ;;  %v342_v39 = vshrl.u32 %v7668_v12, %v7896_v33  ;;  %v345_v25 = vshrl.u32 %v7669_v10, %v7896_v33  ;;  %v3502_v49 = vadd.s32 1, %v6651_v4 }
 0x365   :  { %v331_v60 = vand.u32 8388607, %v7895_v37  ;;  %v3408_v48 = vclz %v3766_v52  ;;  %v347_v23 = vshll.u32 %v7669_v10, %v7897_v24  ;;  %v348_v61 = vshrl.u32 %v7670_v31, %v7896_v33 }
 0x366   :  { %v3316_v43 = vand.u32 2147483647, %v3315_v34  ;;  %vm3501_vm12 = vc.u32 %v6656_v19, %v6650_v9  ;;  %v341_v32 = vshll.u32 %v7671_v40, %v7897_v24  ;;  %v344_v14 = vshll.u32 %v7668_v12, %v7897_v24 }
 0x367   :  { %v3216_v18 = vxor.u32 2147483648, %v3215_v7  ;;  %v3767_v27 = vadd.s32 4294967294, %v3408_v48  ;;  %v3503_v29 = vsel %vm3501_vm12, %v3502_v49, %v6651_v4  ;;  %v349_v57 = vor.u32 %v348_v61, %v347_v23 }
 0x368   :  { %v3318_v38 = vcvt.s32.f32 %v3311_v59  ;;  %v3504_v15 = vadd.s32 %v3503_v29, %v3499_v53  ;;  %v343_v28 = vor.u32 %v342_v39, %v341_v32  ;;  %v346_v63 = vor.u32 %v345_v25, %v344_v14  ;;  %v7902_v53 = vld [vmem:[#allocation15_spill] sm:$0xff]  ;;  %v7904_v25 = vld [vmem:[#allocation20_spill] sm:$0xff] }
 0x369   :  { %v3396_v26 = vadd.s32 %v6598_v35, %v6607_v54  ;;  %vm3768_vm14 = vcmp.lt.s32.totalorder %v3767_v27, 0  ;;  %v332_v56 = vor.u32 8388608, %v331_v60  ;;  %v340_v34 = vshrl.u32 %v7671_v40, %v7896_v33  ;;  %v7906_v29 = vld [vmem:[#allocation16_spill] sm:$0xff] }
 0x36a   :  { %v7898_v21 = vand.u32 2147483647, %v6201_v20  ;;  %v7899_v3 = vmov 0  ;;  %v3319_v4 = vmul.f32 %v3318_v38, %v3316_v43  ;;  %v3411_v52 = vsel %vm3768_vm14, 0, %v3767_v27  ;;  %v6696_v35 = vpop.eup %4010  ;;  %v7905_v27 = vld [vmem:[#allocation22_spill] sm:$0xff] }
 0x36b   :  { %v3505_v59 = vadd.s32 536870912, %v3504_v15  ;;  %vm7903_vm5 = vcmp.lt.s32.totalorder %v7902_v53, 4  ;;  %v3416_v39 = vsub.s32 4294967266, %v3411_v52  ;;  %vm356_vm12 = vcmp.lt.s32.totalorder %v7902_v53, 1 }
 0x36c   :  { %vm6687_vm9 = vcmp.le.f32.partialorder %v7898_v21, 0.7853982  ;;  %v361_v37 = vsel %vm7903_vm5, %v349_v57, 2102212464  ;;  %vm357_vm15 = vcmp.lt.s32.totalorder %v7902_v53, 2  ;;  %vm358_vm3 = vcmp.lt.s32.totalorder %v7902_v53, 3  ;;  %v6701_v49 = vpop.eup %4012 }
 0x36d   :  { %v7900_v3 = vsel %vm6687_vm9, 4294967295, %v7899_v3  ;;  %v3412_v54 = vsub.s32 32, %v3411_v52  ;;  %v6698_v60 = vshrl.u32 %v3505_v59, 30  ;;  %v364_v33 = vsel %vm356_vm12, %v343_v28, %v346_v63 }
 0x36e   :  { %7901 = vst [vmem:[#allocation13_spill] sm:$0xff] %v7900_v3  ;;  %v366_v48 = vsel %vm358_vm3, %v349_v57, %v7904_v25  ;;  %v3417_v24 = vadd.s32 127, %v3416_v39  ;;  %v360_v23 = vsel %vm356_vm12, %v340_v34, %v343_v28  ;;  %v362_v61 = vsel %vm358_vm3, %v346_v63, %v361_v37  ;;  %v7908_v39 = vld [vmem:[#allocation8_spill] sm:$0xff] }
 0x36f   :  { %v368_v43 = vsel %vm356_vm12, %v346_v63, %v349_v57  ;;  %v3507_v32 = vshll.u32 %v6698_v60, 30  ;;  %v367_v14 = vsel %vm357_vm15, %v364_v33, %v366_v48  ;;  %v370_v38 = vsel %vm358_vm3, %v7906_v29, %v7905_v27 }
 0x370   :  { %v372_v21 = vshll.u32 %v332_v56, 8  ;;  %vm7907_vm14 = vcmp.lt.s32.totalorder %v6201_v20, 0  ;;  %v3320_v1 = vxor.u32 2147483648, %v3319_v4  ;;  %v371_v25 = vsel %vm357_vm15, %v368_v43, %v370_v38 }
 0x371   :  { %v3217_v59 = vsel %vm7907_vm14, %v3216_v18, %v3215_v7  ;;  %v532_v28 = vand.u32 2147483647, %v7908_v39  ;;  %v7909_v57 = vand.u32 2147483647, %v6299_v30  ;;  %v7910_v63 = vmov 0 }
 0x372   :  { %v3414_v34 = vshrl.u32 %v3396_v26, %v3412_v54  ;;  %v6719_v37 = vsub.s32 %v3504_v15, %v3507_v32  ;;  %v6721_v33 = vmul.u32.u64.low %v372_v21, %v371_v25  ;;  %v6722_v56 = vmul.u32.u64.high %v372_v21, %v371_v25, %v6721_v33 }
 0x373   :  { %vm6715_vm5 = vcmp.le.f32.partialorder %v7909_v57, 0.7853982  ;;  %v3418_v48 = vshll.u32 %v3417_v24, 23  ;;  %v363_v7 = vsel %vm357_vm15, %v360_v23, %v362_v61  ;;  %4014 = vsinq.f32 %v6578_v47  ;;  %v7912_v24 = vld [vmem:[#allocation21_spill] sm:$0xff] }
 0x374   :  { %v7911_v63 = vsel %vm6715_vm5, 4294967295, %v7910_v63  ;;  %v6726_v18 = vmul.u32.u64.low %v372_v21, %v367_v14  ;;  %v6727_v43 = vmul.u32.u64.high %v372_v21, %v367_v14, %v6726_v18  ;;  %vm7627_vm3 = vcmp.lt.s32.totalorder %v6299_v30, 0  ;;  %v7913_v14 = vld [vmem:[#allocation17_spill] sm:$0xff] }
 0x375   :  { %v3413_v27 = vshll.u32 %v6643_v11, %v3411_v52  ;;  %v3510_v15 = vsub.s32 0, %v6719_v37  ;;  %v6737_v26 = vsel %vm6687_vm9, %v6201_v20, %v3217_v59  ;;  %v3321_v53 = vsel %vm7627_vm3, %v3320_v1, %v3319_v4 }
 0x376   :  { %v539_v54 = vand.u32 8388607, %v532_v28  ;;  %v550_v47 = vshrl.u32 %v7668_v12, %v7912_v24  ;;  %v379_v11 = vmul.u32 %v372_v21, %v363_v7  ;;  %vm381_vm15 = vc.u32 %v6722_v56, %v6726_v18 }
 0x377   :  { %v3415_v23 = vor.u32 %v3414_v34, %v3413_v27  ;;  %v3770_v61 = vmin.u32 %v3510_v15, %v6719_v37  ;;  %v3419_v52 = vor.u32 4788187, %v3418_v48  ;;  %v382_v32 = vadd.s32 1, %v6727_v43  ;;  %v7914_v27 = vld [vmem:[#allocation6_spill] sm:$0xff] }
 0x378   :  { %v549_v29 = vshll.u32 %v7671_v40, %v7913_v14  ;;  %v552_v1 = vshll.u32 %v7668_v12, %v7913_v14  ;;  %v553_v38 = vshrl.u32 %v7669_v10, %v7912_v24  ;;  %v555_v59 = vshll.u32 %v7669_v10, %v7913_v14 }
 0x379   :  { %v3512_v4 = vclz %v3770_v61  ;;  %v556_v21 = vshrl.u32 %v7670_v31, %v7912_v24  ;;  %4016 = vcosq.f32 %v6737_v26  ;;  %v383_v25 = vsel %vm381_vm15, %v382_v32, %v6727_v43  ;;  %v7917_v32 = vld [vmem:[#allocation26_spill] sm:$0xff] }
 0x37a   :  { %v540_v57 = vor.u32 8388608, %v539_v54  ;;  %v551_v34 = vor.u32 %v550_v47, %v549_v29  ;;  %v384_v48 = vadd.s32 %v383_v25, %v379_v11  ;;  %v554_v7 = vor.u32 %v553_v38, %v552_v1  ;;  %v7915_v54 = vld [vmem:[#allocation23_spill] sm:$0xff]  ;;  %v7919_v25 = vld [vmem:[#allocation25_spill] sm:$0xff] }
 0x37b   :  { %v3771_v33 = vadd.s32 4294967294, %v3512_v4  ;;  %v557_v12 = vor.u32 %v556_v21, %v555_v59  ;;  %v3324_v15 = vsel %vm6715_vm5, %v6299_v30, %v3321_v53  ;;  %v3420_v10 = vand.u32 2147483647, %v3419_v52  ;;  %v7918_v21 = vld [vmem:[#allocation30_spill] sm:$0xff] }
 0x37c   :  { %v3422_v61 = vcvt.s32.f32 %v3415_v23  ;;  %v3500_v31 = vadd.s32 %v6650_v9, %v6656_v19  ;;  %v385_v14 = vadd.s32 536870912, %v384_v48  ;;  %v548_v43 = vshrl.u32 %v7671_v40, %v7912_v24 }
 0x37d   :  { %vm3772_vm14 = vcmp.lt.s32.totalorder %v3771_v33, 0  ;;  %vm564_vm15 = vcmp.lt.s32.totalorder %v7915_v54, 1  ;;  %vm565_vm3 = vcmp.lt.s32.totalorder %v7915_v54, 2  ;;  %vm566_vm12 = vcmp.lt.s32.totalorder %v7915_v54, 3  ;;  %v6774_v11 = vpop.eup %4014 }
 0x37e   :  { %v3515_v47 = vsel %vm3772_vm14, 0, %v3771_v33  ;;  %v572_v53 = vsel %vm564_vm15, %v551_v34, %v554_v7  ;;  %vm7916_vm9 = vcmp.lt.s32.totalorder %v7915_v54, 4  ;;  %v580_v19 = vshll.u32 %v540_v57, 8 }
 0x37f   :  { %v3516_v23 = vsub.s32 32, %v3515_v47  ;;  %v3520_v52 = vsub.s32 4294967266, %v3515_v47  ;;  %v569_v9 = vsel %vm7916_vm9, %v557_v12, 2102212464  ;;  %v3517_v40 = vshll.u32 %v6719_v37, %v3515_v47 }
 0x380   :  { %v386_v24 = vshrl.u32 %v385_v14, 30  ;;  %v574_v29 = vsel %vm566_vm12, %v557_v12, %v7917_v32  ;;  %v576_v1 = vsel %vm564_vm15, %v554_v7, %v557_v12  ;;  %v578_v57 = vsel %vm566_vm12, %v7919_v25, %v7918_v21 }
 0x381   :  { %v3518_v4 = vshrl.u32 %v3500_v31, %v3516_v23  ;;  %v3521_v38 = vadd.s32 127, %v3520_v52  ;;  %v575_v59 = vsel %vm565_vm3, %v572_v53, %v574_v29  ;;  %v3423_v33 = vmul.f32 %v3422_v61, %v3420_v10 }
 0x382   :  { %v387_v37 = vshll.u32 %v386_v24, 30  ;;  %v568_v14 = vsel %vm564_vm15, %v548_v43, %v551_v34  ;;  %v579_v47 = vsel %vm565_vm3, %v576_v1, %v578_v57  ;;  %v570_v29 = vsel %vm566_vm12, %v554_v7, %v569_v9  ;;  %v7927_v1 = vld [vmem:[#allocation5_spill] sm:$0xff]  ;;  %v7932_v57 = vld [vmem:[#allocation34_spill] sm:$0xff] }
 0x383   :  { %v3519_v32 = vor.u32 %v3518_v4, %v3517_v40  ;;  %v3522_v12 = vshll.u32 %v3521_v38, 23  ;;  %v6794_v31 = vmul.u32.u64.low %v580_v19, %v579_v47  ;;  %v6795_v23 = vmul.u32.u64.high %v580_v19, %v579_v47, %v6794_v31  ;;  %v6797_v52 = vpop.eup %4016 }
 0x384   :  { %7920 = vst [vmem:[#allocation12_spill] sm:$0xff] %v6797_v52  ;;  %v6799_v53 = vsub.s32 %v384_v48, %v387_v37  ;;  %v6803_v10 = vmul.u32.u64.low %v580_v19, %v575_v59  ;;  %v6804_v61 = vmul.u32.u64.high %v580_v19, %v575_v59, %v6803_v10  ;;  %v7921_v34 = vxor.u32 2147483648, %v5676_v13 }
 0x385   :  { %vm7922_vm9 = vcmp.lt.s32.totalorder %v7914_v27, 0  ;;  %4018 = vsinq.f32 %v6737_v26  ;;  %v3523_v40 = vor.u32 4788187, %v3522_v12  ;;  %v7923_v48 = vand.u32 2147483647, %v6423_v51 }
 0x386   :  { %v513_v43 = vsel %vm7922_vm9, %v7921_v34, %v5676_v13  ;;  %4020 = vcosq.f32 %v3324_v15  ;;  %v7924_v7 = vmov 0  ;;  %v390_v9 = vsub.s32 0, %v6799_v53  ;;  %v7931_v13 = vld [vmem:[#allocation10_spill] sm:$0xff] }
 0x387   :  { %vm6816_vm15 = vcmp.le.f32.partialorder %v7923_v48, 0.7853982  ;;  %v7928_v4 = vand.u32 2147483647, %v7927_v1  ;;  %v306_v26 = vsub.s32 4, %v7931_v13  ;;  %v3526_v21 = vcvt.s32.f32 %v3519_v32 }
 0x388   :  { %v7925_v7 = vsel %vm6816_vm15, 4294967295, %v7924_v7  ;;  %v3524_v59 = vand.u32 2147483647, %v3523_v40  ;;  %v571_v25 = vsel %vm565_vm3, %v568_v14, %v570_v29  ;;  %v3424_v47 = vxor.u32 2147483648, %v3423_v33 }
 0x389   :  { %7926 = vst [vmem:[#allocation15_spill] sm:$0xff] %v7925_v7  ;;  %vm6823_vm12 = vcmp.le.f32.partialorder %v7928_v4, 0.7853982  ;;  %v3650_v12 = vmin.u32 %v390_v9, %v6799_v53  ;;  %vm589_vm9 = vc.u32 %v6795_v23, %v6803_v10  ;;  %v590_v31 = vadd.s32 1, %v6804_v61 }
 0x38a   :  { %v308_v37 = vsel %vm6823_vm12, %v7927_v1, %v7932_v57  ;;  %4022 = vsinq.f32 %v3324_v15  ;;  %v3527_v32 = vmul.f32 %v3526_v21, %v3524_v59  ;;  %v410_v34 = vsub.s32 4, %v386_v24  ;;  %v7942_v59 = vld [vmem:[#allocation18_spill] sm:$0xff] }
 0x38b   :  { %v392_v54 = vclz %v3650_v12  ;;  %v587_v14 = vmul.u32 %v580_v19, %v571_v25  ;;  %vm7933_vm3 = vcmp.lt.s32.totalorder %v7927_v1, 0  ;;  %4024 = vcosq.f32 %v308_v37 }
 0x38c   :  { %v307_v29 = vsel %vm7933_vm3, %v306_v26, %v7931_v13  ;;  %v7934_v40 = vand.u32 2147483647, %v7892_v8  ;;  %vm7632_vm7 = vcmp.lt.s32.totalorder %v7892_v8, 0  ;;  %v591_v15 = vsel %vm589_vm9, %v590_v31, %v6804_v61 }
 0x38d   :  { %4026 = vsinq.f32 %v308_v37  ;;  %vm7937_vm14 = vcmp.lt.s32.totalorder %v6423_v51, 0  ;;  %v7938_v19 = vand.u32 2147483647, %v6460_v42  ;;  %v7939_v4 = vmov 0 }
 0x38e   :  { %vm6844_vm5 = vcmp.le.f32.partialorder %v7934_v40, 0.7853982  ;;  %v3425_v9 = vsel %vm7937_vm14, %v3424_v47, %v3423_v33  ;;  %v3651_v13 = vadd.s32 4294967294, %v392_v54  ;;  %v592_v26 = vadd.s32 %v591_v15, %v587_v14 }
 0x38f   :  { %vm6854_vm6 = vcmp.le.f32.partialorder %v7938_v19, 0.7853982  ;;  %v514_v21 = vsub.s32 4, %v7942_v59  ;;  %v3528_v25 = vxor.u32 2147483648, %v3527_v32  ;;  %v411_v57 = vsel %vm7632_vm7, %v410_v34, %v386_v24  ;;  %v6873_v31 = vpop.eup %4018 }
 0x390   :  { %v7940_v4 = vsel %vm6854_vm6, 4294967295, %v7939_v4  ;;  %v309_v61 = vsel %vm6823_vm12, 0, %v307_v29  ;;  %v7943_v37 = vand.u32 2147483647, %v7914_v27  ;;  %vm3652_vm9 = vcmp.lt.s32.totalorder %v3651_v13, 0  ;;  %7946 = vst [vmem:[#allocation22_spill] sm:$0xff] %v6873_v31  ;;  %v6883_v14 = vpop.eup %4020 }
 0x391   :  { %7941 = vst [vmem:[#allocation20_spill] sm:$0xff] %v7940_v4  ;;  %vm7637_vm3 = vcmp.lt.s32.totalorder %v7908_v39, 0  ;;  %v593_v47 = vadd.s32 536870912, %v592_v26  ;;  %v3428_v24 = vsel %vm6816_vm15, %v6423_v51, %v3425_v9  ;;  %v380_v38 = vadd.s32 %v6726_v18, %v6722_v56  ;;  %v7951_v51 = vld [vmem:[#allocation24_spill] sm:$0xff] }
 0x392   :  { %vm6865_vm14 = vcmp.le.f32.partialorder %v7943_v37, 0.7853982  ;;  %v395_v34 = vsel %vm3652_vm9, 0, %v3651_v13  ;;  %vm7947_vm12 = vcmp.lt.s32.totalorder %v7914_v27, 0  ;;  %vm6889_vm7 = vcmp.le.f32.partialorder %v532_v28, 0.7853982 }
 0x393   :  { %v516_v12 = vsel %vm6865_vm14, %v7914_v27, %v513_v43  ;;  %v515_v54 = vsel %vm7947_vm12, %v514_v21, %v7942_v59  ;;  %v396_v29 = vsub.s32 32, %v395_v34  ;;  %v400_v40 = vsub.s32 4294967266, %v395_v34 }
 0x394   :  { %v413_v43 = vsel %vm6844_vm5, 0, %v411_v57  ;;  %v313_v9 = vadd.s32 3, %v309_v61  ;;  %vm7950_vm9 = vcmp.lt.s32.totalorder %v6460_v42, 0  ;;  %v397_v18 = vshll.u32 %v6799_v53, %v395_v34  ;;  %v6898_v57 = vpop.eup %4022 }
 0x395   :  { %v3529_v56 = vsel %vm7950_vm9, %v3528_v25, %v3527_v32  ;;  %v594_v19 = vshrl.u32 %v593_v47, 30  ;;  %4028 = vcosq.f32 %v516_v12  ;;  %v398_v13 = vshrl.u32 %v380_v38, %v396_v29  ;;  %v4025_v52 = vpop.eup %4024 }
 0x396   :  { %v401_v59 = vadd.s32 127, %v400_v40  ;;  %v517_v21 = vsel %vm6865_vm14, 0, %v515_v54  ;;  %4030 = vsinq.f32 %v516_v12  ;;  %v417_v28 = vadd.s32 3, %v413_v43  ;;  %v7952_v40 = vld [vmem:[#allocation11_spill] sm:$0xff] }
 0x397   :  { %v595_v37 = vshll.u32 %v594_v19, 30  ;;  %v618_v7 = vsub.s32 4, %v594_v19  ;;  %v826_v61 = vsub.s32 4, %v7951_v51  ;;  %4032 = vcosq.f32 %v3428_v24  ;;  %v4027_v47 = vpop.eup %4026 }
 0x398   :  { %v399_v32 = vor.u32 %v398_v13, %v397_v18  ;;  %v402_v25 = vshll.u32 %v401_v59, 23  ;;  %v314_v53 = vand.u32 3, %v313_v9  ;;  %4034 = vsinq.f32 %v3428_v24 }
 0x399   :  { %v3532_v33 = vsel %vm6854_vm6, %v6460_v42, %v3529_v56  ;;  %v6904_v38 = vsub.s32 %v592_v26, %v595_v37  ;;  %v521_v12 = vadd.s32 3, %v517_v21  ;;  %v588_v54 = vadd.s32 %v6803_v10, %v6795_v23 }
 0x39a   :  { %v403_v34 = vor.u32 4788187, %v402_v25  ;;  %v619_v29 = vsel %vm7637_vm3, %v618_v7, %v594_v19  ;;  %vm7953_vm14 = vcmp.lt.s32.totalorder %v7952_v40, 0  ;;  %v6913_v9 = vand.u32 3, %v417_v28 }
 0x39b   :  { %v827_v43 = vsel %vm7953_vm14, %v826_v61, %v7951_v51  ;;  %v598_v24 = vsub.s32 0, %v6904_v38  ;;  %v317_v18 = vxor.u32 2147483648, %v4027_v47  ;;  %v320_v56 = vxor.u32 2147483648, %v4025_v52 }
 0x39c   :  { %4036 = vcosq.f32 %v3532_v33  ;;  %v404_v26 = vand.u32 2147483647, %v403_v34  ;;  %v406_v13 = vcvt.s32.f32 %v399_v32  ;;  %v621_v23 = vsel %vm6889_vm7, 0, %v619_v29 }
 0x39d   :  { %v3658_v59 = vmin.u32 %v598_v24, %v6904_v38  ;;  %v522_v10 = vand.u32 3, %v521_v12  ;;  %v829_v51 = vsel %vm4748_vm0, 0, %v827_v43  ;;  %4038 = vsinq.f32 %v3532_v33 }
 0x39e   :  { %v407_v19 = vmul.f32 %v406_v13, %v404_v26  ;;  %vm316_vm14 = vcmp.eq.s32.totalorder %v314_v53, 0  ;;  %vm319_vm3 = vcmp.eq.s32.totalorder %v314_v53, 2  ;;  %vm520_vm12 = vweird.f32 %v7914_v27 }
 0x39f   :  { %v4029_v21 = vpop.eup %4028  ;;  %v600_v28 = vclz %v3658_v59  ;;  %v318_v37 = vsel %vm316_vm14, %v4025_v52, %v317_v18  ;;  %v321_v61 = vsel %vm319_vm3, %v320_v56, %v4027_v47  ;;  %v833_v32 = vadd.s32 3, %v829_v51  ;;  %v7958_v18 = vld [vmem:[#allocation32_spill] sm:$0xff] }
 0x3a0   :  { %v4031_v25 = vpop.eup %4030  ;;  %v408_v34 = vxor.u32 2147483648, %v407_v19  ;;  %v625_v29 = vadd.s32 3, %v621_v23  ;;  %v528_v24 = vxor.u32 2147483648, %v4029_v21  ;;  %v837_v12 = vxor.u32 2147483648, %v4981_v22  ;;  %v3565_v51 = vld [vmem:[%s7380_s4] sm:$0xff] }
 0x3a1   :  { %v3659_v31 = vadd.s32 4294967294, %v600_v28  ;;  %vm524_vm9 = vcmp.eq.s32.totalorder %v522_v10, 0  ;;  %v525_v43 = vxor.u32 2147483648, %v4031_v25  ;;  %vm527_vm0 = vcmp.eq.s32.totalorder %v522_v10, 2  ;;  %v6924_v33 = vpop.eup %4032  ;;  %3568 = vperm.xlu0 %3911, %v3565_v51  }
 0x3a2   :  { %7955 = vst [vmem:[#allocation16_spill] sm:$0xff] %v6924_v33  ;;  %vm7956_vm15 = vcmp.lt.s32.totalorder %v7892_v8, 0  ;;  %vm7957_vm14 = vcmp.lt.s32.totalorder %v314_v53, 2  ;;  %v529_v47 = vsel %vm527_vm0, %v528_v24, %v4031_v25  ;;  %v1034_v56 = vsub.s32 4, %v7958_v18  ;;  %v6930_v13 = vpop.eup %4034 }
 0x3a3   :  { %v409_v26 = vsel %vm7956_vm15, %v408_v34, %v407_v19  ;;  %v322_v52 = vsel %vm7957_vm14, %v318_v37, %v321_v61  ;;  %7959 = vst [vmem:[#allocation8_spill] sm:$0xff] %v6930_v13  ;;  %vm3660_vm3 = vcmp.lt.s32.totalorder %v3659_v31, 0  ;;  %v526_v23 = vsel %vm524_vm9, %v4029_v21, %v525_v43 }
 0x3a4   :  { %v412_v59 = vsel %vm6844_vm5, %v7892_v8, %v409_v26  ;;  %v6935_v7 = vand.u32 3, %v833_v32  ;;  %v603_v53 = vsel %vm3660_vm3, 0, %v3659_v31  ;;  %v6940_v19 = vand.u32 3, %v625_v29  ;;  %v7962_v32 = vld [vmem:[#allocation46_spill] sm:$0xff] }
 0x3a5   :  { %4040 = vcosq.f32 %v412_v59  ;;  %vm523_vm15 = vcmp.lt.s32.totalorder %v522_v10, 2  ;;  %v604_v28 = vsub.s32 32, %v603_v53  ;;  %v608_v37 = vsub.s32 4294967266, %v603_v53 }
 0x3a6   :  { %4042 = vsinq.f32 %v412_v59  ;;  %v530_v61 = vsel %vm523_vm15, %v526_v23, %v529_v47  ;;  %v6942_v48 = vpop.eup %4036  ;;  %vm7961_vm5 = vweird.f32 %v7927_v1  ;;  %v840_v25 = vxor.u32 2147483648, %v7962_v32  ;;  %v7967_v23 = vld [vmem:[#allocation56_spill] sm:$0xff] }
 0x3a7   :  { %7960 = vst [vmem:[#allocation21_spill] sm:$0xff] %v6942_v48  ;;  %v6946_v21 = vsel %vm7961_vm5, nan, %v322_v52  ;;  %vm7963_vm9 = vcmp.lt.s32.totalorder %v4479_v6, 0  ;;  %v1045_v34 = vxor.u32 2147483648, %v5104_v5  ;;  %v605_v10 = vshll.u32 %v6904_v38, %v603_v53  ;;  %v6955_v43 = vpop.eup %4038  ;;  %v7973_v52 = vld [vmem:[#allocation41_spill] sm:$0xff] }
 0x3a8   :  { %v1035_v31 = vsel %vm7963_vm9, %v1034_v56, %v7958_v18  ;;  %v606_v29 = vshrl.u32 %v588_v54, %v604_v28  ;;  %v609_v24 = vadd.s32 127, %v608_v37  ;;  %vm836_vm0 = vcmp.eq.s32.totalorder %v6935_v7, 0  ;;  %7964 = vst [vmem:[#allocation17_spill] sm:$0xff] %v6955_v43  ;;  %v7966_v18 = vld [vmem:[#allocation19_spill] sm:$0xff]  ;;  %v7970_v28 = vld [vmem:[#allocation28_spill] sm:$0xff] }
 0x3a9   :  { %vm423_vm14 = vcmp.eq.s32.totalorder %v6913_v9, 2  ;;  %v6960_v1 = vsel %vm520_vm12, nan, %v530_v61  ;;  %v838_v26 = vsel %vm836_vm0, %v7962_v32, %v837_v12  ;;  %v1037_v47 = vsel %vm5001_vm4, 0, %v1035_v31  ;;  %v7968_v12 = vld [vmem:[#allocation9_spill] sm:$0xff] }
 0x3aa   :  { %v722_v56 = vsub.s32 4, %v7966_v18  ;;  %vm420_vm3 = vcmp.eq.s32.totalorder %v6913_v9, 0  ;;  %v607_v38 = vor.u32 %v606_v29, %v605_v10  ;;  %v610_v54 = vshll.u32 %v609_v24, 23  ;;  %v7972_v29 = vld [vmem:[#allocation45_spill] sm:$0xff] }
 0x3ab   :  { %vm839_vm15 = vcmp.eq.s32.totalorder %v6935_v7, 2  ;;  %v1041_v59 = vadd.s32 3, %v1037_v47  ;;  %vm835_vm5 = vcmp.lt.s32.totalorder %v6935_v7, 2  ;;  %v1048_v51 = vxor.u32 2147483648, %v7967_v23 }
 0x3ac   :  { %v841_v27 = vsel %vm839_vm15, %v840_v25, %v4981_v22  ;;  %vm7969_vm12 = vcmp.lt.s32.totalorder %v7968_v12, 0  ;;  %v930_v37 = vsub.s32 4, %v7970_v28  ;;  %v611_v61 = vor.u32 4788187, %v610_v54 }
 0x3ad   :  { %v723_v53 = vsel %vm7969_vm12, %v722_v56, %v7966_v18  ;;  %v1042_v31 = vand.u32 3, %v1041_v59  ;;  %v733_v24 = vxor.u32 2147483648, %v7972_v29  ;;  %v736_v47 = vxor.u32 2147483648, %v7973_v52  ;;  %v7974_v18 = vld [vmem:[#allocation14_spill] sm:$0xff] }
 0x3ae   :  { %v725_v22 = vsel %vm4736_vm10, 0, %v723_v53  ;;  %vm7975_vm0 = vcmp.lt.s32.totalorder %v7974_v18, 0  ;;  %v612_v33 = vand.u32 2147483647, %v611_v61  ;;  %v614_v54 = vcvt.s32.f32 %v607_v38  ;;  %v7978_v61 = vld [vmem:[#allocation54_spill] sm:$0xff] }
 0x3af   :  { %v729_v25 = vadd.s32 3, %v725_v22  ;;  %v931_v56 = vsel %vm7975_vm0, %v930_v37, %v7970_v28  ;;  %vm1044_vm15 = vcmp.eq.s32.totalorder %v1042_v31, 0  ;;  %vm1047_vm12 = vcmp.eq.s32.totalorder %v1042_v31, 2  ;;  %v4041_v32 = vpop.eup %4040  ;;  %v7977_v28 = vld [vmem:[#allocation55_spill] sm:$0xff] }
 0x3b0   :  { %vm832_vm9 = vweird.f32 %v7952_v40  ;;  %v1046_v59 = vsel %vm1044_vm15, %v7967_v23, %v1045_v34  ;;  %v1049_v53 = vsel %vm1047_vm12, %v1048_v51, %v5104_v5  ;;  %v933_v13 = vsel %vm4914_vm8, 0, %v931_v56  ;;  %v4043_v3 = vpop.eup %4042 }
 0x3b1   :  { %v730_v10 = vand.u32 3, %v729_v25  ;;  %v424_v20 = vxor.u32 2147483648, %v4041_v32  ;;  %v615_v48 = vmul.f32 %v614_v54, %v612_v33  ;;  %v937_v43 = vadd.s32 3, %v933_v13  ;;  %v7979_v25 = vld [vmem:[#allocation40_spill] sm:$0xff] }
 0x3b2   :  { %v941_v37 = vxor.u32 2147483648, %v7977_v28  ;;  %vm416_vm10 = vweird.f32 %v7892_v8  ;;  %v421_v38 = vxor.u32 2147483648, %v4043_v3  ;;  %vm1043_vm0 = vcmp.lt.s32.totalorder %v1042_v31, 2 }
 0x3b3   :  { %vm732_vm4 = vcmp.eq.s32.totalorder %v730_v10, 0  ;;  %v944_v4 = vxor.u32 2147483648, %v7978_v61  ;;  %v425_v5 = vsel %vm423_vm14, %v424_v20, %v4043_v3  ;;  %v616_v34 = vxor.u32 2147483648, %v615_v48 }
 0x3b4   :  { %v1050_v23 = vsel %vm1043_vm0, %v1046_v59, %v1049_v53  ;;  %v734_v51 = vsel %vm732_vm4, %v7973_v52, %v733_v24  ;;  %v422_v33 = vsel %vm420_vm3, %v4041_v32, %v421_v38  ;;  %vm735_vm8 = vcmp.eq.s32.totalorder %v730_v10, 2 }
 0x3b5   :  { %v938_v13 = vand.u32 3, %v937_v43  ;;  %v1242_v56 = vsub.s32 4, %v7979_v25  ;;  %vm7980_vm15 = vcmp.lt.s32.totalorder %v7908_v39, 0  ;;  %v842_v54 = vsel %vm835_vm5, %v838_v26, %v841_v27 }
 0x3b6   :  { %v617_v31 = vsel %vm7980_vm15, %v616_v34, %v615_v48  ;;  %vm731_vm12 = vcmp.lt.s32.totalorder %v730_v10, 2  ;;  %v737_v20 = vsel %vm735_vm8, %v736_v47, %v7972_v29  ;;  %vm7981_vm14 = vcmp.lt.s32.totalorder %v6913_v9, 2  ;;  %v7983_v9 = vld [vmem:[#allocation31_spill] sm:$0xff]  ;;  %v7986_v47 = vld [vmem:[#allocation48_spill] sm:$0xff] }
 0x3b7   :  { %v426_v3 = vsel %vm7981_vm14, %v422_v33, %v425_v5  ;;  %v620_v32 = vsel %vm6889_vm7, %v7908_v39, %v617_v31  ;;  %vm7982_vm3 = vweird.f32 %v4479_v6  ;;  %v738_v24 = vsel %vm731_vm12, %v734_v51, %v737_v20  ;;  %v7987_v10 = vld [vmem:[#allocation36_spill] sm:$0xff] }
 0x3b8   :  { %v7012_v43 = vsel %vm7982_vm3, nan, %v1050_v23  ;;  %4044 = vcosq.f32 %v620_v32  ;;  %vm939_vm4 = vcmp.lt.s32.totalorder %v938_v13, 2  ;;  %vm940_vm0 = vcmp.eq.s32.totalorder %v938_v13, 0  ;;  %v7992_v23 = vld [vmem:[#allocation27_spill] sm:$0xff]  ;;  %v7994_v33 = vld [vmem:[#allocation44_spill] sm:$0xff] }
 0x3b9   :  { %vm943_vm15 = vcmp.eq.s32.totalorder %v938_v13, 2  ;;  %4046 = vsinq.f32 %v620_v32  ;;  %v942_v7 = vsel %vm940_vm0, %v7978_v61, %v941_v37  ;;  %vm7984_vm5 = vcmp.lt.s32.totalorder %v7983_v9, 0  ;;  %v7988_v37 = vld [vmem:[#allocation64_spill] sm:$0xff]  ;;  %v7989_v61 = vld [vmem:[#allocation39_spill] sm:$0xff] }
 0x3ba   :  { %v945_v48 = vsel %vm943_vm15, %v944_v4, %v7977_v28  ;;  %v1243_v26 = vsel %vm7984_vm5, %v1242_v56, %v7979_v25  ;;  %v7021_v15 = vsel %vm832_vm9, nan, %v842_v54  ;;  %vm728_vm7 = vweird.f32 %v7968_v12  ;;  %v7995_v56 = vld [vmem:[#allocation75_spill] sm:$0xff]  ;;  %v7996_v54 = vld [vmem:[#allocation73_spill] sm:$0xff] }
 0x3bb   :  { %v946_v6 = vsel %vm939_vm4, %v942_v7, %v945_v48  ;;  %v1245_v29 = vsel %vm5138_vm1, 0, %v1243_v26  ;;  %v3551_v52 = vpack.c.bf16 %v7012_v43, %v7021_v15  ;;  %vm936_vm8 = vweird.f32 %v7974_v18  ;;  %v7999_v48 = vld [vmem:[#allocation57_spill] sm:$0xff] }
 0x3bc   :  { %v1249_v4 = vadd.s32 3, %v1245_v29  ;;  %v1450_v59 = vsub.s32 4, %v7986_v47  ;;  %v7032_v53 = vsel %vm416_vm10, nan, %v426_v3  ;;  %vm631_vm9 = vcmp.eq.s32.totalorder %v6940_v19, 2  ;;  %v7997_v3 = vld [vmem:[#allocation60_spill] sm:$0xff] }
 0x3bd   :  { %v7035_v40 = vsel %vm728_vm7, nan, %v738_v24  ;;  %v1253_v12 = vxor.u32 2147483648, %v5248_v0  ;;  %v1138_v22 = vsub.s32 4, %v7987_v10  ;;  %vm628_vm1 = vcmp.eq.s32.totalorder %v6940_v19, 0 }
 0x3be   :  { %v7040_v28 = vsel %vm936_vm8, nan, %v946_v6  ;;  %v1250_v18 = vand.u32 3, %v1249_v4  ;;  %v1256_v38 = vxor.u32 2147483648, %v7988_v37  ;;  %vm7990_vm12 = vcmp.lt.s32.totalorder %v7989_v61, 0  ;;  %v8000_v6 = vld [vmem:[#allocation33_spill] sm:$0xff] }
 0x3bf   :  { %v1451_v8 = vsel %vm7990_vm12, %v1450_v59, %v7986_v47  ;;  %vm627_vm10 = vcmp.lt.s32.totalorder %v6940_v19, 2  ;;  %vm1456_vm14 = vweird.f32 %v7989_v61  ;;  %vm7993_vm3 = vcmp.lt.s32.totalorder %v7992_v23, 0 }
 0x3c0   :  { %v1453_v34 = vsel %vm5264_vm11, 0, %v1451_v8  ;;  %v1139_v51 = vsel %vm7993_vm3, %v1138_v22, %v7987_v10  ;;  %v1346_v13 = vsub.s32 4, %v7994_v33  ;;  %vm624_vm4 = vweird.f32 %v7908_v39 }
 0x3c1   :  { %v1457_v25 = vadd.s32 3, %v1453_v34  ;;  %v1461_v31 = vxor.u32 2147483648, %v7995_v56  ;;  %v1464_v20 = vxor.u32 2147483648, %v7996_v54  ;;  %v1149_v32 = vxor.u32 2147483648, %v7997_v3 }
 0x3c2   :  { %vm1252_vm0 = vcmp.eq.s32.totalorder %v1250_v18, 0  ;;  %v1141_v7 = vsel %vm5026_vm13, 0, %v1139_v51  ;;  %v1152_v26 = vxor.u32 2147483648, %v7999_v48  ;;  %vm8001_vm11 = vcmp.lt.s32.totalorder %v8000_v6, 0  ;;  %v4045_v10 = vpop.eup %4044 }
 0x3c3   :  { %v1347_v27 = vsel %vm8001_vm11, %v1346_v13, %v7994_v33  ;;  %vm1255_vm15 = vcmp.eq.s32.totalorder %v1250_v18, 2  ;;  %v1458_v29 = vand.u32 3, %v1457_v25  ;;  %v1145_v4 = vadd.s32 3, %v1141_v7  ;;  %v4047_v34 = vpop.eup %4046 }
 0x3c4   :  { %v1349_v59 = vsel %vm5179_vm2, 0, %v1347_v27  ;;  %vm1248_vm5 = vweird.f32 %v7983_v9  ;;  %vm1251_vm7 = vcmp.lt.s32.totalorder %v1250_v18, 2  ;;  %v1254_v22 = vsel %vm1252_vm0, %v7988_v37, %v1253_v12  ;;  %v8003_v12 = vld [vmem:[#allocation69_spill] sm:$0xff] }
 0x3c5   :  { %v1257_v8 = vsel %vm1255_vm15, %v1256_v38, %v5248_v0  ;;  %v1353_v5 = vadd.s32 3, %v1349_v59  ;;  %v632_v51 = vxor.u32 2147483648, %v4045_v10  ;;  %vm1459_vm13 = vcmp.lt.s32.totalorder %v1458_v29, 2 }
 0x3c6   :  { %vm1460_vm8 = vcmp.eq.s32.totalorder %v1458_v29, 0  ;;  %vm1463_vm12 = vcmp.eq.s32.totalorder %v1458_v29, 2  ;;  %v629_v33 = vxor.u32 2147483648, %v4047_v34  ;;  %v1146_v24 = vand.u32 3, %v1145_v4  ;;  %v8004_v29 = vld [vmem:[#allocation67_spill] sm:$0xff] }
 0x3c7   :  { %v1462_v13 = vsel %vm1460_vm8, %v7996_v54, %v1461_v31  ;;  %v1465_v25 = vsel %vm1463_vm12, %v1464_v20, %v7995_v56  ;;  %v633_v7 = vsel %vm631_vm9, %v632_v51, %v4047_v34  ;;  %v1354_v47 = vand.u32 3, %v1353_v5 }
 0x3c8   :  { %v1466_v27 = vsel %vm1459_vm13, %v1462_v13, %v1465_v25  ;;  %v1357_v37 = vxor.u32 2147483648, %v8003_v12  ;;  %v630_v0 = vsel %vm628_vm1, %v4045_v10, %v629_v33  ;;  %v1258_v38 = vsel %vm1251_vm7, %v1254_v22, %v1257_v8  ;;  %v8013_v33 = vld [vmem:[#allocation29_spill] sm:$0xff] }
 0x3c9   :  { %vm1148_vm2 = vcmp.eq.s32.totalorder %v1146_v24, 0  ;;  %v1360_v59 = vxor.u32 2147483648, %v8004_v29  ;;  %v634_v31 = vsel %vm627_vm10, %v630_v0, %v633_v7  ;;  %v1467_v56 = vsel %vm1456_vm14, nan, %v1466_v27  ;;  %v8015_v25 = vld [vmem:[#allocation81_spill] sm:$0xff]  ;;  %v8016_v7 = vld [vmem:[#allocation82_spill] sm:$0xff] }
 0x3ca   :  { %v1150_v54 = vsel %vm1148_vm2, %v7999_v48, %v1149_v32  ;;  %vm1151_vm9 = vcmp.eq.s32.totalorder %v1146_v24, 2  ;;  %v635_v20 = vsel %vm624_vm4, nan, %v634_v31  ;;  %vm1147_vm3 = vcmp.lt.s32.totalorder %v1146_v24, 2  ;;  %v8005_v32 = vld [vmem:[#allocation59_spill] sm:$0xff] }
 0x3cb   :  { %v1153_v4 = vsel %vm1151_vm9, %v1152_v26, %v7997_v3  ;;  %vm1356_vm1 = vcmp.eq.s32.totalorder %v1354_v47, 0  ;;  %v3549_v18 = vpack.c.bf16 %v635_v20, %v7032_v53  ;;  %vm1359_vm0 = vcmp.eq.s32.totalorder %v1354_v47, 2  ;;  %v8006_v53 = vld [vmem:[#allocation68_spill] sm:$0xff] }
 0x3cc   :  { %v1154_v10 = vsel %vm1147_vm3, %v1150_v54, %v1153_v4  ;;  %v1358_v22 = vsel %vm1356_vm1, %v8004_v29, %v1357_v37  ;;  %v3550_v19 = vpack.c.bf16 %v7040_v28, %v7035_v40  ;;  %vm1355_vm10 = vcmp.lt.s32.totalorder %v1354_v47, 2  ;;  %v8008_v28 = vld [vmem:[#allocation49_spill] sm:$0xff]  ;;  %v8020_v37 = vld [vmem:[#allocation63_spill] sm:$0xff] }
 0x3cd   :  { %v1361_v61 = vsel %vm1359_vm0, %v1360_v59, %v8003_v12  ;;  %v1658_v48 = vsub.s32 4, %v8005_v32  ;;  %3578 = vmatprep.subr.bf16.mxu1 %v3549_v18  ;;  %v1259_v39 = vsel %vm1248_vm5, nan, %v1258_v38  ;;  %vm1144_vm14 = vweird.f32 %v7992_v23  ;;  %v8010_v23 = vld [vmem:[#allocation74_spill] sm:$0xff]  ;;  %v8018_v47 = vld [vmem:[#allocation53_spill] sm:$0xff]  ;;  %v8021_v59 = vld [vmem:[#allocation88_spill] sm:$0xff] }
 0x3ce   :  { %v1362_v3 = vsel %vm1355_vm10, %v1358_v22, %v1361_v61  ;;  %v1866_v26 = vsub.s32 4, %v8006_v53  ;;  %v8007_v8 = vpack.c.bf16 %v6960_v1, %v6946_v21  ;;  %v3553_v5 = vpack.c.bf16 %v1467_v56, %v1259_v39  ;;  %v8012_v21 = vld [vmem:[#allocation83_spill] sm:$0xff]  ;;  %v8027_v61 = vld [vmem:[#allocation78_spill] sm:$0xff]  ;;  %v8028_v39 = vld [vmem:[#allocation52_spill] sm:$0xff] }
 0x3cf   :  { %v7099_v40 = vsel %vm1144_vm14, nan, %v1154_v10  ;;  %vm1352_vm4 = vweird.f32 %v8000_v6  ;;  %vm8009_vm11 = vcmp.lt.s32.totalorder %v8008_v28, 0  ;;  %vm8011_vm15 = vnez %v8010_v23  ;;  %v8022_v56 = vld [vmem:[#allocation43_spill] sm:$0xff]  ;;  %v8026_v10 = vld [vmem:[#allocation80_spill] sm:$0xff] }
 0x3d0   :  { %3579 = vmatpush1.bf16.xpose.msra.mxu1 %v8007_v8  ;;  %v1659_v34 = vsel %vm8009_vm11, %v1658_v48, %v8005_v32  ;;  %v7108_v9 = vsel %vm1352_vm4, nan, %v1362_v3  ;;  %v1669_v1 = vxor.u32 2147483648, %v8012_v21  ;;  %vm8014_vm5 = vcmp.lt.s32.totalorder %v8013_v33, 0  ;;  %v8024_v4 = vld [vmem:[#allocation71_spill] sm:$0xff]  ;;  %v8030_v23 = vld [vmem:[#allocation76_spill] sm:$0xff] }
 0x3d1   :  { %3580 = vmatprep.subr.bf16.mxu1 %v3551_v52  ;;  %v1661_v51 = vsel %vm8011_vm15, 0, %v1659_v34  ;;  %v1867_v13 = vsel %vm8014_vm5, %v1866_v26, %v8006_v53  ;;  %v1672_v24 = vxor.u32 2147483648, %v8015_v25  ;;  %vm8017_vm7 = vnez %v8016_v7  ;;  %v8019_v52 = vld [vmem:[#allocation89_spill] sm:$0xff]  ;;  %v8033_v7 = vld [vmem:[#allocation87_spill] sm:$0xff] }
 0x3d2   :  { %v1665_v6 = vadd.s32 3, %v1661_v51  ;;  %v1869_v27 = vsel %vm8017_vm7, 0, %v1867_v13  ;;  %v1554_v43 = vsub.s32 4, %v8018_v47  ;;  %vm1664_vm13 = vweird.f32 %v8008_v28  ;;  %v8032_v13 = vld [vmem:[#allocation72_spill] sm:$0xff]  ;;  %v8039_v28 = vld [vmem:[#allocation85_spill] sm:$0xff] }
 0x3d3   :  { %vm1872_vm8 = vweird.f32 %v8013_v33  ;;  %v1873_v15 = vadd.s32 3, %v1869_v27  ;;  %v1877_v12 = vxor.u32 2147483648, %v8019_v52  ;;  %v1762_v0 = vsub.s32 4, %v8020_v37 }
 0x3d4   :  { %v3552_v38 = vpack.c.bf16 %v7108_v9, %v7099_v40  ;;  %v1666_v29 = vand.u32 3, %v1665_v6  ;;  %v1880_v31 = vxor.u32 2147483648, %v8021_v59  ;;  %vm8023_vm12 = vcmp.lt.s32.totalorder %v8022_v56, 0 }
 0x3d5   :  { %v1555_v54 = vsel %vm8023_vm12, %v1554_v43, %v8018_v47  ;;  %v1874_v20 = vand.u32 3, %v1873_v15  ;;  %vm8025_vm2 = vnez %v8024_v4  ;;  %v1565_v22 = vxor.u32 2147483648, %v8026_v10  ;;  %v8034_v47 = vld [vmem:[#allocation86_spill] sm:$0xff] }
 0x3d6   :  { %v1557_v18 = vsel %vm8025_vm2, 0, %v1555_v54  ;;  %v1568_v32 = vxor.u32 2147483648, %v8027_v61  ;;  %vm1668_vm9 = vcmp.eq.s32.totalorder %v1666_v29, 0  ;;  %vm1671_vm3 = vcmp.eq.s32.totalorder %v1666_v29, 2  ;;  %v8035_v15 = vld [vmem:[#allocation66_spill] sm:$0xff] }
 0x3d7   :  { %v1561_v48 = vadd.s32 3, %v1557_v18  ;;  %vm8029_vm1 = vcmp.lt.s32.totalorder %v8028_v39, 0  ;;  %vm1667_vm0 = vcmp.lt.s32.totalorder %v1666_v29, 2  ;;  %v1670_v53 = vsel %vm1668_vm9, %v8015_v25, %v1669_v1 }
 0x3d8   :  { %v1763_v3 = vsel %vm8029_vm1, %v1762_v0, %v8020_v37  ;;  %v1673_v26 = vsel %vm1671_vm3, %v1672_v24, %v8012_v21  ;;  %vm1876_vm10 = vcmp.eq.s32.totalorder %v1874_v20, 0  ;;  %3581 = vmatpush1.bf16.xpose.msra.mxu1 %v3550_v19  ;;  %vm1875_vm14 = vcmp.lt.s32.totalorder %v1874_v20, 2  ;;  %v8037_v37 = vld [vmem:[#allocation93_spill] sm:$0xff] }
 0x3d9   :  { %v1878_v8 = vsel %vm1876_vm10, %v8021_v59, %v1877_v12  ;;  %vm1879_vm4 = vcmp.eq.s32.totalorder %v1874_v20, 2  ;;  %v1562_v40 = vand.u32 3, %v1561_v48  ;;  %3582 = vmatprep.subr.bf16.mxu1 %v3553_v5  ;;  %v1674_v34 = vsel %vm1667_vm0, %v1670_v53, %v1673_v26 }
 0x3da   :  { %v1881_v9 = vsel %vm1879_vm4, %v1880_v31, %v8019_v52  ;;  %vm1560_vm11 = vweird.f32 %v8022_v56  ;;  %vm8031_vm15 = vnez %v8030_v23  ;;  %v2074_v1 = vsub.s32 4, %v8032_v13  ;;  %v8044_v56 = vld [vmem:[#allocation62_spill] sm:$0xff] }
 0x3db   :  { %v1765_v51 = vsel %vm8031_vm15, 0, %v1763_v3  ;;  %v1882_v6 = vsel %vm1875_vm14, %v1878_v8, %v1881_v9  ;;  %vm1564_vm5 = vcmp.eq.s32.totalorder %v1562_v40, 0  ;;  %vm1567_vm7 = vcmp.eq.s32.totalorder %v1562_v40, 2  ;;  %v8043_v3 = vld [vmem:[#allocation70_spill] sm:$0xff] }
 0x3dc   :  { %vm1768_vm12 = vweird.f32 %v8028_v39  ;;  %v1883_v19 = vsel %vm1872_vm8, nan, %v1882_v6  ;;  %v1566_v5 = vsel %vm1564_vm5, %v8027_v61, %v1565_v22  ;;  %v1569_v21 = vsel %vm1567_vm7, %v1568_v32, %v8026_v10  ;;  %v8041_v32 = vld [vmem:[#allocation100_spill] sm:$0xff]  ;;  %v8046_v6 = vld [vmem:[#allocation35_spill] sm:$0xff] }
 0x3dd   :  { %v1769_v25 = vadd.s32 3, %v1765_v51  ;;  %v1675_v24 = vsel %vm1664_vm13, nan, %v1674_v34  ;;  %v1773_v27 = vxor.u32 2147483648, %v8033_v7  ;;  %v1776_v43 = vxor.u32 2147483648, %v8034_v47 }
 0x3de   :  { %vm8036_vm2 = vcmp.lt.s32.totalorder %v8035_v15, 0  ;;  %v3555_v12 = vpack.c.bf16 %v1883_v19, %v1675_v24  ;;  %vm1563_vm9 = vcmp.lt.s32.totalorder %v1562_v40, 2  ;;  %vm8038_vm8 = vnez %v8037_v37  ;;  %v8048_v19 = vld [vmem:[#allocation96_spill] sm:$0xff]  ;;  %v8050_v24 = vld [vmem:[#allocation94_spill] sm:$0xff] }
 0x3df   :  { %v2075_v52 = vsel %vm8036_vm2, %v2074_v1, %v8032_v13  ;;  %v1770_v33 = vand.u32 3, %v1769_v25  ;;  %v1570_v29 = vsel %vm1563_vm9, %v1566_v5, %v1569_v21  ;;  %v2085_v31 = vxor.u32 2147483648, %v6052_v45  ;;  %v8049_v21 = vld [vmem:[#allocation79_spill] sm:$0xff] }
 0x3e0   :  { %v2077_v0 = vsel %vm8038_vm8, 0, %v2075_v52  ;;  %v2282_v54 = vsub.s32 4, %v8039_v28  ;;  %v2088_v20 = vxor.u32 2147483648, %v6030_v41  ;;  %3583 = vmatpush1.bf16.xpose.msra.mxu1 %v3552_v38  ;;  %vm8040_vm0 = vcmp.lt.s32.totalorder %v5476_v58, 0  ;;  %v8051_v52 = vld [vmem:[#allocation42_spill] sm:$0xff] }
 0x3e1   :  { %v2081_v59 = vadd.s32 3, %v2077_v0  ;;  %vm1771_vm13 = vcmp.lt.s32.totalorder %v1770_v33, 2  ;;  %vm1772_vm3 = vcmp.eq.s32.totalorder %v1770_v33, 0  ;;  %vm1775_vm1 = vcmp.eq.s32.totalorder %v1770_v33, 2  ;;  %3584 = vmatprep.subr.bf16.mxu1 %v3555_v12  ;;  %v8053_v0 = vld [vmem:[#allocation99_spill] sm:$0xff] }
 0x3e2   :  { %v1774_v4 = vsel %vm1772_vm3, %v8034_v47, %v1773_v27  ;;  %v1777_v18 = vsel %vm1775_vm1, %v1776_v43, %v8033_v7  ;;  %v2283_v22 = vsel %vm8040_vm0, %v2282_v54, %v8039_v28  ;;  %vm2080_vm10 = vweird.f32 %v8035_v15 }
 0x3e3   :  { %v2082_v10 = vand.u32 3, %v2081_v59  ;;  %v1778_v61 = vsel %vm1771_vm13, %v1774_v4, %v1777_v18  ;;  %vm8042_vm14 = vnez %v8041_v32  ;;  %v1970_v53 = vsub.s32 4, %v8043_v3  ;;  %v8055_v59 = vld [vmem:[#allocation95_spill] sm:$0xff]  ;;  %v8056_v4 = vld [vmem:[#allocation105_spill] sm:$0xff] }
 0x3e4   :  { %v2285_v48 = vsel %vm8042_vm14, 0, %v2283_v22  ;;  %v1571_v38 = vsel %vm1560_vm11, nan, %v1570_v29  ;;  %v1779_v26 = vsel %vm1768_vm12, nan, %v1778_v61  ;;  %vm2288_vm5 = vweird.f32 %v5476_v58  ;;  %v8058_v61 = vld [vmem:[#allocation84_spill] sm:$0xff] }
 0x3e5   :  { %vm2084_vm4 = vcmp.eq.s32.totalorder %v2082_v10, 0  ;;  %vm2087_vm15 = vcmp.eq.s32.totalorder %v2082_v10, 2  ;;  %v2289_v34 = vadd.s32 3, %v2285_v48  ;;  %vm2083_vm7 = vcmp.lt.s32.totalorder %v2082_v10, 2  ;;  %v8057_v10 = vld [vmem:[#allocation104_spill] sm:$0xff]  ;;  %v8060_v48 = vld [vmem:[#allocation106_spill] sm:$0xff] }
 0x3e6   :  { %v2086_v8 = vsel %vm2084_vm4, %v6030_v41, %v2085_v31  ;;  %v2089_v40 = vsel %vm2087_vm15, %v2088_v20, %v6052_v45  ;;  %v2293_v9 = vxor.u32 2147483648, %v6071_v36  ;;  %v2296_v23 = vxor.u32 2147483648, %v6069_v46 }
 0x3e7   :  { %vm8045_vm11 = vcmp.lt.s32.totalorder %v8044_v56, 0  ;;  %v3554_v39 = vpack.c.bf16 %v1779_v26, %v1571_v38  ;;  %v2090_v13 = vsel %vm2083_vm7, %v2086_v8, %v2089_v40  ;;  %v2290_v1 = vand.u32 3, %v2289_v34 }
 0x3e8   :  { %v1971_v51 = vsel %vm8045_vm11, %v1970_v53, %v8043_v3  ;;  %vm8047_vm12 = vnez %v8046_v6  ;;  %vm1976_vm2 = vweird.f32 %v8044_v56  ;;  %v1981_v5 = vxor.u32 2147483648, %v8048_v19  ;;  %v8062_v53 = vld [vmem:[#allocation102_spill] sm:$0xff] }
 0x3e9   :  { %v1973_v41 = vsel %vm8047_vm12, 0, %v1971_v51  ;;  %v2178_v25 = vsub.s32 4, %v8049_v21  ;;  %vm2291_vm9 = vcmp.lt.s32.totalorder %v2290_v1, 2  ;;  %vm2292_vm8 = vcmp.eq.s32.totalorder %v2290_v1, 0  ;;  %3585 = vmatpush1.bf16.xpose.msra.mxu1 %v3554_v39 }
 0x3ea   :  { %v1977_v45 = vadd.s32 3, %v1973_v41  ;;  %vm2295_vm13 = vcmp.eq.s32.totalorder %v2290_v1, 2  ;;  %v1984_v7 = vxor.u32 2147483648, %v8050_v24  ;;  %v2294_v27 = vsel %vm2292_vm8, %v6069_v46, %v2293_v9  ;;  %v8063_v9 = vld [vmem:[#allocation91_spill] sm:$0xff]  ;;  %v8065_v1 = vld [vmem:[#allocation114_spill] sm:$0xff] }
 0x3eb   :  { %v2297_v47 = vsel %vm2295_vm13, %v2296_v23, %v6071_v36  ;;  %vm8052_vm3 = vcmp.lt.s32.totalorder %v8051_v52, 0  ;;  %v2091_v33 = vsel %vm2080_vm10, nan, %v2090_v13  ;;  %vm8054_vm1 = vnez %v8053_v0  ;;  %v8072_v0 = vld [vmem:[#allocation98_spill] sm:$0xff] }
 0x3ec   :  { %v1978_v43 = vand.u32 3, %v1977_v45  ;;  %v2179_v12 = vsel %vm8052_vm3, %v2178_v25, %v8049_v21  ;;  %v2298_v37 = vsel %vm2291_vm9, %v2294_v27, %v2297_v47  ;;  %v2490_v31 = vsub.s32 4, %v8055_v59 }
 0x3ed   :  { %v2181_v29 = vsel %vm8054_vm1, 0, %v2179_v12  ;;  %v2299_v28 = vsel %vm2288_vm5, nan, %v2298_v37  ;;  %v2189_v18 = vxor.u32 2147483648, %v8056_v4  ;;  %v2192_v22 = vxor.u32 2147483648, %v8057_v10 }
 0x3ee   :  { %vm1979_vm0 = vcmp.lt.s32.totalorder %v1978_v43, 2  ;;  %vm1980_vm14 = vcmp.eq.s32.totalorder %v1978_v43, 0  ;;  %vm1983_vm4 = vcmp.eq.s32.totalorder %v1978_v43, 2  ;;  %v3557_v46 = vpack.c.bf16 %v2299_v28, %v2091_v33  ;;  %v8068_v43 = vld [vmem:[#allocation77_spill] sm:$0xff]  ;;  %v8073_v28 = vld [vmem:[#allocation110_spill] sm:$0xff] }
 0x3ef   :  { %v1982_v36 = vsel %vm1980_vm14, %v8050_v24, %v1981_v5  ;;  %v1985_v54 = vsel %vm1983_vm4, %v1984_v7, %v8048_v19  ;;  %v2185_v20 = vadd.s32 3, %v2181_v29  ;;  %vm8059_vm10 = vcmp.lt.s32.totalorder %v8058_v61, 0  ;;  %v8067_v19 = vld [vmem:[#allocation92_spill] sm:$0xff] }
 0x3f0   :  { %v1986_v15 = vsel %vm1979_vm0, %v1982_v36, %v1985_v54  ;;  %v2491_v32 = vsel %vm8059_vm10, %v2490_v31, %v8055_v59  ;;  %3586 = vmatprep.subr.bf16.mxu1 %v3557_v46  ;;  %vm2184_vm15 = vweird.f32 %v8051_v52  ;;  %vm8061_vm5 = vnez %v8060_v48  ;;  %v8074_v36 = vld [vmem:[#allocation107_spill] sm:$0xff] }
 0x3f1   :  { %v2186_v58 = vand.u32 3, %v2185_v20  ;;  %v2493_v3 = vsel %vm8061_vm5, 0, %v2491_v32  ;;  %v2698_v38 = vsub.s32 4, %v8062_v53  ;;  %v1987_v26 = vsel %vm1976_vm2, nan, %v1986_v15  ;;  %v8078_v32 = vld [vmem:[#allocation113_spill] sm:$0xff] }
 0x3f2   :  { %v2497_v8 = vadd.s32 3, %v2493_v3  ;;  %v2501_v40 = vxor.u32 2147483648, %v6309_v17  ;;  %v2504_v34 = vxor.u32 2147483648, %v6196_v44  ;;  %vm8064_vm9 = vcmp.lt.s32.totalorder %v8063_v9, 0 }
 0x3f3   :  { %vm2187_vm7 = vcmp.lt.s32.totalorder %v2186_v58, 2  ;;  %vm2188_vm11 = vcmp.eq.s32.totalorder %v2186_v58, 0  ;;  %vm2191_vm12 = vcmp.eq.s32.totalorder %v2186_v58, 2  ;;  %v2699_v23 = vsel %vm8064_vm9, %v2698_v38, %v8062_v53  ;;  %v8081_v38 = vld [vmem:[#allocation118_spill] sm:$0xff] }
 0x3f4   :  { %v2190_v51 = vsel %vm2188_vm11, %v8057_v10, %v2189_v18  ;;  %v2193_v39 = vsel %vm2191_vm12, %v2192_v22, %v8056_v4  ;;  %v2498_v13 = vand.u32 3, %v2497_v8  ;;  %vm8066_vm8 = vnez %v8065_v1  ;;  %v8077_v4 = vld [vmem:[#allocation111_spill] sm:$0xff]  ;;  %v8085_v1 = vld [vmem:[#allocation117_spill] sm:$0xff] }
 0x3f5   :  { %v2701_v56 = vsel %vm8066_vm8, 0, %v2699_v23  ;;  %v2194_v6 = vsel %vm2187_vm7, %v2190_v51, %v2193_v39  ;;  %v2709_v45 = vxor.u32 2147483648, %v6497_v55  ;;  %v2386_v5 = vsub.s32 4, %v8067_v19  ;;  %v8083_v23 = vld [vmem:[#allocation126_spill] sm:$0xff]  ;;  %v8084_v39 = vld [vmem:[#allocation124_spill] sm:$0xff] }
 0x3f6   :  { %v2705_v41 = vadd.s32 3, %v2701_v56  ;;  %v2195_v21 = vsel %vm2184_vm15, nan, %v2194_v6  ;;  %vm2500_vm2 = vcmp.eq.s32.totalorder %v2498_v13, 0  ;;  %vm2503_vm13 = vcmp.eq.s32.totalorder %v2498_v13, 2 }
 0x3f7   :  { %v2712_v25 = vxor.u32 2147483648, %v6479_v2  ;;  %v3556_v24 = vpack.c.bf16 %v2195_v21, %v1987_v26  ;;  %v2502_v7 = vsel %vm2500_vm2, %v6196_v44, %v2501_v40  ;;  %v2505_v27 = vsel %vm2503_vm13, %v2504_v34, %v6309_v17  ;;  %v8070_v17 = vld [vmem:[#allocation101_spill] sm:$0xff] }
 0x3f8   :  { %v2706_v47 = vand.u32 3, %v2705_v41  ;;  %vm2496_vm3 = vweird.f32 %v8058_v61  ;;  %vm2499_vm1 = vcmp.lt.s32.totalorder %v2498_v13, 2  ;;  %vm2704_vm0 = vweird.f32 %v8063_v9 }
 0x3f9   :  { %vm8069_vm14 = vcmp.lt.s32.totalorder %v8068_v43, 0  ;;  %3587 = vmatpush1.bf16.xpose.msra.mxu1 %v3556_v24  ;;  %v2506_v12 = vsel %vm2499_vm1, %v2502_v7, %v2505_v27  ;;  %vm8071_vm5 = vnez %v8070_v17  ;;  %v2594_v29 = vsub.s32 4, %v8072_v0  ;;  %v8088_v24 = vld [vmem:[#allocation125_spill] sm:$0xff]  ;;  %v8090_v27 = vld [vmem:[#allocation108_spill] sm:$0xff] }
 0x3fa   :  { %v2387_v52 = vsel %vm8069_vm14, %v2386_v5, %v8067_v19  ;;  %vm2707_vm4 = vcmp.lt.s32.totalorder %v2706_v47, 2  ;;  %vm2708_vm10 = vcmp.eq.s32.totalorder %v2706_v47, 0  ;;  %vm2711_vm15 = vcmp.eq.s32.totalorder %v2706_v47, 2  ;;  %v8086_v5 = vld [vmem:[#allocation109_spill] sm:$0xff] }
 0x3fb   :  { %v2710_v33 = vsel %vm2708_vm10, %v6479_v2, %v2709_v45  ;;  %v2713_v44 = vsel %vm2711_vm15, %v2712_v25, %v6497_v55  ;;  %v2389_v37 = vsel %vm8071_vm5, 0, %v2387_v52  ;;  %v2397_v46 = vxor.u32 2147483648, %v8073_v28  ;;  %v8075_v2 = vld [vmem:[#allocation90_spill] sm:$0xff] }
 0x3fc   :  { %v2714_v59 = vsel %vm2707_vm4, %v2710_v33, %v2713_v44  ;;  %v2393_v31 = vadd.s32 3, %v2389_v37  ;;  %v2400_v54 = vxor.u32 2147483648, %v8074_v36  ;;  %v2507_v20 = vsel %vm2496_vm3, nan, %v2506_v12 }
 0x3fd   :  { %v2715_v15 = vsel %vm2704_vm0, nan, %v2714_v59  ;;  %vm8076_vm7 = vcmp.lt.s32.totalorder %v8075_v2, 0  ;;  %v2906_v18 = vsub.s32 4, %v8077_v4  ;;  %vm2392_vm11 = vweird.f32 %v8068_v43 }
 0x3fe   :  { %v2595_v55 = vsel %vm8076_vm7, %v2594_v29, %v8072_v0  ;;  %v3559_v10 = vpack.c.bf16 %v2715_v15, %v2507_v20  ;;  %v2394_v22 = vand.u32 3, %v2393_v31  ;;  %vm8079_vm12 = vnez %v8078_v32  ;;  %v8091_v0 = vld [vmem:[#allocation97_spill] sm:$0xff]  ;;  %v8093_v31 = vld [vmem:[#allocation116_spill] sm:$0xff]  ;;  %v8096_v20 = vld [vmem:[#allocation115_spill] sm:$0xff] }
 0x3ff   :  { %v2597_v58 = vsel %vm8079_vm12, 0, %v2595_v55  ;;  %vm2600_vm9 = vweird.f32 %v8075_v2  ;;  %v2605_v48 = vxor.u32 2147483648, %v6469_v50  ;;  %vm8080_vm8 = vcmp.lt.s32.totalorder %v5985_v16, 0  ;;  %v8097_v2 = vld [vmem:[#allocation122_spill] sm:$0xff] }
 0x400   :  { %v2601_v61 = vadd.s32 3, %v2597_v58  ;;  %v2907_v3 = vsel %vm8080_vm8, %v2906_v18, %v8077_v4  ;;  %3588 = vmatprep.subr.bf16.mxu1 %v3559_v10  ;;  %vm2396_vm2 = vcmp.eq.s32.totalorder %v2394_v22, 0  ;;  %vm2399_vm13 = vcmp.eq.s32.totalorder %v2394_v22, 2 }
 0x401   :  { %v2608_v53 = vxor.u32 2147483648, %v6325_v62  ;;  %vm8082_vm3 = vnez %v8081_v38  ;;  %v2398_v8 = vsel %vm2396_vm2, %v8074_v36, %v2397_v46  ;;  %v2401_v40 = vsel %vm2399_vm13, %v2400_v54, %v8073_v28  ;;  %v8095_v36 = vld [vmem:[#allocation123_spill] sm:$0xff] }
 0x402   :  { %v2909_v26 = vsel %vm8082_vm3, 0, %v2907_v3  ;;  %v2602_v34 = vand.u32 3, %v2601_v61  ;;  %vm2395_vm1 = vcmp.lt.s32.totalorder %v2394_v22, 2  ;;  %v2917_v51 = vxor.u32 2147483648, %v8083_v23  ;;  %v8098_v22 = vld [vmem:[#allocation103_spill] sm:$0xff] }
 0x403   :  { %v2913_v9 = vadd.s32 3, %v2909_v26  ;;  %v2920_v13 = vxor.u32 2147483648, %v8084_v39  ;;  %v3114_v56 = vsub.s32 4, %v8085_v1  ;;  %v2402_v6 = vsel %vm2395_vm1, %v2398_v8, %v2401_v40 }
 0x404   :  { %vm2603_vm0 = vcmp.lt.s32.totalorder %v2602_v34, 2  ;;  %vm2604_vm14 = vcmp.eq.s32.totalorder %v2602_v34, 0  ;;  %vm2607_vm4 = vcmp.eq.s32.totalorder %v2602_v34, 2  ;;  %vm8087_vm10 = vcmp.lt.s32.totalorder %v8086_v5, 0 }
 0x405   :  { %v2606_v41 = vsel %vm2604_vm14, %v6325_v62, %v2605_v48  ;;  %v2609_v45 = vsel %vm2607_vm4, %v2608_v53, %v6469_v50  ;;  %v2914_v19 = vand.u32 3, %v2913_v9  ;;  %v3115_v21 = vsel %vm8087_vm10, %v3114_v56, %v8085_v1  ;;  %v8100_v48 = vld [vmem:[#allocation121_spill] sm:$0xff]  ;;  %v8102_v53 = vld [vmem:[#allocation127_spill] sm:$0xff]  ;;  %v8103_v9 = vld [vmem:[#allocation128_spill] sm:$0xff] }
 0x406   :  { %v2610_v25 = vsel %vm2603_vm0, %v2606_v41, %v2609_v45  ;;  %vm2912_vm15 = vweird.f32 %v5985_v16  ;;  %vm8089_vm5 = vnez %v8088_v24  ;;  %v2802_v47 = vsub.s32 4, %v8090_v27 }
 0x407   :  { %v3117_v7 = vsel %vm8089_vm5, 0, %v3115_v21  ;;  %v2403_v52 = vsel %vm2392_vm11, nan, %v2402_v6  ;;  %v2611_v62 = vsel %vm2600_vm9, nan, %v2610_v25  ;;  %vm2916_vm7 = vcmp.eq.s32.totalorder %v2914_v19, 0 }
 0x408   :  { %vm2919_vm12 = vcmp.eq.s32.totalorder %v2914_v19, 2  ;;  %v3558_v50 = vpack.c.bf16 %v2611_v62, %v2403_v52  ;;  %v2918_v12 = vsel %vm2916_vm7, %v8084_v39, %v2917_v51  ;;  %v3121_v44 = vadd.s32 3, %v3117_v7  ;;  %v8109_v62 = vld [vmem:[#allocation120_spill] sm:$0xff] }
 0x409   :  { %v2921_v33 = vsel %vm2919_vm12, %v2920_v13, %v8083_v23  ;;  %vm2915_vm8 = vcmp.lt.s32.totalorder %v2914_v19, 2  ;;  %v3125_v17 = vxor.u32 2147483648, %v6774_v11  ;;  %v3128_v37 = vxor.u32 2147483648, %v6701_v49 }
 0x40a   :  { %vm8092_vm2 = vcmp.lt.s32.totalorder %v8091_v0, 0  ;;  %3589 = vmatpush1.bf16.xpose.msra.mxu1 %v3558_v50  ;;  %v2922_v29 = vsel %vm2915_vm8, %v2918_v12, %v2921_v33  ;;  %vm3120_vm11 = vweird.f32 %v8086_v5  ;;  %v3122_v59 = vand.u32 3, %v3121_v44 }
 0x40b   :  { %v2803_v43 = vsel %vm8092_vm2, %v2802_v47, %v8090_v27  ;;  %vm8094_vm9 = vnez %v8093_v31  ;;  %vm2808_vm13 = vweird.f32 %v8091_v0  ;;  %v2813_v54 = vxor.u32 2147483648, %v8095_v36  ;;  %v8108_v47 = vld [vmem:[#allocation17_spill] sm:$0xff]  ;;  %v8111_v0 = vld [vmem:[#allocation112_spill] sm:$0xff] }
 0x40c   :  { %v2805_v28 = vsel %vm8094_vm9, 0, %v2803_v43  ;;  %v3010_v15 = vsub.s32 4, %v8096_v20  ;;  %vm3123_vm3 = vcmp.lt.s32.totalorder %v3122_v59, 2  ;;  %vm3124_vm1 = vcmp.eq.s32.totalorder %v3122_v59, 0 }
 0x40d   :  { %v2809_v46 = vadd.s32 3, %v2805_v28  ;;  %vm3127_vm0 = vcmp.eq.s32.totalorder %v3122_v59, 2  ;;  %v2816_v55 = vxor.u32 2147483648, %v8097_v2  ;;  %v3126_v4 = vsel %vm3124_vm1, %v6701_v49, %v3125_v17  ;;  %v8115_v28 = vld [vmem:[#allocation7_spill] sm:$0xff] }
 0x40e   :  { %v3129_v18 = vsel %vm3127_vm0, %v3128_v37, %v6774_v11  ;;  %vm8099_vm14 = vcmp.lt.s32.totalorder %v8098_v22, 0  ;;  %v2923_v58 = vsel %vm2912_vm15, nan, %v2922_v29  ;;  %vm8101_vm4 = vnez %v8100_v48  ;;  %v8120_v48 = vld [vmem:[#allocation15_spill] sm:$0xff] }
 0x40f   :  { %v2810_v10 = vand.u32 3, %v2809_v46  ;;  %v3011_v32 = vsel %vm8099_vm14, %v3010_v15, %v8096_v20  ;;  %v3130_v61 = vsel %vm3123_vm3, %v3126_v4, %v3129_v18  ;;  %v3322_v38 = vsub.s32 4, %v8102_v53  ;;  %v8116_v15 = vld [vmem:[#allocation22_spill] sm:$0xff]  ;;  %v8117_v18 = vld [vmem:[#allocation12_spill] sm:$0xff] }
 0x410   :  { %v3013_v3 = vsel %vm8101_vm4, 0, %v3011_v32  ;;  %v3131_v26 = vsel %vm3120_vm11, nan, %v3130_v61  ;;  %v3021_v34 = vxor.u32 2147483648, %v6696_v35  ;;  %v3024_v23 = vxor.u32 2147483648, %v8103_v9 }
 0x411   :  { %vm2811_vm10 = vcmp.lt.s32.totalorder %v2810_v10, 2  ;;  %vm2812_vm5 = vcmp.eq.s32.totalorder %v2810_v10, 0  ;;  %vm2815_vm7 = vcmp.eq.s32.totalorder %v2810_v10, 2  ;;  %v3561_v49 = vpack.c.bf16 %v3131_v26, %v2923_v58  ;;  %v8123_v26 = vld [vmem:[#allocation16_spill] sm:$0xff] }
 0x412   :  { %v2814_v11 = vsel %vm2812_vm5, %v8097_v2, %v2813_v54  ;;  %v2817_v8 = vsel %vm2815_vm7, %v2816_v55, %v8095_v36  ;;  %v3017_v40 = vadd.s32 3, %v3013_v3  ;;  %vm8104_vm15 = vcmp.lt.s32.totalorder %v6299_v30, 0  ;;  %v3564_v36 = vld [vmem:[%s7379_s3] sm:$0xff]  ;;  %s4079_s3 = smov [#allocation2]  }
 0x413   :  { %v2818_v16 = vsel %vm2811_vm10, %v2814_v11, %v2817_v8  ;;  %v3323_v51 = vsel %vm8104_vm15, %v3322_v38, %v8102_v53  ;;  %3590 = vmatprep.subr.bf16.mxu1 %v3561_v49  ;;  %vm3016_vm12 = vweird.f32 %v8098_v22  ;;  %vm8105_vm8 = vnez %v7911_v63  ;;  %v8118_v22 = vld [vmem:[#allocation119_spill] sm:$0xff]  ;;  %v8122_v38 = vld [vmem:[#allocation8_spill] sm:$0xff]  ;;  %s3625_s9 = sshll.u32 %s4079_s3, 4  ;;  %s3626_s9 = int_to_ptr.vmem [resolvable:$true] %s3625_s9 }
 0x414   :  { %v3018_v39 = vand.u32 3, %v3017_v40  ;;  %v3325_v13 = vsel %vm8105_vm8, 0, %v3323_v51  ;;  %v3530_v1 = vsub.s32 4, %v6698_v60  ;;  %v2819_v56 = vsel %vm2808_vm13, nan, %v2818_v16  ;;  %s4048_s10 = scalar_lea.vmem %s3626_s9, 128  ;;  %p4053_p1 = scmp.lt.s32.totalorder %s3626_s9, %s3626_s9 }
 0x415   :  { %v3329_v6 = vadd.s32 3, %v3325_v13  ;;  %v3333_v41 = vxor.u32 2147483648, %v6898_v57  ;;  %v3336_v45 = vxor.u32 2147483648, %v6883_v14  ;;  %vm8106_vm3 = vcmp.lt.s32.totalorder %v6460_v42, 0  ;;  %p4049_p0 = scmp.ne.s32.totalorder %s3626_s9, %s4048_s10  ;;  %p4054_p2 = scmp.lt.s32.totalorder %s4048_s10, %s4048_s10 }
 0x416   :  { %vm3019_vm2 = vcmp.lt.s32.totalorder %v3018_v39, 2  ;;  %vm3020_vm11 = vcmp.eq.s32.totalorder %v3018_v39, 0  ;;  %vm3023_vm9 = vcmp.eq.s32.totalorder %v3018_v39, 2  ;;  %v3531_v19 = vsel %vm8106_vm3, %v3530_v1, %v6698_v60  ;;  %v8110_v60 = vld [vmem:[#allocation21_spill] sm:$0xff] }
 0x417   :  { %v3022_v63 = vsel %vm3020_vm11, %v8103_v9, %v3021_v34  ;;  %v3025_v5 = vsel %vm3023_vm9, %v3024_v23, %v6696_v35  ;;  %v3330_v21 = vand.u32 3, %v3329_v6  ;;  %v3533_v24 = vsel %vm6854_vm6, 0, %v3531_v19  ;;  %p4055_p3 = por %p4054_p2, %p4053_p1 }
 0x418   :  { %v3026_v7 = vsel %vm3019_vm2, %v3022_v63, %v3025_v5  ;;  %v3537_v27 = vadd.s32 3, %v3533_v24  ;;  %v3541_v52 = vxor.u32 2147483648, %v8108_v47  ;;  %v3218_v50 = vsub.s32 4, %v8109_v62 }
 0x419   :  { %v3027_v12 = vsel %vm3016_vm12, nan, %v3026_v7  ;;  %vm3332_vm13 = vcmp.eq.s32.totalorder %v3330_v21, 0  ;;  %vm3335_vm1 = vcmp.eq.s32.totalorder %v3330_v21, 2  ;;  %v3544_v33 = vxor.u32 2147483648, %v8110_v60  ;;  %p4056_p4 = pnand %p4055_p3, %p4049_p0 }
 0x41a   :  { %v3560_v44 = vpack.c.bf16 %v3027_v12, %v2819_v56  ;;  %v3334_v35 = vsel %vm3332_vm13, %v6883_v14, %v3333_v41  ;;  %v3337_v17 = vsel %vm3335_vm1, %v3336_v45, %v6898_v57  ;;  %v3538_v37 = vand.u32 3, %v3537_v27  ;;  %v8113_v14 = vld [vmem:[#allocation13_spill] sm:$0xff] }
 0x41b   :  { %vm3328_vm6 = vweird.f32 %v6299_v30  ;;  %vm3331_vm0 = vcmp.lt.s32.totalorder %v3330_v21, 2  ;;  %vm8112_vm14 = vcmp.lt.s32.totalorder %v8111_v0, 0  ;;  %vm8114_vm7 = vnez %v8113_v14 }
 0x41c   :  { %v3219_v43 = vsel %vm8112_vm14, %v3218_v50, %v8109_v62  ;;  %3591 = vmatpush1.bf16.xpose.msra.mxu1 %v3560_v44  ;;  %v3338_v29 = vsel %vm3331_vm0, %v3334_v35, %v3337_v17  ;;  %vm3539_vm4 = vcmp.lt.s32.totalorder %v3538_v37, 2  ;;  %vm3540_vm10 = vcmp.eq.s32.totalorder %v3538_v37, 0 }
 0x41d   :  { %vm3543_vm5 = vcmp.eq.s32.totalorder %v3538_v37, 2  ;;  %v3542_v59 = vsel %vm3540_vm10, %v8110_v60, %v3541_v52  ;;  %v3221_v57 = vsel %vm8114_vm7, 0, %v3219_v43  ;;  %v3426_v46 = vsub.s32 4, %v8115_v28 }
 0x41e   :  { %v3545_v31 = vsel %vm3543_vm5, %v3544_v33, %v8108_v47  ;;  %vm3536_vm15 = vweird.f32 %v6460_v42  ;;  %v3225_v20 = vadd.s32 3, %v3221_v57  ;;  %v3229_v2 = vxor.u32 2147483648, %v8116_v15 }
 0x41f   :  { %v3546_v54 = vsel %vm3539_vm4, %v3542_v59, %v3545_v31  ;;  %v3339_v55 = vsel %vm3328_vm6, nan, %v3338_v29  ;;  %v3232_v10 = vxor.u32 2147483648, %v8117_v18  ;;  %vm8119_vm12 = vcmp.lt.s32.totalorder %v8118_v22, 0 }
 0x420   :  { %v3547_v4 = vsel %vm3536_vm15, nan, %v3546_v54  ;;  %v3427_v32 = vsel %vm8119_vm12, %v3426_v46, %v8115_v28  ;;  %v3226_v61 = vand.u32 3, %v3225_v20  ;;  %vm8121_vm8 = vnez %v8120_v48  ;;  %v3569_v56 = vpop.permute.xlu0 %3568 }
 0x421   :  { %v3563_v58 = vpack.c.bf16 %v3547_v4, %v3339_v55  ;;  %v3429_v3 = vsel %vm8121_vm8, 0, %v3427_v32  ;;  %v3774_v42 = vcombine.high %v3564_v36, %v3564_v36  ;;  %v3437_v30 = vxor.u32 2147483648, %v8122_v38 }
 0x422   :  { %v3433_v53 = vadd.s32 3, %v3429_v3  ;;  %vm3228_vm2 = vcmp.eq.s32.totalorder %v3226_v61, 0  ;;  %vm3231_vm11 = vcmp.eq.s32.totalorder %v3226_v61, 2  ;;  %v3440_v49 = vxor.u32 2147483648, %v8123_v26 }
 0x423   :  { %3592 = vmatprep.subr.bf16.mxu1 %v3563_v58  ;;  %3610 = vmatprep.mubr.bf16.mxu1 %v3774_v42  ;;  %v3230_v11 = vsel %vm3228_vm2, %v8117_v18, %v3229_v2  ;;  %v3233_v8 = vsel %vm3231_vm11, %v3232_v10, %v8116_v15  ;;  %vm3227_vm9 = vcmp.lt.s32.totalorder %v3226_v61, 2  ;;  %vm3224_vm6 = vweird.f32 %v8111_v0 }
 0x424   :  { %v3434_v40 = vand.u32 3, %v3433_v53  ;;  %v3234_v16 = vsel %vm3227_vm9, %v3230_v11, %v3233_v8  ;;  %vm3432_vm0 = vweird.f32 %v8118_v22  ;;  %v3773_v1 = vcombine.low %v3564_v36, %v3564_v36 }
 0x425   :  { %v3235_v51 = vsel %vm3224_vm6, nan, %v3234_v16 }
 0x426   :  { %vm3436_vm3 = vcmp.eq.s32.totalorder %v3434_v40, 0  ;;  %vm3439_vm13 = vcmp.eq.s32.totalorder %v3434_v40, 2  ;;  %vm3435_vm1 = vcmp.lt.s32.totalorder %v3434_v40, 2 }
 0x427   :  { %v3438_v34 = vsel %vm3436_vm3, %v8123_v26, %v3437_v30  ;;  %v3441_v9 = vsel %vm3439_vm13, %v3440_v49, %v8122_v38 }
 0x428   :  { %v3442_v23 = vsel %vm3435_vm1, %v3438_v34, %v3441_v9 }
 0x429   :  { %v3443_v39 = vsel %vm3432_vm0, nan, %v3442_v23 }
 0x42a   :  { %v3562_v13 = vpack.c.bf16 %v3443_v39, %v3235_v51 }
 0x42c   :  { %3593 = vmatpush1.bf16.xpose.msra.mxu1 %v3562_v13 }
 0x433   :  { %3611 = vmatmul.mubr.bf16.vlgmr.msra.gmra.mrb[0].mxu1 %v3773_v1 }
 0x506   :  { %v3612_v6 = vpop.f32.mrb[0].mxu1 }
 0x507   :  { %v3613_v41 = vadd.f32 %v3612_v6, %v3569_v56  ;;  %v3614_v45 = vpop.f32.mrb[1].mxu1 }
 0x508   :  { %v3615_v19 = vpop.f32.mrb[2].mxu1 }
 0x509   :  { %3618 = vst [vmem:[#allocation2] sm:$0xff] %v3613_v41  ;;  %v3616_v63 = vpop.f32.mrb[3].mxu1 }
 0x50a   :  { %4059 = shalt.err (!%p4056_p4)
}
 0x50b   :  { %s4060_s13 = scalar_lea.hbm %s7381_s5, 128 }
 0x50c   :  { %p4061_p5 = scmp.ne.s32.totalorder %s7381_s5, %s4060_s13  ;;  %p4064_p6 = scmp.lt.u32.totalorder %s4060_s13, %s7381_s5 }
 0x50e   :  { %p4066_p7 = pnand %p4064_p6, %p4061_p5 }
 0x510   :  { %4069 = shalt.err (!%p4066_p7)
}
 0x511   :  { %3628 = dma.vmem_to_hbm [thread:$0]  %s3626_s9, 128, %s7381_s5, [#allocation3]  }
 0x512   :  { %4070 = dma.done.wait [#allocation3], 128  }
 0x513   :  { %4071 = vsyncadd [#allocation3], 4294967168 }
 0x514   :  { %3632 = vsyncpa [#allocation3], 1 }

</bundles_post_ra>
